<compile_context>
chip_gen: v7x
topology: tpu7x:2x2x1
jax: 0.10.0
libtpu: 0.0.40
codegen_flags: <defaults>
</compile_context>

<pallas_src>
import functools

import jax
import jax.numpy as jnp
from jax.experimental import pallas as pl
from jax.experimental.pallas import tpu as pltpu


def _round_up(n, m):
    return ((n + m - 1) // m) * m


def _sigmoid(x):
    # exact sigmoid via a single tanh EUP push (vs exp + reciprocal).
    return 0.5 * jnp.tanh(0.5 * x) + 0.5


# ----------------------------------------------------------------------------
# Fused kernel: K-tiled embedding matmul -> tanh -> LSTM1+tanh -> LSTM2+tanh
# ----------------------------------------------------------------------------
def _make_encoder_kernel(Bp, T, H1p, H2p):
    """Bp (batch padded to 8), T and the 128-padded hidden sizes are static."""

    def kernel(x_ref, wemd_ref, bemd_ref,
               wih1_ref, whh1_ref, b1_ref,
               wih2_ref, whh2_ref, b2_ref,
               out_ref, emb_acc):
        k = pl.program_id(0)

        # ---- 1) Embedding: accumulate x_k @ W_k (bf16 in, f32 acc) ---------
        @pl.when(k == 0)
        def _():
            emb_acc[...] = jnp.zeros_like(emb_acc)

        emb_acc[...] += jnp.dot(x_ref[...], wemd_ref[...],
                                preferred_element_type=jnp.float32)

        # ---- 2) Epilogue (last K-tile): tanh + both LSTM layers ------------
        @pl.when(k == pl.num_programs(0) - 1)
        def _():
            emb = jnp.tanh(emb_acc[...] + bemd_ref[...])       # (T*Bp, Ep) f32

            # LSTM1: input projection hoisted over the whole sequence.
            gx1 = (jnp.dot(emb, wih1_ref[...],
                           preferred_element_type=jnp.float32) + b1_ref[...])
            whh1 = whh1_ref[...]
            h1 = jnp.zeros((Bp, H1p), jnp.float32)
            c1 = jnp.zeros((Bp, H1p), jnp.float32)
            h1_steps = []
            for t in range(T):                                 # static unroll (small T)
                gates = gx1[t * Bp:(t + 1) * Bp, :] + jnp.dot(
                    h1, whh1, preferred_element_type=jnp.float32)
                i = _sigmoid(gates[:, 0 * H1p:1 * H1p])        # 128-lane aligned
                f = _sigmoid(gates[:, 1 * H1p:2 * H1p])
                g = jnp.tanh(gates[:, 2 * H1p:3 * H1p])
                o = _sigmoid(gates[:, 3 * H1p:4 * H1p])
                c1 = f * c1 + i * g
                h1 = o * jnp.tanh(c1)
                h1_steps.append(jnp.tanh(h1))                  # fused outer tanh
            h1_seq = jnp.concatenate(h1_steps, axis=0)         # (T*Bp, H1p), values only

            # LSTM2: hoisted input projection over the whole sequence.
            gx2 = (jnp.dot(h1_seq, wih2_ref[...],
                           preferred_element_type=jnp.float32) + b2_ref[...])
            whh2 = whh2_ref[...]
            h2 = jnp.zeros((Bp, H2p), jnp.float32)
            c2 = jnp.zeros((Bp, H2p), jnp.float32)
            out_steps = []
            for t in range(T):                                 # static unroll (small T)
                gates = gx2[t * Bp:(t + 1) * Bp, :] + jnp.dot(
                    h2, whh2, preferred_element_type=jnp.float32)
                i = _sigmoid(gates[:, 0 * H2p:1 * H2p])
                f = _sigmoid(gates[:, 1 * H2p:2 * H2p])
                g = jnp.tanh(gates[:, 2 * H2p:3 * H2p])
                o = _sigmoid(gates[:, 3 * H2p:4 * H2p])
                c2 = f * c2 + i * g
                h2 = o * jnp.tanh(c2)
                out_steps.append(jnp.tanh(h2))
            # Single lane- and sublane-dense 2-D writeback (time-major).
            out_ref[...] = jnp.concatenate(out_steps, axis=0)  # (T*Bp, H2p)

    return kernel


def dsrae_encoder_forward(x_bf, kparams, d_out, *, tk=128):
    """x_bf: (B, T, d_vol) batch-first f32; kparams: padded params; d_out: d_lstm2."""
    B, T, d_vol = x_bf.shape
    Kp, Ep = kparams["w_emd"].shape
    H1p = kparams["w_hh1"].shape[0]
    H2p = kparams["w_hh2"].shape[0]
    assert Kp % tk == 0
    Bp = _round_up(B, 8)                                       # fill all 8 f32 sublanes
    n_rows = T * Bp

    # Time-major, batch padded to Bp, reduction dim padded to Kp, bf16 stream.
    x_tm = jnp.zeros((T, Bp, Kp), jnp.bfloat16)
    x_tm = x_tm.at[:, :B, :d_vol].set(
        jnp.transpose(x_bf, (1, 0, 2)).astype(jnp.bfloat16))
    x2d = x_tm.reshape(n_rows, Kp)

    out2d = pl.pallas_call(
        _make_encoder_kernel(Bp, T, H1p, H2p),
        out_shape=jax.ShapeDtypeStruct((n_rows, H2p), jnp.float32),
        grid_spec=pltpu.PrefetchScalarGridSpec(
            num_scalar_prefetch=0,
            grid=(Kp // tk,),
            in_specs=[
                pl.BlockSpec((n_rows, tk), lambda k: (0, k)),   # x tile (bf16)
                pl.BlockSpec((tk, Ep), lambda k: (k, 0)),       # W_emd tile (bf16)
                pl.BlockSpec((1, Ep), lambda k: (0, 0)),        # b_emd
                pl.BlockSpec((Ep, 4 * H1p), lambda k: (0, 0)),  # W_ih1
                pl.BlockSpec((H1p, 4 * H1p), lambda k: (0, 0)), # W_hh1
                pl.BlockSpec((1, 4 * H1p), lambda k: (0, 0)),   # b1
                pl.BlockSpec((H1p, 4 * H2p), lambda k: (0, 0)), # W_ih2
                pl.BlockSpec((H2p, 4 * H2p), lambda k: (0, 0)), # W_hh2
                pl.BlockSpec((1, 4 * H2p), lambda k: (0, 0)),   # b2
            ],
            out_specs=pl.BlockSpec((n_rows, H2p), lambda k: (0, 0)),
            scratch_shapes=[pltpu.VMEM((n_rows, Ep), jnp.float32)],  # emb accumulator
        ),
        compiler_params=pltpu.CompilerParams(
            dimension_semantics=("arbitrary",),                 # K is a reduction axis
            vmem_limit_bytes=32 * 1024 * 1024,
        ),
    )(
        x2d,
        kparams["w_emd"], kparams["b_emd"],
        kparams["w_ih1"], kparams["w_hh1"], kparams["b1"],
        kparams["w_ih2"], kparams["w_hh2"], kparams["b2"],
    )
    # (T*Bp, H2p) time-major -> (B, T, d_out) batch-first; drop all padding.
    return jnp.transpose(out2d.reshape(T, Bp, H2p)[:, :B, :d_out], (1, 0, 2))


# ----------------------------------------------------------------------------
# Parameter handling: logical (PyTorch-equivalent) params + padding.
# ----------------------------------------------------------------------------
def init_params(key, d_vol, d_emd, d_lstm1, d_lstm2):
    """Logical params, stored transposed; gate order [i, f, g, o] like PyTorch."""
    ks = jax.random.split(key, 10)

    def u(k, shape, fan):
        bound = 1.0 / jnp.sqrt(jnp.asarray(fan, jnp.float32))
        return jax.random.uniform(k, shape, jnp.float32, -bound, bound)

    return {
        "w_emd": u(ks[0], (d_vol, d_emd), d_vol),
        "b_emd": u(ks[1], (1, d_emd), d_vol),
        "w_ih1": u(ks[2], (d_emd, 4 * d_lstm1), d_lstm1),
        "w_hh1": u(ks[3], (d_lstm1, 4 * d_lstm1), d_lstm1),
        "b1": u(ks[4], (1, 4 * d_lstm1), d_lstm1) + u(ks[5], (1, 4 * d_lstm1), d_lstm1),
        "w_ih2": u(ks[6], (d_lstm1, 4 * d_lstm2), d_lstm2),
        "w_hh2": u(ks[7], (d_lstm2, 4 * d_lstm2), d_lstm2),
        "b2": u(ks[8], (1, 4 * d_lstm2), d_lstm2) + u(ks[9], (1, 4 * d_lstm2), d_lstm2),
    }


def pad_params(p, d_vol, d_emd, d_lstm1, d_lstm2, *, lane=128, tk=128):
    """Zero-pad hidden/embedding dims to 128 lanes, d_vol to a multiple of tk,
    and re-block the 4H gate axis so each gate gets its own 128-lane block.
    Padded bias/weight lanes MUST be exactly zero (correctness relies on it:
    padded gate lanes -> g=tanh(0)=0 -> padded c/h lanes stay 0)."""
    Ep = _round_up(d_emd, lane)
    H1p = _round_up(d_lstm1, lane)
    H2p = _round_up(d_lstm2, lane)
    Kp = _round_up(d_vol, tk)

    def pad2(a, rows, cols, dtype=jnp.float32):
        out = jnp.zeros((rows, cols), dtype)
        return out.at[: a.shape[0], : a.shape[1]].set(a.astype(dtype))

    def pad_gates(w, H, Hp, rows):
        out = jnp.zeros((rows, 4 * Hp), jnp.float32)
        for g in range(4):
            out = out.at[: w.shape[0], g * Hp:g * Hp + H].set(w[:, g * H:(g + 1) * H])
        return out

    return {
        # W_emd streamed in bf16 (halves the dominant HBM transfer).
        "w_emd": pad2(p["w_emd"], Kp, Ep, jnp.bfloat16),
        "b_emd": pad2(p["b_emd"], 1, Ep),
        "w_ih1": pad_gates(p["w_ih1"], d_lstm1, H1p, Ep),
        "w_hh1": pad_gates(p["w_hh1"], d_lstm1, H1p, H1p),
        "b1": pad_gates(p["b1"], d_lstm1, H1p, 1),
        "w_ih2": pad_gates(p["w_ih2"], d_lstm2, H2p, H1p),
        "w_hh2": pad_gates(p["w_hh2"], d_lstm2, H2p, H2p),
        "b2": pad_gates(p["b2"], d_lstm2, H2p, 1),
    }


# ----------------------------------------------------------------------------
# Pure-JAX reference (same math; embedding matmul uses the same bf16 rounding
# as the kernel's bf16 MXU stream, accumulation in f32).
# ----------------------------------------------------------------------------
def _lstm_ref(x_tmaj, w_ih_t, w_hh_t, b):
    H = w_hh_t.shape[0]
    B = x_tmaj.shape[1]

    def step(carry, x_t):
        h, c = carry
        gates = x_t @ w_ih_t + h @ w_hh_t + b
        i = jax.nn.sigmoid(gates[:, 0 * H:1 * H])
        f = jax.nn.sigmoid(gates[:, 1 * H:2 * H])
        g = jnp.tanh(gates[:, 2 * H:3 * H])
        o = jax.nn.sigmoid(gates[:, 3 * H:4 * H])
        c = f * c + i * g
        h = o * jnp.tanh(c)
        return (h, c), h

    init = (jnp.zeros((B, H), jnp.float32), jnp.zeros((B, H), jnp.float32))
    _, hs = jax.lax.scan(step, init, x_tmaj)
    return hs


def _forward_ref(x_bf, p):
    B, T, d_vol = x_bf.shape
    xe = x_bf.reshape(B * T, d_vol).astype(jnp.bfloat16).astype(jnp.float32)
    we = p["w_emd"].astype(jnp.bfloat16).astype(jnp.float32)
    emd = jnp.tanh(xe @ we + p["b_emd"])
    emd = emd.reshape(B, T, -1).transpose(1, 0, 2)
    h1 = jnp.tanh(_lstm_ref(emd, p["w_ih1"], p["w_hh1"], p["b1"]))
    h2 = jnp.tanh(_lstm_ref(h1, p["w_ih2"], p["w_hh2"], p["b2"]))
    return h2.transpose(1, 0, 2)


if __name__ == "__main__":
    # Small shapes consistent with the module's forward (B, T, d_vol).
    B, T = 2, 8
    d_vol, d_emd, d_lstm1, d_lstm2 = 256, 128, 64, 32
    tk = 128                                                  # K-tile; grid=(2,) here

    key = jax.random.PRNGKey(0)
    k_x, k_p = jax.random.split(key)
    x = jax.random.normal(k_x, (B, T, d_vol), jnp.float32)

    params = init_params(k_p, d_vol, d_emd, d_lstm1, d_lstm2)
    kparams = pad_params(params, d_vol, d_emd, d_lstm1, d_lstm2, tk=tk)

    fwd = functools.partial(dsrae_encoder_forward, d_out=d_lstm2, tk=tk)
    out = jax.block_until_ready(fwd(x, kparams))
    assert out.shape == (B, T, d_lstm2), out.shape

    ref = jax.block_until_ready(_forward_ref(x, params))
    err = float(jnp.max(jnp.abs(out - ref)))
    assert jnp.allclose(out, ref, atol=3e-4, rtol=3e-4), err

    print("KERNEL_OK")
</pallas_src>

<mosaic_0001>
module attributes {stable_mosaic.version = 11 : i64} {
  func.func @kernel(%arg0: i32, %arg1: memref<64x128xbf16, #tpu.memory_space<vmem>>, %arg2: memref<128x128xbf16, #tpu.memory_space<vmem>>, %arg3: memref<1x128xf32, #tpu.memory_space<vmem>>, %arg4: memref<128x512xf32, #tpu.memory_space<vmem>>, %arg5: memref<128x512xf32, #tpu.memory_space<vmem>>, %arg6: memref<1x512xf32, #tpu.memory_space<vmem>>, %arg7: memref<128x512xf32, #tpu.memory_space<vmem>>, %arg8: memref<128x512xf32, #tpu.memory_space<vmem>>, %arg9: memref<1x512xf32, #tpu.memory_space<vmem>>, %arg10: memref<64x128xf32, #tpu.memory_space<vmem>>, %arg11: memref<64x128xf32, #tpu.memory_space<vmem>>) attributes {dimension_semantics = [#tpu.dimension_semantics<arbitrary>], iteration_bounds = array<i64: 2>, scalar_prefetch = 0 : i64, scratch_operands = 1 : i64, tpu.core_type = #tpu.core_type<tc>, window_params = [{transform_indices = @transform_0, window_bounds = array<i64: 64, 128>}, {transform_indices = @transform_1, window_bounds = array<i64: 128, 128>}, {pipeline_mode = #tpu.pipeline_mode<synchronous>, transform_indices = @transform_2, window_bounds = array<i64: 1, 128>}, {pipeline_mode = #tpu.pipeline_mode<synchronous>, transform_indices = @transform_3, window_bounds = array<i64: 128, 512>}, {pipeline_mode = #tpu.pipeline_mode<synchronous>, transform_indices = @transform_4, window_bounds = array<i64: 128, 512>}, {pipeline_mode = #tpu.pipeline_mode<synchronous>, transform_indices = @transform_5, window_bounds = array<i64: 1, 512>}, {pipeline_mode = #tpu.pipeline_mode<synchronous>, transform_indices = @transform_6, window_bounds = array<i64: 128, 512>}, {pipeline_mode = #tpu.pipeline_mode<synchronous>, transform_indices = @transform_7, window_bounds = array<i64: 128, 512>}, {pipeline_mode = #tpu.pipeline_mode<synchronous>, transform_indices = @transform_8, window_bounds = array<i64: 1, 512>}, {pipeline_mode = #tpu.pipeline_mode<synchronous>, transform_indices = @transform_9, window_bounds = array<i64: 64, 128>}]} {
    %c0_i32 = arith.constant 0 : i32
    %0 = arith.cmpi eq, %arg0, %c0_i32 : i32
    %1 = arith.extui %0 : i1 to i32
    %c0_i32_0 = arith.constant 0 : i32
    %2 = arith.cmpi ne, %1, %c0_i32_0 : i32
    scf.if %2 {
      %cst_9 = arith.constant 0.000000e+00 : f32
      %12 = vector.broadcast %cst_9 : f32 to vector<64x128xf32>
      %c0_10 = arith.constant 0 : index
      %c0_11 = arith.constant 0 : index
      %13 = vector.load %arg11[%c0_10, %c0_11] : memref<64x128xf32, #tpu.memory_space<vmem>>, vector<64x128xf32>
      tpu.vector_store %arg11[%c0_10, %c0_11], %12 {strides = array<i32>} : memref<64x128xf32, #tpu.memory_space<vmem>>, vector<64x128xf32>,
    } else {
    }
    %c0 = arith.constant 0 : index
    %c0_1 = arith.constant 0 : index
    %3 = vector.load %arg11[%c0, %c0_1] : memref<64x128xf32, #tpu.memory_space<vmem>>, vector<64x128xf32>
    %c0_2 = arith.constant 0 : index
    %c0_3 = arith.constant 0 : index
    %4 = vector.load %arg1[%c0_2, %c0_3] : memref<64x128xbf16, #tpu.memory_space<vmem>>, vector<64x128xbf16>
    %c0_4 = arith.constant 0 : index
    %c0_5 = arith.constant 0 : index
    %5 = vector.load %arg2[%c0_4, %c0_5] : memref<128x128xbf16, #tpu.memory_space<vmem>>, vector<128x128xbf16>
    %cst = arith.constant dense<0.000000e+00> : vector<64x128xf32>
    %6 = tpu.matmul %4, %5, %cst {dimension_numbers = #tpu.dot_dimension_numbers<[1], [0], [0], [1], [0, 0, 1, 1], [], []>} : vector<64x128xbf16>, vector<128x128xbf16>, vector<64x128xf32> -> vector<64x128xf32>
    %7 = arith.addf %3, %6 : vector<64x128xf32>
    %c0_6 = arith.constant 0 : index
    %c0_7 = arith.constant 0 : index
    %8 = vector.load %arg11[%c0_6, %c0_7] : memref<64x128xf32, #tpu.memory_space<vmem>>, vector<64x128xf32>
    tpu.vector_store %arg11[%c0_6, %c0_7], %7 {strides = array<i32>} : memref<64x128xf32, #tpu.memory_space<vmem>>, vector<64x128xf32>,
    %c1_i32 = arith.constant 1 : i32
    %9 = arith.cmpi eq, %arg0, %c1_i32 : i32
    %10 = arith.extui %9 : i1 to i32
    %c0_i32_8 = arith.constant 0 : i32
    %11 = arith.cmpi ne, %10, %c0_i32_8 : i32
    scf.if %11 {
      %c0_9 = arith.constant 0 : index
      %c0_10 = arith.constant 0 : index
      %12 = vector.load %arg11[%c0_9, %c0_10] : memref<64x128xf32, #tpu.memory_space<vmem>>, vector<64x128xf32>
      %c0_11 = arith.constant 0 : index
      %c0_12 = arith.constant 0 : index
      %13 = vector.load %arg3[%c0_11, %c0_12] : memref<1x128xf32, #tpu.memory_space<vmem>>, vector<1x128xf32>
      %14 = vector.broadcast %13 : vector<1x128xf32> to vector<64x128xf32>
      %15 = arith.addf %12, %14 : vector<64x128xf32>
      %16 = math.tanh %15 : vector<64x128xf32>
      %c0_13 = arith.constant 0 : index
      %c0_14 = arith.constant 0 : index
      %17 = vector.load %arg4[%c0_13, %c0_14] : memref<128x512xf32, #tpu.memory_space<vmem>>, vector<128x512xf32>
      %cst_15 = arith.constant dense<0.000000e+00> : vector<64x512xf32>
      %18 = tpu.matmul %16, %17, %cst_15 {dimension_numbers = #tpu.dot_dimension_numbers<[1], [0], [0], [1], [0, 0, 1, 1], [], []>} : vector<64x128xf32>, vector<128x512xf32>, vector<64x512xf32> -> vector<64x512xf32>
      %c0_16 = arith.constant 0 : index
      %c0_17 = arith.constant 0 : index
      %19 = vector.load %arg6[%c0_16, %c0_17] : memref<1x512xf32, #tpu.memory_space<vmem>>, vector<1x512xf32>
      %20 = vector.broadcast %19 : vector<1x512xf32> to vector<64x512xf32>
      %21 = arith.addf %18, %20 : vector<64x512xf32>
      %c0_18 = arith.constant 0 : index
      %c0_19 = arith.constant 0 : index
      %22 = vector.load %arg5[%c0_18, %c0_19] : memref<128x512xf32, #tpu.memory_space<vmem>>, vector<128x512xf32>
      %cst_20 = arith.constant 0.000000e+00 : f32
      %23 = vector.broadcast %cst_20 : f32 to vector<8x128xf32>
      %cst_21 = arith.constant 0.000000e+00 : f32
      %24 = vector.broadcast %cst_21 : f32 to vector<8x128xf32>
      %25 = vector.extract_strided_slice %21 {offsets = [0, 0], sizes = [8, 512], strides = [1, 1]} : vector<64x512xf32> to vector<8x512xf32>
      %cst_22 = arith.constant dense<0.000000e+00> : vector<8x512xf32>
      %26 = tpu.matmul %23, %22, %cst_22 {dimension_numbers = #tpu.dot_dimension_numbers<[1], [0], [0], [1], [0, 0, 1, 1], [], []>} : vector<8x128xf32>, vector<128x512xf32>, vector<8x512xf32> -> vector<8x512xf32>
      %27 = arith.addf %25, %26 : vector<8x512xf32>
      %28 = vector.extract_strided_slice %27 {offsets = [0, 0], sizes = [8, 128], strides = [1, 1]} : vector<8x512xf32> to vector<8x128xf32>
      %cst_23 = arith.constant 5.000000e-01 : f32
      %29 = vector.broadcast %cst_23 : f32 to vector<8x128xf32>
      %30 = arith.mulf %29, %28 : vector<8x128xf32>
      %31 = math.tanh %30 : vector<8x128xf32>
      %cst_24 = arith.constant 5.000000e-01 : f32
      %32 = vector.broadcast %cst_24 : f32 to vector<8x128xf32>
      %33 = arith.mulf %32, %31 : vector<8x128xf32>
      %cst_25 = arith.constant 5.000000e-01 : f32
      %34 = vector.broadcast %cst_25 : f32 to vector<8x128xf32>
      %35 = arith.addf %33, %34 : vector<8x128xf32>
      %36 = vector.extract_strided_slice %27 {offsets = [0, 128], sizes = [8, 128], strides = [1, 1]} : vector<8x512xf32> to vector<8x128xf32>
      %cst_26 = arith.constant 5.000000e-01 : f32
      %37 = vector.broadcast %cst_26 : f32 to vector<8x128xf32>
      %38 = arith.mulf %37, %36 : vector<8x128xf32>
      %39 = math.tanh %38 : vector<8x128xf32>
      %cst_27 = arith.constant 5.000000e-01 : f32
      %40 = vector.broadcast %cst_27 : f32 to vector<8x128xf32>
      %41 = arith.mulf %40, %39 : vector<8x128xf32>
      %cst_28 = arith.constant 5.000000e-01 : f32
      %42 = vector.broadcast %cst_28 : f32 to vector<8x128xf32>
      %43 = arith.addf %41, %42 : vector<8x128xf32>
      %44 = vector.extract_strided_slice %27 {offsets = [0, 256], sizes = [8, 128], strides = [1, 1]} : vector<8x512xf32> to vector<8x128xf32>
      %45 = math.tanh %44 : vector<8x128xf32>
      %46 = vector.extract_strided_slice %27 {offsets = [0, 384], sizes = [8, 128], strides = [1, 1]} : vector<8x512xf32> to vector<8x128xf32>
      %cst_29 = arith.constant 5.000000e-01 : f32
      %47 = vector.broadcast %cst_29 : f32 to vector<8x128xf32>
      %48 = arith.mulf %47, %46 : vector<8x128xf32>
      %49 = math.tanh %48 : vector<8x128xf32>
      %cst_30 = arith.constant 5.000000e-01 : f32
      %50 = vector.broadcast %cst_30 : f32 to vector<8x128xf32>
      %51 = arith.mulf %50, %49 : vector<8x128xf32>
      %cst_31 = arith.constant 5.000000e-01 : f32
      %52 = vector.broadcast %cst_31 : f32 to vector<8x128xf32>
      %53 = arith.addf %51, %52 : vector<8x128xf32>
      %54 = arith.mulf %43, %24 : vector<8x128xf32>
      %55 = arith.mulf %35, %45 : vector<8x128xf32>
      %56 = arith.addf %54, %55 : vector<8x128xf32>
      %57 = math.tanh %56 : vector<8x128xf32>
      %58 = arith.mulf %53, %57 : vector<8x128xf32>
      %59 = math.tanh %58 : vector<8x128xf32>
      %60 = vector.extract_strided_slice %21 {offsets = [8, 0], sizes = [8, 512], strides = [1, 1]} : vector<64x512xf32> to vector<8x512xf32>
      %cst_32 = arith.constant dense<0.000000e+00> : vector<8x512xf32>
      %61 = tpu.matmul %58, %22, %cst_32 {dimension_numbers = #tpu.dot_dimension_numbers<[1], [0], [0], [1], [0, 0, 1, 1], [], []>} : vector<8x128xf32>, vector<128x512xf32>, vector<8x512xf32> -> vector<8x512xf32>
      %62 = arith.addf %60, %61 : vector<8x512xf32>
      %63 = vector.extract_strided_slice %62 {offsets = [0, 0], sizes = [8, 128], strides = [1, 1]} : vector<8x512xf32> to vector<8x128xf32>
      %cst_33 = arith.constant 5.000000e-01 : f32
      %64 = vector.broadcast %cst_33 : f32 to vector<8x128xf32>
      %65 = arith.mulf %64, %63 : vector<8x128xf32>
      %66 = math.tanh %65 : vector<8x128xf32>
      %cst_34 = arith.constant 5.000000e-01 : f32
      %67 = vector.broadcast %cst_34 : f32 to vector<8x128xf32>
      %68 = arith.mulf %67, %66 : vector<8x128xf32>
      %cst_35 = arith.constant 5.000000e-01 : f32
      %69 = vector.broadcast %cst_35 : f32 to vector<8x128xf32>
      %70 = arith.addf %68, %69 : vector<8x128xf32>
      %71 = vector.extract_strided_slice %62 {offsets = [0, 128], sizes = [8, 128], strides = [1, 1]} : vector<8x512xf32> to vector<8x128xf32>
      %cst_36 = arith.constant 5.000000e-01 : f32
      %72 = vector.broadcast %cst_36 : f32 to vector<8x128xf32>
      %73 = arith.mulf %72, %71 : vector<8x128xf32>
      %74 = math.tanh %73 : vector<8x128xf32>
      %cst_37 = arith.constant 5.000000e-01 : f32
      %75 = vector.broadcast %cst_37 : f32 to vector<8x128xf32>
      %76 = arith.mulf %75, %74 : vector<8x128xf32>
      %cst_38 = arith.constant 5.000000e-01 : f32
      %77 = vector.broadcast %cst_38 : f32 to vector<8x128xf32>
      %78 = arith.addf %76, %77 : vector<8x128xf32>
      %79 = vector.extract_strided_slice %62 {offsets = [0, 256], sizes = [8, 128], strides = [1, 1]} : vector<8x512xf32> to vector<8x128xf32>
      %80 = math.tanh %79 : vector<8x128xf32>
      %81 = vector.extract_strided_slice %62 {offsets = [0, 384], sizes = [8, 128], strides = [1, 1]} : vector<8x512xf32> to vector<8x128xf32>
      %cst_39 = arith.constant 5.000000e-01 : f32
      %82 = vector.broadcast %cst_39 : f32 to vector<8x128xf32>
      %83 = arith.mulf %82, %81 : vector<8x128xf32>
      %84 = math.tanh %83 : vector<8x128xf32>
      %cst_40 = arith.constant 5.000000e-01 : f32
      %85 = vector.broadcast %cst_40 : f32 to vector<8x128xf32>
      %86 = arith.mulf %85, %84 : vector<8x128xf32>
      %cst_41 = arith.constant 5.000000e-01 : f32
      %87 = vector.broadcast %cst_41 : f32 to vector<8x128xf32>
      %88 = arith.addf %86, %87 : vector<8x128xf32>
      %89 = arith.mulf %78, %56 : vector<8x128xf32>
      %90 = arith.mulf %70, %80 : vector<8x128xf32>
      %91 = arith.addf %89, %90 : vector<8x128xf32>
      %92 = math.tanh %91 : vector<8x128xf32>
      %93 = arith.mulf %88, %92 : vector<8x128xf32>
      %94 = math.tanh %93 : vector<8x128xf32>
      %95 = vector.extract_strided_slice %21 {offsets = [16, 0], sizes = [8, 512], strides = [1, 1]} : vector<64x512xf32> to vector<8x512xf32>
      %cst_42 = arith.constant dense<0.000000e+00> : vector<8x512xf32>
      %96 = tpu.matmul %93, %22, %cst_42 {dimension_numbers = #tpu.dot_dimension_numbers<[1], [0], [0], [1], [0, 0, 1, 1], [], []>} : vector<8x128xf32>, vector<128x512xf32>, vector<8x512xf32> -> vector<8x512xf32>
      %97 = arith.addf %95, %96 : vector<8x512xf32>
      %98 = vector.extract_strided_slice %97 {offsets = [0, 0], sizes = [8, 128], strides = [1, 1]} : vector<8x512xf32> to vector<8x128xf32>
      %cst_43 = arith.constant 5.000000e-01 : f32
      %99 = vector.broadcast %cst_43 : f32 to vector<8x128xf32>
      %100 = arith.mulf %99, %98 : vector<8x128xf32>
      %101 = math.tanh %100 : vector<8x128xf32>
      %cst_44 = arith.constant 5.000000e-01 : f32
      %102 = vector.broadcast %cst_44 : f32 to vector<8x128xf32>
      %103 = arith.mulf %102, %101 : vector<8x128xf32>
      %cst_45 = arith.constant 5.000000e-01 : f32
      %104 = vector.broadcast %cst_45 : f32 to vector<8x128xf32>
      %105 = arith.addf %103, %104 : vector<8x128xf32>
      %106 = vector.extract_strided_slice %97 {offsets = [0, 128], sizes = [8, 128], strides = [1, 1]} : vector<8x512xf32> to vector<8x128xf32>
      %cst_46 = arith.constant 5.000000e-01 : f32
      %107 = vector.broadcast %cst_46 : f32 to vector<8x128xf32>
      %108 = arith.mulf %107, %106 : vector<8x128xf32>
      %109 = math.tanh %108 : vector<8x128xf32>
      %cst_47 = arith.constant 5.000000e-01 : f32
      %110 = vector.broadcast %cst_47 : f32 to vector<8x128xf32>
      %111 = arith.mulf %110, %109 : vector<8x128xf32>
      %cst_48 = arith.constant 5.000000e-01 : f32
      %112 = vector.broadcast %cst_48 : f32 to vector<8x128xf32>
      %113 = arith.addf %111, %112 : vector<8x128xf32>
      %114 = vector.extract_strided_slice %97 {offsets = [0, 256], sizes = [8, 128], strides = [1, 1]} : vector<8x512xf32> to vector<8x128xf32>
      %115 = math.tanh %114 : vector<8x128xf32>
      %116 = vector.extract_strided_slice %97 {offsets = [0, 384], sizes = [8, 128], strides = [1, 1]} : vector<8x512xf32> to vector<8x128xf32>
      %cst_49 = arith.constant 5.000000e-01 : f32
      %117 = vector.broadcast %cst_49 : f32 to vector<8x128xf32>
      %118 = arith.mulf %117, %116 : vector<8x128xf32>
      %119 = math.tanh %118 : vector<8x128xf32>
      %cst_50 = arith.constant 5.000000e-01 : f32
      %120 = vector.broadcast %cst_50 : f32 to vector<8x128xf32>
      %121 = arith.mulf %120, %119 : vector<8x128xf32>
      %cst_51 = arith.constant 5.000000e-01 : f32
      %122 = vector.broadcast %cst_51 : f32 to vector<8x128xf32>
      %123 = arith.addf %121, %122 : vector<8x128xf32>
      %124 = arith.mulf %113, %91 : vector<8x128xf32>
      %125 = arith.mulf %105, %115 : vector<8x128xf32>
      %126 = arith.addf %124, %125 : vector<8x128xf32>
      %127 = math.tanh %126 : vector<8x128xf32>
      %128 = arith.mulf %123, %127 : vector<8x128xf32>
      %129 = math.tanh %128 : vector<8x128xf32>
      %130 = vector.extract_strided_slice %21 {offsets = [24, 0], sizes = [8, 512], strides = [1, 1]} : vector<64x512xf32> to vector<8x512xf32>
      %cst_52 = arith.constant dense<0.000000e+00> : vector<8x512xf32>
      %131 = tpu.matmul %128, %22, %cst_52 {dimension_numbers = #tpu.dot_dimension_numbers<[1], [0], [0], [1], [0, 0, 1, 1], [], []>} : vector<8x128xf32>, vector<128x512xf32>, vector<8x512xf32> -> vector<8x512xf32>
      %132 = arith.addf %130, %131 : vector<8x512xf32>
      %133 = vector.extract_strided_slice %132 {offsets = [0, 0], sizes = [8, 128], strides = [1, 1]} : vector<8x512xf32> to vector<8x128xf32>
      %cst_53 = arith.constant 5.000000e-01 : f32
      %134 = vector.broadcast %cst_53 : f32 to vector<8x128xf32>
      %135 = arith.mulf %134, %133 : vector<8x128xf32>
      %136 = math.tanh %135 : vector<8x128xf32>
      %cst_54 = arith.constant 5.000000e-01 : f32
      %137 = vector.broadcast %cst_54 : f32 to vector<8x128xf32>
      %138 = arith.mulf %137, %136 : vector<8x128xf32>
      %cst_55 = arith.constant 5.000000e-01 : f32
      %139 = vector.broadcast %cst_55 : f32 to vector<8x128xf32>
      %140 = arith.addf %138, %139 : vector<8x128xf32>
      %141 = vector.extract_strided_slice %132 {offsets = [0, 128], sizes = [8, 128], strides = [1, 1]} : vector<8x512xf32> to vector<8x128xf32>
      %cst_56 = arith.constant 5.000000e-01 : f32
      %142 = vector.broadcast %cst_56 : f32 to vector<8x128xf32>
      %143 = arith.mulf %142, %141 : vector<8x128xf32>
      %144 = math.tanh %143 : vector<8x128xf32>
      %cst_57 = arith.constant 5.000000e-01 : f32
      %145 = vector.broadcast %cst_57 : f32 to vector<8x128xf32>
      %146 = arith.mulf %145, %144 : vector<8x128xf32>
      %cst_58 = arith.constant 5.000000e-01 : f32
      %147 = vector.broadcast %cst_58 : f32 to vector<8x128xf32>
      %148 = arith.addf %146, %147 : vector<8x128xf32>
      %149 = vector.extract_strided_slice %132 {offsets = [0, 256], sizes = [8, 128], strides = [1, 1]} : vector<8x512xf32> to vector<8x128xf32>
      %150 = math.tanh %149 : vector<8x128xf32>
      %151 = vector.extract_strided_slice %132 {offsets = [0, 384], sizes = [8, 128], strides = [1, 1]} : vector<8x512xf32> to vector<8x128xf32>
      %cst_59 = arith.constant 5.000000e-01 : f32
      %152 = vector.broadcast %cst_59 : f32 to vector<8x128xf32>
      %153 = arith.mulf %152, %151 : vector<8x128xf32>
      %154 = math.tanh %153 : vector<8x128xf32>
      %cst_60 = arith.constant 5.000000e-01 : f32
      %155 = vector.broadcast %cst_60 : f32 to vector<8x128xf32>
      %156 = arith.mulf %155, %154 : vector<8x128xf32>
      %cst_61 = arith.constant 5.000000e-01 : f32
      %157 = vector.broadcast %cst_61 : f32 to vector<8x128xf32>
      %158 = arith.addf %156, %157 : vector<8x128xf32>
      %159 = arith.mulf %148, %126 : vector<8x128xf32>
      %160 = arith.mulf %140, %150 : vector<8x128xf32>
      %161 = arith.addf %159, %160 : vector<8x128xf32>
      %162 = math.tanh %161 : vector<8x128xf32>
      %163 = arith.mulf %158, %162 : vector<8x128xf32>
      %164 = math.tanh %163 : vector<8x128xf32>
      %165 = vector.extract_strided_slice %21 {offsets = [32, 0], sizes = [8, 512], strides = [1, 1]} : vector<64x512xf32> to vector<8x512xf32>
      %cst_62 = arith.constant dense<0.000000e+00> : vector<8x512xf32>
      %166 = tpu.matmul %163, %22, %cst_62 {dimension_numbers = #tpu.dot_dimension_numbers<[1], [0], [0], [1], [0, 0, 1, 1], [], []>} : vector<8x128xf32>, vector<128x512xf32>, vector<8x512xf32> -> vector<8x512xf32>
      %167 = arith.addf %165, %166 : vector<8x512xf32>
      %168 = vector.extract_strided_slice %167 {offsets = [0, 0], sizes = [8, 128], strides = [1, 1]} : vector<8x512xf32> to vector<8x128xf32>
      %cst_63 = arith.constant 5.000000e-01 : f32
      %169 = vector.broadcast %cst_63 : f32 to vector<8x128xf32>
      %170 = arith.mulf %169, %168 : vector<8x128xf32>
      %171 = math.tanh %170 : vector<8x128xf32>
      %cst_64 = arith.constant 5.000000e-01 : f32
      %172 = vector.broadcast %cst_64 : f32 to vector<8x128xf32>
      %173 = arith.mulf %172, %171 : vector<8x128xf32>
      %cst_65 = arith.constant 5.000000e-01 : f32
      %174 = vector.broadcast %cst_65 : f32 to vector<8x128xf32>
      %175 = arith.addf %173, %174 : vector<8x128xf32>
      %176 = vector.extract_strided_slice %167 {offsets = [0, 128], sizes = [8, 128], strides = [1, 1]} : vector<8x512xf32> to vector<8x128xf32>
      %cst_66 = arith.constant 5.000000e-01 : f32
      %177 = vector.broadcast %cst_66 : f32 to vector<8x128xf32>
      %178 = arith.mulf %177, %176 : vector<8x128xf32>
      %179 = math.tanh %178 : vector<8x128xf32>
      %cst_67 = arith.constant 5.000000e-01 : f32
      %180 = vector.broadcast %cst_67 : f32 to vector<8x128xf32>
      %181 = arith.mulf %180, %179 : vector<8x128xf32>
      %cst_68 = arith.constant 5.000000e-01 : f32
      %182 = vector.broadcast %cst_68 : f32 to vector<8x128xf32>
      %183 = arith.addf %181, %182 : vector<8x128xf32>
      %184 = vector.extract_strided_slice %167 {offsets = [0, 256], sizes = [8, 128], strides = [1, 1]} : vector<8x512xf32> to vector<8x128xf32>
      %185 = math.tanh %184 : vector<8x128xf32>
      %186 = vector.extract_strided_slice %167 {offsets = [0, 384], sizes = [8, 128], strides = [1, 1]} : vector<8x512xf32> to vector<8x128xf32>
      %cst_69 = arith.constant 5.000000e-01 : f32
      %187 = vector.broadcast %cst_69 : f32 to vector<8x128xf32>
      %188 = arith.mulf %187, %186 : vector<8x128xf32>
      %189 = math.tanh %188 : vector<8x128xf32>
      %cst_70 = arith.constant 5.000000e-01 : f32
      %190 = vector.broadcast %cst_70 : f32 to vector<8x128xf32>
      %191 = arith.mulf %190, %189 : vector<8x128xf32>
      %cst_71 = arith.constant 5.000000e-01 : f32
      %192 = vector.broadcast %cst_71 : f32 to vector<8x128xf32>
      %193 = arith.addf %191, %192 : vector<8x128xf32>
      %194 = arith.mulf %183, %161 : vector<8x128xf32>
      %195 = arith.mulf %175, %185 : vector<8x128xf32>
      %196 = arith.addf %194, %195 : vector<8x128xf32>
      %197 = math.tanh %196 : vector<8x128xf32>
      %198 = arith.mulf %193, %197 : vector<8x128xf32>
      %199 = math.tanh %198 : vector<8x128xf32>
      %200 = vector.extract_strided_slice %21 {offsets = [40, 0], sizes = [8, 512], strides = [1, 1]} : vector<64x512xf32> to vector<8x512xf32>
      %cst_72 = arith.constant dense<0.000000e+00> : vector<8x512xf32>
      %201 = tpu.matmul %198, %22, %cst_72 {dimension_numbers = #tpu.dot_dimension_numbers<[1], [0], [0], [1], [0, 0, 1, 1], [], []>} : vector<8x128xf32>, vector<128x512xf32>, vector<8x512xf32> -> vector<8x512xf32>
      %202 = arith.addf %200, %201 : vector<8x512xf32>
      %203 = vector.extract_strided_slice %202 {offsets = [0, 0], sizes = [8, 128], strides = [1, 1]} : vector<8x512xf32> to vector<8x128xf32>
      %cst_73 = arith.constant 5.000000e-01 : f32
      %204 = vector.broadcast %cst_73 : f32 to vector<8x128xf32>
      %205 = arith.mulf %204, %203 : vector<8x128xf32>
      %206 = math.tanh %205 : vector<8x128xf32>
      %cst_74 = arith.constant 5.000000e-01 : f32
      %207 = vector.broadcast %cst_74 : f32 to vector<8x128xf32>
      %208 = arith.mulf %207, %206 : vector<8x128xf32>
      %cst_75 = arith.constant 5.000000e-01 : f32
      %209 = vector.broadcast %cst_75 : f32 to vector<8x128xf32>
      %210 = arith.addf %208, %209 : vector<8x128xf32>
      %211 = vector.extract_strided_slice %202 {offsets = [0, 128], sizes = [8, 128], strides = [1, 1]} : vector<8x512xf32> to vector<8x128xf32>
      %cst_76 = arith.constant 5.000000e-01 : f32
      %212 = vector.broadcast %cst_76 : f32 to vector<8x128xf32>
      %213 = arith.mulf %212, %211 : vector<8x128xf32>
      %214 = math.tanh %213 : vector<8x128xf32>
      %cst_77 = arith.constant 5.000000e-01 : f32
      %215 = vector.broadcast %cst_77 : f32 to vector<8x128xf32>
      %216 = arith.mulf %215, %214 : vector<8x128xf32>
      %cst_78 = arith.constant 5.000000e-01 : f32
      %217 = vector.broadcast %cst_78 : f32 to vector<8x128xf32>
      %218 = arith.addf %216, %217 : vector<8x128xf32>
      %219 = vector.extract_strided_slice %202 {offsets = [0, 256], sizes = [8, 128], strides = [1, 1]} : vector<8x512xf32> to vector<8x128xf32>
      %220 = math.tanh %219 : vector<8x128xf32>
      %221 = vector.extract_strided_slice %202 {offsets = [0, 384], sizes = [8, 128], strides = [1, 1]} : vector<8x512xf32> to vector<8x128xf32>
      %cst_79 = arith.constant 5.000000e-01 : f32
      %222 = vector.broadcast %cst_79 : f32 to vector<8x128xf32>
      %223 = arith.mulf %222, %221 : vector<8x128xf32>
      %224 = math.tanh %223 : vector<8x128xf32>
      %cst_80 = arith.constant 5.000000e-01 : f32
      %225 = vector.broadcast %cst_80 : f32 to vector<8x128xf32>
      %226 = arith.mulf %225, %224 : vector<8x128xf32>
      %cst_81 = arith.constant 5.000000e-01 : f32
      %227 = vector.broadcast %cst_81 : f32 to vector<8x128xf32>
      %228 = arith.addf %226, %227 : vector<8x128xf32>
      %229 = arith.mulf %218, %196 : vector<8x128xf32>
      %230 = arith.mulf %210, %220 : vector<8x128xf32>
      %231 = arith.addf %229, %230 : vector<8x128xf32>
      %232 = math.tanh %231 : vector<8x128xf32>
      %233 = arith.mulf %228, %232 : vector<8x128xf32>
      %234 = math.tanh %233 : vector<8x128xf32>
      %235 = vector.extract_strided_slice %21 {offsets = [48, 0], sizes = [8, 512], strides = [1, 1]} : vector<64x512xf32> to vector<8x512xf32>
      %cst_82 = arith.constant dense<0.000000e+00> : vector<8x512xf32>
      %236 = tpu.matmul %233, %22, %cst_82 {dimension_numbers = #tpu.dot_dimension_numbers<[1], [0], [0], [1], [0, 0, 1, 1], [], []>} : vector<8x128xf32>, vector<128x512xf32>, vector<8x512xf32> -> vector<8x512xf32>
      %237 = arith.addf %235, %236 : vector<8x512xf32>
      %238 = vector.extract_strided_slice %237 {offsets = [0, 0], sizes = [8, 128], strides = [1, 1]} : vector<8x512xf32> to vector<8x128xf32>
      %cst_83 = arith.constant 5.000000e-01 : f32
      %239 = vector.broadcast %cst_83 : f32 to vector<8x128xf32>
      %240 = arith.mulf %239, %238 : vector<8x128xf32>
      %241 = math.tanh %240 : vector<8x128xf32>
      %cst_84 = arith.constant 5.000000e-01 : f32
      %242 = vector.broadcast %cst_84 : f32 to vector<8x128xf32>
      %243 = arith.mulf %242, %241 : vector<8x128xf32>
      %cst_85 = arith.constant 5.000000e-01 : f32
      %244 = vector.broadcast %cst_85 : f32 to vector<8x128xf32>
      %245 = arith.addf %243, %244 : vector<8x128xf32>
      %246 = vector.extract_strided_slice %237 {offsets = [0, 128], sizes = [8, 128], strides = [1, 1]} : vector<8x512xf32> to vector<8x128xf32>
      %cst_86 = arith.constant 5.000000e-01 : f32
      %247 = vector.broadcast %cst_86 : f32 to vector<8x128xf32>
      %248 = arith.mulf %247, %246 : vector<8x128xf32>
      %249 = math.tanh %248 : vector<8x128xf32>
      %cst_87 = arith.constant 5.000000e-01 : f32
      %250 = vector.broadcast %cst_87 : f32 to vector<8x128xf32>
      %251 = arith.mulf %250, %249 : vector<8x128xf32>
      %cst_88 = arith.constant 5.000000e-01 : f32
      %252 = vector.broadcast %cst_88 : f32 to vector<8x128xf32>
      %253 = arith.addf %251, %252 : vector<8x128xf32>
      %254 = vector.extract_strided_slice %237 {offsets = [0, 256], sizes = [8, 128], strides = [1, 1]} : vector<8x512xf32> to vector<8x128xf32>
      %255 = math.tanh %254 : vector<8x128xf32>
      %256 = vector.extract_strided_slice %237 {offsets = [0, 384], sizes = [8, 128], strides = [1, 1]} : vector<8x512xf32> to vector<8x128xf32>
      %cst_89 = arith.constant 5.000000e-01 : f32
      %257 = vector.broadcast %cst_89 : f32 to vector<8x128xf32>
      %258 = arith.mulf %257, %256 : vector<8x128xf32>
      %259 = math.tanh %258 : vector<8x128xf32>
      %cst_90 = arith.constant 5.000000e-01 : f32
      %260 = vector.broadcast %cst_90 : f32 to vector<8x128xf32>
      %261 = arith.mulf %260, %259 : vector<8x128xf32>
      %cst_91 = arith.constant 5.000000e-01 : f32
      %262 = vector.broadcast %cst_91 : f32 to vector<8x128xf32>
      %263 = arith.addf %261, %262 : vector<8x128xf32>
      %264 = arith.mulf %253, %231 : vector<8x128xf32>
      %265 = arith.mulf %245, %255 : vector<8x128xf32>
      %266 = arith.addf %264, %265 : vector<8x128xf32>
      %267 = math.tanh %266 : vector<8x128xf32>
      %268 = arith.mulf %263, %267 : vector<8x128xf32>
      %269 = math.tanh %268 : vector<8x128xf32>
      %270 = vector.extract_strided_slice %21 {offsets = [56, 0], sizes = [8, 512], strides = [1, 1]} : vector<64x512xf32> to vector<8x512xf32>
      %cst_92 = arith.constant dense<0.000000e+00> : vector<8x512xf32>
      %271 = tpu.matmul %268, %22, %cst_92 {dimension_numbers = #tpu.dot_dimension_numbers<[1], [0], [0], [1], [0, 0, 1, 1], [], []>} : vector<8x128xf32>, vector<128x512xf32>, vector<8x512xf32> -> vector<8x512xf32>
      %272 = arith.addf %270, %271 : vector<8x512xf32>
      %273 = vector.extract_strided_slice %272 {offsets = [0, 0], sizes = [8, 128], strides = [1, 1]} : vector<8x512xf32> to vector<8x128xf32>
      %cst_93 = arith.constant 5.000000e-01 : f32
      %274 = vector.broadcast %cst_93 : f32 to vector<8x128xf32>
      %275 = arith.mulf %274, %273 : vector<8x128xf32>
      %276 = math.tanh %275 : vector<8x128xf32>
      %cst_94 = arith.constant 5.000000e-01 : f32
      %277 = vector.broadcast %cst_94 : f32 to vector<8x128xf32>
      %278 = arith.mulf %277, %276 : vector<8x128xf32>
      %cst_95 = arith.constant 5.000000e-01 : f32
      %279 = vector.broadcast %cst_95 : f32 to vector<8x128xf32>
      %280 = arith.addf %278, %279 : vector<8x128xf32>
      %281 = vector.extract_strided_slice %272 {offsets = [0, 128], sizes = [8, 128], strides = [1, 1]} : vector<8x512xf32> to vector<8x128xf32>
      %cst_96 = arith.constant 5.000000e-01 : f32
      %282 = vector.broadcast %cst_96 : f32 to vector<8x128xf32>
      %283 = arith.mulf %282, %281 : vector<8x128xf32>
      %284 = math.tanh %283 : vector<8x128xf32>
      %cst_97 = arith.constant 5.000000e-01 : f32
      %285 = vector.broadcast %cst_97 : f32 to vector<8x128xf32>
      %286 = arith.mulf %285, %284 : vector<8x128xf32>
      %cst_98 = arith.constant 5.000000e-01 : f32
      %287 = vector.broadcast %cst_98 : f32 to vector<8x128xf32>
      %288 = arith.addf %286, %287 : vector<8x128xf32>
      %289 = vector.extract_strided_slice %272 {offsets = [0, 256], sizes = [8, 128], strides = [1, 1]} : vector<8x512xf32> to vector<8x128xf32>
      %290 = math.tanh %289 : vector<8x128xf32>
      %291 = vector.extract_strided_slice %272 {offsets = [0, 384], sizes = [8, 128], strides = [1, 1]} : vector<8x512xf32> to vector<8x128xf32>
      %cst_99 = arith.constant 5.000000e-01 : f32
      %292 = vector.broadcast %cst_99 : f32 to vector<8x128xf32>
      %293 = arith.mulf %292, %291 : vector<8x128xf32>
      %294 = math.tanh %293 : vector<8x128xf32>
      %cst_100 = arith.constant 5.000000e-01 : f32
      %295 = vector.broadcast %cst_100 : f32 to vector<8x128xf32>
      %296 = arith.mulf %295, %294 : vector<8x128xf32>
      %cst_101 = arith.constant 5.000000e-01 : f32
      %297 = vector.broadcast %cst_101 : f32 to vector<8x128xf32>
      %298 = arith.addf %296, %297 : vector<8x128xf32>
      %299 = arith.mulf %288, %266 : vector<8x128xf32>
      %300 = arith.mulf %280, %290 : vector<8x128xf32>
      %301 = arith.addf %299, %300 : vector<8x128xf32>
      %302 = math.tanh %301 : vector<8x128xf32>
      %303 = arith.mulf %298, %302 : vector<8x128xf32>
      %304 = math.tanh %303 : vector<8x128xf32>
      %305 = tpu.concatenate %59, %94, %129, %164, %199, %234, %269, %304 in 0 : vector<8x128xf32>, vector<8x128xf32>, vector<8x128xf32>, vector<8x128xf32>, vector<8x128xf32>, vector<8x128xf32>, vector<8x128xf32>, vector<8x128xf32> -> vector<64x128xf32>
      %c0_102 = arith.constant 0 : index
      %c0_103 = arith.constant 0 : index
      %306 = vector.load %arg7[%c0_102, %c0_103] : memref<128x512xf32, #tpu.memory_space<vmem>>, vector<128x512xf32>
      %cst_104 = arith.constant dense<0.000000e+00> : vector<64x512xf32>
      %307 = tpu.matmul %305, %306, %cst_104 {dimension_numbers = #tpu.dot_dimension_numbers<[1], [0], [0], [1], [0, 0, 1, 1], [], []>} : vector<64x128xf32>, vector<128x512xf32>, vector<64x512xf32> -> vector<64x512xf32>
      %c0_105 = arith.constant 0 : index
      %c0_106 = arith.constant 0 : index
      %308 = vector.load %arg9[%c0_105, %c0_106] : memref<1x512xf32, #tpu.memory_space<vmem>>, vector<1x512xf32>
      %309 = vector.broadcast %308 : vector<1x512xf32> to vector<64x512xf32>
      %310 = arith.addf %307, %309 : vector<64x512xf32>
      %c0_107 = arith.constant 0 : index
      %c0_108 = arith.constant 0 : index
      %311 = vector.load %arg8[%c0_107, %c0_108] : memref<128x512xf32, #tpu.memory_space<vmem>>, vector<128x512xf32>
      %cst_109 = arith.constant 0.000000e+00 : f32
      %312 = vector.broadcast %cst_109 : f32 to vector<8x128xf32>
      %cst_110 = arith.constant 0.000000e+00 : f32
      %313 = vector.broadcast %cst_110 : f32 to vector<8x128xf32>
      %314 = vector.extract_strided_slice %310 {offsets = [0, 0], sizes = [8, 512], strides = [1, 1]} : vector<64x512xf32> to vector<8x512xf32>
      %cst_111 = arith.constant dense<0.000000e+00> : vector<8x512xf32>
      %315 = tpu.matmul %312, %311, %cst_111 {dimension_numbers = #tpu.dot_dimension_numbers<[1], [0], [0], [1], [0, 0, 1, 1], [], []>} : vector<8x128xf32>, vector<128x512xf32>, vector<8x512xf32> -> vector<8x512xf32>
      %316 = arith.addf %314, %315 : vector<8x512xf32>
      %317 = vector.extract_strided_slice %316 {offsets = [0, 0], sizes = [8, 128], strides = [1, 1]} : vector<8x512xf32> to vector<8x128xf32>
      %cst_112 = arith.constant 5.000000e-01 : f32
      %318 = vector.broadcast %cst_112 : f32 to vector<8x128xf32>
      %319 = arith.mulf %318, %317 : vector<8x128xf32>
      %320 = math.tanh %319 : vector<8x128xf32>
      %cst_113 = arith.constant 5.000000e-01 : f32
      %321 = vector.broadcast %cst_113 : f32 to vector<8x128xf32>
      %322 = arith.mulf %321, %320 : vector<8x128xf32>
      %cst_114 = arith.constant 5.000000e-01 : f32
      %323 = vector.broadcast %cst_114 : f32 to vector<8x128xf32>
      %324 = arith.addf %322, %323 : vector<8x128xf32>
      %325 = vector.extract_strided_slice %316 {offsets = [0, 128], sizes = [8, 128], strides = [1, 1]} : vector<8x512xf32> to vector<8x128xf32>
      %cst_115 = arith.constant 5.000000e-01 : f32
      %326 = vector.broadcast %cst_115 : f32 to vector<8x128xf32>
      %327 = arith.mulf %326, %325 : vector<8x128xf32>
      %328 = math.tanh %327 : vector<8x128xf32>
      %cst_116 = arith.constant 5.000000e-01 : f32
      %329 = vector.broadcast %cst_116 : f32 to vector<8x128xf32>
      %330 = arith.mulf %329, %328 : vector<8x128xf32>
      %cst_117 = arith.constant 5.000000e-01 : f32
      %331 = vector.broadcast %cst_117 : f32 to vector<8x128xf32>
      %332 = arith.addf %330, %331 : vector<8x128xf32>
      %333 = vector.extract_strided_slice %316 {offsets = [0, 256], sizes = [8, 128], strides = [1, 1]} : vector<8x512xf32> to vector<8x128xf32>
      %334 = math.tanh %333 : vector<8x128xf32>
      %335 = vector.extract_strided_slice %316 {offsets = [0, 384], sizes = [8, 128], strides = [1, 1]} : vector<8x512xf32> to vector<8x128xf32>
      %cst_118 = arith.constant 5.000000e-01 : f32
      %336 = vector.broadcast %cst_118 : f32 to vector<8x128xf32>
      %337 = arith.mulf %336, %335 : vector<8x128xf32>
      %338 = math.tanh %337 : vector<8x128xf32>
      %cst_119 = arith.constant 5.000000e-01 : f32
      %339 = vector.broadcast %cst_119 : f32 to vector<8x128xf32>
      %340 = arith.mulf %339, %338 : vector<8x128xf32>
      %cst_120 = arith.constant 5.000000e-01 : f32
      %341 = vector.broadcast %cst_120 : f32 to vector<8x128xf32>
      %342 = arith.addf %340, %341 : vector<8x128xf32>
      %343 = arith.mulf %332, %313 : vector<8x128xf32>
      %344 = arith.mulf %324, %334 : vector<8x128xf32>
      %345 = arith.addf %343, %344 : vector<8x128xf32>
      %346 = math.tanh %345 : vector<8x128xf32>
      %347 = arith.mulf %342, %346 : vector<8x128xf32>
      %348 = math.tanh %347 : vector<8x128xf32>
      %349 = vector.extract_strided_slice %310 {offsets = [8, 0], sizes = [8, 512], strides = [1, 1]} : vector<64x512xf32> to vector<8x512xf32>
      %cst_121 = arith.constant dense<0.000000e+00> : vector<8x512xf32>
      %350 = tpu.matmul %347, %311, %cst_121 {dimension_numbers = #tpu.dot_dimension_numbers<[1], [0], [0], [1], [0, 0, 1, 1], [], []>} : vector<8x128xf32>, vector<128x512xf32>, vector<8x512xf32> -> vector<8x512xf32>
      %351 = arith.addf %349, %350 : vector<8x512xf32>
      %352 = vector.extract_strided_slice %351 {offsets = [0, 0], sizes = [8, 128], strides = [1, 1]} : vector<8x512xf32> to vector<8x128xf32>
      %cst_122 = arith.constant 5.000000e-01 : f32
      %353 = vector.broadcast %cst_122 : f32 to vector<8x128xf32>
      %354 = arith.mulf %353, %352 : vector<8x128xf32>
      %355 = math.tanh %354 : vector<8x128xf32>
      %cst_123 = arith.constant 5.000000e-01 : f32
      %356 = vector.broadcast %cst_123 : f32 to vector<8x128xf32>
      %357 = arith.mulf %356, %355 : vector<8x128xf32>
      %cst_124 = arith.constant 5.000000e-01 : f32
      %358 = vector.broadcast %cst_124 : f32 to vector<8x128xf32>
      %359 = arith.addf %357, %358 : vector<8x128xf32>
      %360 = vector.extract_strided_slice %351 {offsets = [0, 128], sizes = [8, 128], strides = [1, 1]} : vector<8x512xf32> to vector<8x128xf32>
      %cst_125 = arith.constant 5.000000e-01 : f32
      %361 = vector.broadcast %cst_125 : f32 to vector<8x128xf32>
      %362 = arith.mulf %361, %360 : vector<8x128xf32>
      %363 = math.tanh %362 : vector<8x128xf32>
      %cst_126 = arith.constant 5.000000e-01 : f32
      %364 = vector.broadcast %cst_126 : f32 to vector<8x128xf32>
      %365 = arith.mulf %364, %363 : vector<8x128xf32>
      %cst_127 = arith.constant 5.000000e-01 : f32
      %366 = vector.broadcast %cst_127 : f32 to vector<8x128xf32>
      %367 = arith.addf %365, %366 : vector<8x128xf32>
      %368 = vector.extract_strided_slice %351 {offsets = [0, 256], sizes = [8, 128], strides = [1, 1]} : vector<8x512xf32> to vector<8x128xf32>
      %369 = math.tanh %368 : vector<8x128xf32>
      %370 = vector.extract_strided_slice %351 {offsets = [0, 384], sizes = [8, 128], strides = [1, 1]} : vector<8x512xf32> to vector<8x128xf32>
      %cst_128 = arith.constant 5.000000e-01 : f32
      %371 = vector.broadcast %cst_128 : f32 to vector<8x128xf32>
      %372 = arith.mulf %371, %370 : vector<8x128xf32>
      %373 = math.tanh %372 : vector<8x128xf32>
      %cst_129 = arith.constant 5.000000e-01 : f32
      %374 = vector.broadcast %cst_129 : f32 to vector<8x128xf32>
      %375 = arith.mulf %374, %373 : vector<8x128xf32>
      %cst_130 = arith.constant 5.000000e-01 : f32
      %376 = vector.broadcast %cst_130 : f32 to vector<8x128xf32>
      %377 = arith.addf %375, %376 : vector<8x128xf32>
      %378 = arith.mulf %367, %345 : vector<8x128xf32>
      %379 = arith.mulf %359, %369 : vector<8x128xf32>
      %380 = arith.addf %378, %379 : vector<8x128xf32>
      %381 = math.tanh %380 : vector<8x128xf32>
      %382 = arith.mulf %377, %381 : vector<8x128xf32>
      %383 = math.tanh %382 : vector<8x128xf32>
      %384 = vector.extract_strided_slice %310 {offsets = [16, 0], sizes = [8, 512], strides = [1, 1]} : vector<64x512xf32> to vector<8x512xf32>
      %cst_131 = arith.constant dense<0.000000e+00> : vector<8x512xf32>
      %385 = tpu.matmul %382, %311, %cst_131 {dimension_numbers = #tpu.dot_dimension_numbers<[1], [0], [0], [1], [0, 0, 1, 1], [], []>} : vector<8x128xf32>, vector<128x512xf32>, vector<8x512xf32> -> vector<8x512xf32>
      %386 = arith.addf %384, %385 : vector<8x512xf32>
      %387 = vector.extract_strided_slice %386 {offsets = [0, 0], sizes = [8, 128], strides = [1, 1]} : vector<8x512xf32> to vector<8x128xf32>
      %cst_132 = arith.constant 5.000000e-01 : f32
      %388 = vector.broadcast %cst_132 : f32 to vector<8x128xf32>
      %389 = arith.mulf %388, %387 : vector<8x128xf32>
      %390 = math.tanh %389 : vector<8x128xf32>
      %cst_133 = arith.constant 5.000000e-01 : f32
      %391 = vector.broadcast %cst_133 : f32 to vector<8x128xf32>
      %392 = arith.mulf %391, %390 : vector<8x128xf32>
      %cst_134 = arith.constant 5.000000e-01 : f32
      %393 = vector.broadcast %cst_134 : f32 to vector<8x128xf32>
      %394 = arith.addf %392, %393 : vector<8x128xf32>
      %395 = vector.extract_strided_slice %386 {offsets = [0, 128], sizes = [8, 128], strides = [1, 1]} : vector<8x512xf32> to vector<8x128xf32>
      %cst_135 = arith.constant 5.000000e-01 : f32
      %396 = vector.broadcast %cst_135 : f32 to vector<8x128xf32>
      %397 = arith.mulf %396, %395 : vector<8x128xf32>
      %398 = math.tanh %397 : vector<8x128xf32>
      %cst_136 = arith.constant 5.000000e-01 : f32
      %399 = vector.broadcast %cst_136 : f32 to vector<8x128xf32>
      %400 = arith.mulf %399, %398 : vector<8x128xf32>
      %cst_137 = arith.constant 5.000000e-01 : f32
      %401 = vector.broadcast %cst_137 : f32 to vector<8x128xf32>
      %402 = arith.addf %400, %401 : vector<8x128xf32>
      %403 = vector.extract_strided_slice %386 {offsets = [0, 256], sizes = [8, 128], strides = [1, 1]} : vector<8x512xf32> to vector<8x128xf32>
      %404 = math.tanh %403 : vector<8x128xf32>
      %405 = vector.extract_strided_slice %386 {offsets = [0, 384], sizes = [8, 128], strides = [1, 1]} : vector<8x512xf32> to vector<8x128xf32>
      %cst_138 = arith.constant 5.000000e-01 : f32
      %406 = vector.broadcast %cst_138 : f32 to vector<8x128xf32>
      %407 = arith.mulf %406, %405 : vector<8x128xf32>
      %408 = math.tanh %407 : vector<8x128xf32>
      %cst_139 = arith.constant 5.000000e-01 : f32
      %409 = vector.broadcast %cst_139 : f32 to vector<8x128xf32>
      %410 = arith.mulf %409, %408 : vector<8x128xf32>
      %cst_140 = arith.constant 5.000000e-01 : f32
      %411 = vector.broadcast %cst_140 : f32 to vector<8x128xf32>
      %412 = arith.addf %410, %411 : vector<8x128xf32>
      %413 = arith.mulf %402, %380 : vector<8x128xf32>
      %414 = arith.mulf %394, %404 : vector<8x128xf32>
      %415 = arith.addf %413, %414 : vector<8x128xf32>
      %416 = math.tanh %415 : vector<8x128xf32>
      %417 = arith.mulf %412, %416 : vector<8x128xf32>
      %418 = math.tanh %417 : vector<8x128xf32>
      %419 = vector.extract_strided_slice %310 {offsets = [24, 0], sizes = [8, 512], strides = [1, 1]} : vector<64x512xf32> to vector<8x512xf32>
      %cst_141 = arith.constant dense<0.000000e+00> : vector<8x512xf32>
      %420 = tpu.matmul %417, %311, %cst_141 {dimension_numbers = #tpu.dot_dimension_numbers<[1], [0], [0], [1], [0, 0, 1, 1], [], []>} : vector<8x128xf32>, vector<128x512xf32>, vector<8x512xf32> -> vector<8x512xf32>
      %421 = arith.addf %419, %420 : vector<8x512xf32>
      %422 = vector.extract_strided_slice %421 {offsets = [0, 0], sizes = [8, 128], strides = [1, 1]} : vector<8x512xf32> to vector<8x128xf32>
      %cst_142 = arith.constant 5.000000e-01 : f32
      %423 = vector.broadcast %cst_142 : f32 to vector<8x128xf32>
      %424 = arith.mulf %423, %422 : vector<8x128xf32>
      %425 = math.tanh %424 : vector<8x128xf32>
      %cst_143 = arith.constant 5.000000e-01 : f32
      %426 = vector.broadcast %cst_143 : f32 to vector<8x128xf32>
      %427 = arith.mulf %426, %425 : vector<8x128xf32>
      %cst_144 = arith.constant 5.000000e-01 : f32
      %428 = vector.broadcast %cst_144 : f32 to vector<8x128xf32>
      %429 = arith.addf %427, %428 : vector<8x128xf32>
      %430 = vector.extract_strided_slice %421 {offsets = [0, 128], sizes = [8, 128], strides = [1, 1]} : vector<8x512xf32> to vector<8x128xf32>
      %cst_145 = arith.constant 5.000000e-01 : f32
      %431 = vector.broadcast %cst_145 : f32 to vector<8x128xf32>
      %432 = arith.mulf %431, %430 : vector<8x128xf32>
      %433 = math.tanh %432 : vector<8x128xf32>
      %cst_146 = arith.constant 5.000000e-01 : f32
      %434 = vector.broadcast %cst_146 : f32 to vector<8x128xf32>
      %435 = arith.mulf %434, %433 : vector<8x128xf32>
      %cst_147 = arith.constant 5.000000e-01 : f32
      %436 = vector.broadcast %cst_147 : f32 to vector<8x128xf32>
      %437 = arith.addf %435, %436 : vector<8x128xf32>
      %438 = vector.extract_strided_slice %421 {offsets = [0, 256], sizes = [8, 128], strides = [1, 1]} : vector<8x512xf32> to vector<8x128xf32>
      %439 = math.tanh %438 : vector<8x128xf32>
      %440 = vector.extract_strided_slice %421 {offsets = [0, 384], sizes = [8, 128], strides = [1, 1]} : vector<8x512xf32> to vector<8x128xf32>
      %cst_148 = arith.constant 5.000000e-01 : f32
      %441 = vector.broadcast %cst_148 : f32 to vector<8x128xf32>
      %442 = arith.mulf %441, %440 : vector<8x128xf32>
      %443 = math.tanh %442 : vector<8x128xf32>
      %cst_149 = arith.constant 5.000000e-01 : f32
      %444 = vector.broadcast %cst_149 : f32 to vector<8x128xf32>
      %445 = arith.mulf %444, %443 : vector<8x128xf32>
      %cst_150 = arith.constant 5.000000e-01 : f32
      %446 = vector.broadcast %cst_150 : f32 to vector<8x128xf32>
      %447 = arith.addf %445, %446 : vector<8x128xf32>
      %448 = arith.mulf %437, %415 : vector<8x128xf32>
      %449 = arith.mulf %429, %439 : vector<8x128xf32>
      %450 = arith.addf %448, %449 : vector<8x128xf32>
      %451 = math.tanh %450 : vector<8x128xf32>
      %452 = arith.mulf %447, %451 : vector<8x128xf32>
      %453 = math.tanh %452 : vector<8x128xf32>
      %454 = vector.extract_strided_slice %310 {offsets = [32, 0], sizes = [8, 512], strides = [1, 1]} : vector<64x512xf32> to vector<8x512xf32>
      %cst_151 = arith.constant dense<0.000000e+00> : vector<8x512xf32>
      %455 = tpu.matmul %452, %311, %cst_151 {dimension_numbers = #tpu.dot_dimension_numbers<[1], [0], [0], [1], [0, 0, 1, 1], [], []>} : vector<8x128xf32>, vector<128x512xf32>, vector<8x512xf32> -> vector<8x512xf32>
      %456 = arith.addf %454, %455 : vector<8x512xf32>
      %457 = vector.extract_strided_slice %456 {offsets = [0, 0], sizes = [8, 128], strides = [1, 1]} : vector<8x512xf32> to vector<8x128xf32>
      %cst_152 = arith.constant 5.000000e-01 : f32
      %458 = vector.broadcast %cst_152 : f32 to vector<8x128xf32>
      %459 = arith.mulf %458, %457 : vector<8x128xf32>
      %460 = math.tanh %459 : vector<8x128xf32>
      %cst_153 = arith.constant 5.000000e-01 : f32
      %461 = vector.broadcast %cst_153 : f32 to vector<8x128xf32>
      %462 = arith.mulf %461, %460 : vector<8x128xf32>
      %cst_154 = arith.constant 5.000000e-01 : f32
      %463 = vector.broadcast %cst_154 : f32 to vector<8x128xf32>
      %464 = arith.addf %462, %463 : vector<8x128xf32>
      %465 = vector.extract_strided_slice %456 {offsets = [0, 128], sizes = [8, 128], strides = [1, 1]} : vector<8x512xf32> to vector<8x128xf32>
      %cst_155 = arith.constant 5.000000e-01 : f32
      %466 = vector.broadcast %cst_155 : f32 to vector<8x128xf32>
      %467 = arith.mulf %466, %465 : vector<8x128xf32>
      %468 = math.tanh %467 : vector<8x128xf32>
      %cst_156 = arith.constant 5.000000e-01 : f32
      %469 = vector.broadcast %cst_156 : f32 to vector<8x128xf32>
      %470 = arith.mulf %469, %468 : vector<8x128xf32>
      %cst_157 = arith.constant 5.000000e-01 : f32
      %471 = vector.broadcast %cst_157 : f32 to vector<8x128xf32>
      %472 = arith.addf %470, %471 : vector<8x128xf32>
      %473 = vector.extract_strided_slice %456 {offsets = [0, 256], sizes = [8, 128], strides = [1, 1]} : vector<8x512xf32> to vector<8x128xf32>
      %474 = math.tanh %473 : vector<8x128xf32>
      %475 = vector.extract_strided_slice %456 {offsets = [0, 384], sizes = [8, 128], strides = [1, 1]} : vector<8x512xf32> to vector<8x128xf32>
      %cst_158 = arith.constant 5.000000e-01 : f32
      %476 = vector.broadcast %cst_158 : f32 to vector<8x128xf32>
      %477 = arith.mulf %476, %475 : vector<8x128xf32>
      %478 = math.tanh %477 : vector<8x128xf32>
      %cst_159 = arith.constant 5.000000e-01 : f32
      %479 = vector.broadcast %cst_159 : f32 to vector<8x128xf32>
      %480 = arith.mulf %479, %478 : vector<8x128xf32>
      %cst_160 = arith.constant 5.000000e-01 : f32
      %481 = vector.broadcast %cst_160 : f32 to vector<8x128xf32>
      %482 = arith.addf %480, %481 : vector<8x128xf32>
      %483 = arith.mulf %472, %450 : vector<8x128xf32>
      %484 = arith.mulf %464, %474 : vector<8x128xf32>
      %485 = arith.addf %483, %484 : vector<8x128xf32>
      %486 = math.tanh %485 : vector<8x128xf32>
      %487 = arith.mulf %482, %486 : vector<8x128xf32>
      %488 = math.tanh %487 : vector<8x128xf32>
      %489 = vector.extract_strided_slice %310 {offsets = [40, 0], sizes = [8, 512], strides = [1, 1]} : vector<64x512xf32> to vector<8x512xf32>
      %cst_161 = arith.constant dense<0.000000e+00> : vector<8x512xf32>
      %490 = tpu.matmul %487, %311, %cst_161 {dimension_numbers = #tpu.dot_dimension_numbers<[1], [0], [0], [1], [0, 0, 1, 1], [], []>} : vector<8x128xf32>, vector<128x512xf32>, vector<8x512xf32> -> vector<8x512xf32>
      %491 = arith.addf %489, %490 : vector<8x512xf32>
      %492 = vector.extract_strided_slice %491 {offsets = [0, 0], sizes = [8, 128], strides = [1, 1]} : vector<8x512xf32> to vector<8x128xf32>
      %cst_162 = arith.constant 5.000000e-01 : f32
      %493 = vector.broadcast %cst_162 : f32 to vector<8x128xf32>
      %494 = arith.mulf %493, %492 : vector<8x128xf32>
      %495 = math.tanh %494 : vector<8x128xf32>
      %cst_163 = arith.constant 5.000000e-01 : f32
      %496 = vector.broadcast %cst_163 : f32 to vector<8x128xf32>
      %497 = arith.mulf %496, %495 : vector<8x128xf32>
      %cst_164 = arith.constant 5.000000e-01 : f32
      %498 = vector.broadcast %cst_164 : f32 to vector<8x128xf32>
      %499 = arith.addf %497, %498 : vector<8x128xf32>
      %500 = vector.extract_strided_slice %491 {offsets = [0, 128], sizes = [8, 128], strides = [1, 1]} : vector<8x512xf32> to vector<8x128xf32>
      %cst_165 = arith.constant 5.000000e-01 : f32
      %501 = vector.broadcast %cst_165 : f32 to vector<8x128xf32>
      %502 = arith.mulf %501, %500 : vector<8x128xf32>
      %503 = math.tanh %502 : vector<8x128xf32>
      %cst_166 = arith.constant 5.000000e-01 : f32
      %504 = vector.broadcast %cst_166 : f32 to vector<8x128xf32>
      %505 = arith.mulf %504, %503 : vector<8x128xf32>
      %cst_167 = arith.constant 5.000000e-01 : f32
      %506 = vector.broadcast %cst_167 : f32 to vector<8x128xf32>
      %507 = arith.addf %505, %506 : vector<8x128xf32>
      %508 = vector.extract_strided_slice %491 {offsets = [0, 256], sizes = [8, 128], strides = [1, 1]} : vector<8x512xf32> to vector<8x128xf32>
      %509 = math.tanh %508 : vector<8x128xf32>
      %510 = vector.extract_strided_slice %491 {offsets = [0, 384], sizes = [8, 128], strides = [1, 1]} : vector<8x512xf32> to vector<8x128xf32>
      %cst_168 = arith.constant 5.000000e-01 : f32
      %511 = vector.broadcast %cst_168 : f32 to vector<8x128xf32>
      %512 = arith.mulf %511, %510 : vector<8x128xf32>
      %513 = math.tanh %512 : vector<8x128xf32>
      %cst_169 = arith.constant 5.000000e-01 : f32
      %514 = vector.broadcast %cst_169 : f32 to vector<8x128xf32>
      %515 = arith.mulf %514, %513 : vector<8x128xf32>
      %cst_170 = arith.constant 5.000000e-01 : f32
      %516 = vector.broadcast %cst_170 : f32 to vector<8x128xf32>
      %517 = arith.addf %515, %516 : vector<8x128xf32>
      %518 = arith.mulf %507, %485 : vector<8x128xf32>
      %519 = arith.mulf %499, %509 : vector<8x128xf32>
      %520 = arith.addf %518, %519 : vector<8x128xf32>
      %521 = math.tanh %520 : vector<8x128xf32>
      %522 = arith.mulf %517, %521 : vector<8x128xf32>
      %523 = math.tanh %522 : vector<8x128xf32>
      %524 = vector.extract_strided_slice %310 {offsets = [48, 0], sizes = [8, 512], strides = [1, 1]} : vector<64x512xf32> to vector<8x512xf32>
      %cst_171 = arith.constant dense<0.000000e+00> : vector<8x512xf32>
      %525 = tpu.matmul %522, %311, %cst_171 {dimension_numbers = #tpu.dot_dimension_numbers<[1], [0], [0], [1], [0, 0, 1, 1], [], []>} : vector<8x128xf32>, vector<128x512xf32>, vector<8x512xf32> -> vector<8x512xf32>
      %526 = arith.addf %524, %525 : vector<8x512xf32>
      %527 = vector.extract_strided_slice %526 {offsets = [0, 0], sizes = [8, 128], strides = [1, 1]} : vector<8x512xf32> to vector<8x128xf32>
      %cst_172 = arith.constant 5.000000e-01 : f32
      %528 = vector.broadcast %cst_172 : f32 to vector<8x128xf32>
      %529 = arith.mulf %528, %527 : vector<8x128xf32>
      %530 = math.tanh %529 : vector<8x128xf32>
      %cst_173 = arith.constant 5.000000e-01 : f32
      %531 = vector.broadcast %cst_173 : f32 to vector<8x128xf32>
      %532 = arith.mulf %531, %530 : vector<8x128xf32>
      %cst_174 = arith.constant 5.000000e-01 : f32
      %533 = vector.broadcast %cst_174 : f32 to vector<8x128xf32>
      %534 = arith.addf %532, %533 : vector<8x128xf32>
      %535 = vector.extract_strided_slice %526 {offsets = [0, 128], sizes = [8, 128], strides = [1, 1]} : vector<8x512xf32> to vector<8x128xf32>
      %cst_175 = arith.constant 5.000000e-01 : f32
      %536 = vector.broadcast %cst_175 : f32 to vector<8x128xf32>
      %537 = arith.mulf %536, %535 : vector<8x128xf32>
      %538 = math.tanh %537 : vector<8x128xf32>
      %cst_176 = arith.constant 5.000000e-01 : f32
      %539 = vector.broadcast %cst_176 : f32 to vector<8x128xf32>
      %540 = arith.mulf %539, %538 : vector<8x128xf32>
      %cst_177 = arith.constant 5.000000e-01 : f32
      %541 = vector.broadcast %cst_177 : f32 to vector<8x128xf32>
      %542 = arith.addf %540, %541 : vector<8x128xf32>
      %543 = vector.extract_strided_slice %526 {offsets = [0, 256], sizes = [8, 128], strides = [1, 1]} : vector<8x512xf32> to vector<8x128xf32>
      %544 = math.tanh %543 : vector<8x128xf32>
      %545 = vector.extract_strided_slice %526 {offsets = [0, 384], sizes = [8, 128], strides = [1, 1]} : vector<8x512xf32> to vector<8x128xf32>
      %cst_178 = arith.constant 5.000000e-01 : f32
      %546 = vector.broadcast %cst_178 : f32 to vector<8x128xf32>
      %547 = arith.mulf %546, %545 : vector<8x128xf32>
      %548 = math.tanh %547 : vector<8x128xf32>
      %cst_179 = arith.constant 5.000000e-01 : f32
      %549 = vector.broadcast %cst_179 : f32 to vector<8x128xf32>
      %550 = arith.mulf %549, %548 : vector<8x128xf32>
      %cst_180 = arith.constant 5.000000e-01 : f32
      %551 = vector.broadcast %cst_180 : f32 to vector<8x128xf32>
      %552 = arith.addf %550, %551 : vector<8x128xf32>
      %553 = arith.mulf %542, %520 : vector<8x128xf32>
      %554 = arith.mulf %534, %544 : vector<8x128xf32>
      %555 = arith.addf %553, %554 : vector<8x128xf32>
      %556 = math.tanh %555 : vector<8x128xf32>
      %557 = arith.mulf %552, %556 : vector<8x128xf32>
      %558 = math.tanh %557 : vector<8x128xf32>
      %559 = vector.extract_strided_slice %310 {offsets = [56, 0], sizes = [8, 512], strides = [1, 1]} : vector<64x512xf32> to vector<8x512xf32>
      %cst_181 = arith.constant dense<0.000000e+00> : vector<8x512xf32>
      %560 = tpu.matmul %557, %311, %cst_181 {dimension_numbers = #tpu.dot_dimension_numbers<[1], [0], [0], [1], [0, 0, 1, 1], [], []>} : vector<8x128xf32>, vector<128x512xf32>, vector<8x512xf32> -> vector<8x512xf32>
      %561 = arith.addf %559, %560 : vector<8x512xf32>
      %562 = vector.extract_strided_slice %561 {offsets = [0, 0], sizes = [8, 128], strides = [1, 1]} : vector<8x512xf32> to vector<8x128xf32>
      %cst_182 = arith.constant 5.000000e-01 : f32
      %563 = vector.broadcast %cst_182 : f32 to vector<8x128xf32>
      %564 = arith.mulf %563, %562 : vector<8x128xf32>
      %565 = math.tanh %564 : vector<8x128xf32>
      %cst_183 = arith.constant 5.000000e-01 : f32
      %566 = vector.broadcast %cst_183 : f32 to vector<8x128xf32>
      %567 = arith.mulf %566, %565 : vector<8x128xf32>
      %cst_184 = arith.constant 5.000000e-01 : f32
      %568 = vector.broadcast %cst_184 : f32 to vector<8x128xf32>
      %569 = arith.addf %567, %568 : vector<8x128xf32>
      %570 = vector.extract_strided_slice %561 {offsets = [0, 128], sizes = [8, 128], strides = [1, 1]} : vector<8x512xf32> to vector<8x128xf32>
      %cst_185 = arith.constant 5.000000e-01 : f32
      %571 = vector.broadcast %cst_185 : f32 to vector<8x128xf32>
      %572 = arith.mulf %571, %570 : vector<8x128xf32>
      %573 = math.tanh %572 : vector<8x128xf32>
      %cst_186 = arith.constant 5.000000e-01 : f32
      %574 = vector.broadcast %cst_186 : f32 to vector<8x128xf32>
      %575 = arith.mulf %574, %573 : vector<8x128xf32>
      %cst_187 = arith.constant 5.000000e-01 : f32
      %576 = vector.broadcast %cst_187 : f32 to vector<8x128xf32>
      %577 = arith.addf %575, %576 : vector<8x128xf32>
      %578 = vector.extract_strided_slice %561 {offsets = [0, 256], sizes = [8, 128], strides = [1, 1]} : vector<8x512xf32> to vector<8x128xf32>
      %579 = math.tanh %578 : vector<8x128xf32>
      %580 = vector.extract_strided_slice %561 {offsets = [0, 384], sizes = [8, 128], strides = [1, 1]} : vector<8x512xf32> to vector<8x128xf32>
      %cst_188 = arith.constant 5.000000e-01 : f32
      %581 = vector.broadcast %cst_188 : f32 to vector<8x128xf32>
      %582 = arith.mulf %581, %580 : vector<8x128xf32>
      %583 = math.tanh %582 : vector<8x128xf32>
      %cst_189 = arith.constant 5.000000e-01 : f32
      %584 = vector.broadcast %cst_189 : f32 to vector<8x128xf32>
      %585 = arith.mulf %584, %583 : vector<8x128xf32>
      %cst_190 = arith.constant 5.000000e-01 : f32
      %586 = vector.broadcast %cst_190 : f32 to vector<8x128xf32>
      %587 = arith.addf %585, %586 : vector<8x128xf32>
      %588 = arith.mulf %577, %555 : vector<8x128xf32>
      %589 = arith.mulf %569, %579 : vector<8x128xf32>
      %590 = arith.addf %588, %589 : vector<8x128xf32>
      %591 = math.tanh %590 : vector<8x128xf32>
      %592 = arith.mulf %587, %591 : vector<8x128xf32>
      %593 = math.tanh %592 : vector<8x128xf32>
      %594 = tpu.concatenate %348, %383, %418, %453, %488, %523, %558, %593 in 0 : vector<8x128xf32>, vector<8x128xf32>, vector<8x128xf32>, vector<8x128xf32>, vector<8x128xf32>, vector<8x128xf32>, vector<8x128xf32>, vector<8x128xf32> -> vector<64x128xf32>
      %c0_191 = arith.constant 0 : index
      %c0_192 = arith.constant 0 : index
      %595 = vector.load %arg10[%c0_191, %c0_192] : memref<64x128xf32, #tpu.memory_space<vmem>>, vector<64x128xf32>
      tpu.vector_store %arg10[%c0_191, %c0_192], %594 {strides = array<i32>} : memref<64x128xf32, #tpu.memory_space<vmem>>, vector<64x128xf32>,
    } else {
    }
    return
  }
  func.func @transform_0(%arg0: i32) -> (i32, i32) {
    %c0_i32 = arith.constant 0 : i32
    %c0_i32_0 = arith.constant 0 : i32
    return %c0_i32, %arg0 : i32, i32
  }
  func.func @transform_1(%arg0: i32) -> (i32, i32) {
    %c0_i32 = arith.constant 0 : i32
    %c0_i32_0 = arith.constant 0 : i32
    return %arg0, %c0_i32 : i32, i32
  }
  func.func @transform_2(%arg0: i32) -> (i32, i32) {
    %c0_i32 = arith.constant 0 : i32
    %c0_i32_0 = arith.constant 0 : i32
    %c0_i32_1 = arith.constant 0 : i32
    return %c0_i32, %c0_i32_0 : i32, i32
  }
  func.func @transform_3(%arg0: i32) -> (i32, i32) {
    %c0_i32 = arith.constant 0 : i32
    %c0_i32_0 = arith.constant 0 : i32
    %c0_i32_1 = arith.constant 0 : i32
    return %c0_i32, %c0_i32_0 : i32, i32
  }
  func.func @transform_4(%arg0: i32) -> (i32, i32) {
    %c0_i32 = arith.constant 0 : i32
    %c0_i32_0 = arith.constant 0 : i32
    %c0_i32_1 = arith.constant 0 : i32
    return %c0_i32, %c0_i32_0 : i32, i32
  }
  func.func @transform_5(%arg0: i32) -> (i32, i32) {
    %c0_i32 = arith.constant 0 : i32
    %c0_i32_0 = arith.constant 0 : i32
    %c0_i32_1 = arith.constant 0 : i32
    return %c0_i32, %c0_i32_0 : i32, i32
  }
  func.func @transform_6(%arg0: i32) -> (i32, i32) {
    %c0_i32 = arith.constant 0 : i32
    %c0_i32_0 = arith.constant 0 : i32
    %c0_i32_1 = arith.constant 0 : i32
    return %c0_i32, %c0_i32_0 : i32, i32
  }
  func.func @transform_7(%arg0: i32) -> (i32, i32) {
    %c0_i32 = arith.constant 0 : i32
    %c0_i32_0 = arith.constant 0 : i32
    %c0_i32_1 = arith.constant 0 : i32
    return %c0_i32, %c0_i32_0 : i32, i32
  }
  func.func @transform_8(%arg0: i32) -> (i32, i32) {
    %c0_i32 = arith.constant 0 : i32
    %c0_i32_0 = arith.constant 0 : i32
    %c0_i32_1 = arith.constant 0 : i32
    return %c0_i32, %c0_i32_0 : i32, i32
  }
  func.func @transform_9(%arg0: i32) -> (i32, i32) {
    %c0_i32 = arith.constant 0 : i32
    %c0_i32_0 = arith.constant 0 : i32
    %c0_i32_1 = arith.constant 0 : i32
    return %c0_i32, %c0_i32_0 : i32, i32
  }
}

</mosaic_0001>

<bundles_post_ra>
// kernel: tpu_custom_call.1
= control target key start
LH: loop header
LB: loop body
LE: loop exit
PB: predicated region body
PF: predicated region fallthrough
CT: control target
= control target key end

     0   :  { %s7448_s0 = inlined_call_operand.hbm [shape: bf16[64,256], index: 0, kind: input, shape index: {}]   ;;  %s7449_s1 = inlined_call_operand.hbm [shape: bf16[256,128], index: 1, kind: input, shape index: {}]   ;;  %s7450_s2 = inlined_call_operand.vmem [shape: f32[1,128], index: 2, kind: input, shape index: {}]   ;;  %s7451_s3 = inlined_call_operand.hbm [shape: f32[128,512], index: 3, kind: input, shape index: {}]   ;;  %s7452_s4 = inlined_call_operand.hbm [shape: f32[128,512], index: 4, kind: input, shape index: {}]   ;;  %s7453_s5 = inlined_call_operand.vmem [shape: f32[1,512], index: 5, kind: input, shape index: {}]   ;;  %s7454_s6 = inlined_call_operand.hbm [shape: f32[128,512], index: 6, kind: input, shape index: {}]   ;;  %s7455_s7 = inlined_call_operand.hbm [shape: f32[128,512], index: 7, kind: input, shape index: {}]   ;;  %s7456_s8 = inlined_call_operand.vmem [shape: f32[1,512], index: 8, kind: input, shape index: {}]   ;;  %s7457_s9 = inlined_call_operand.hbm [shape: f32[64,128], index: 9, kind: output, shape index: {}]  }
   0x1   :  { %7463 = sst [smem:[#allocation21_spill]] %s7448_s0 }
   0x2   :  { %7464 = sst [smem:[#allocation22_spill]] %s7451_s3 }
   0x3   :  { %7465 = sst [smem:[#allocation23_spill]] %s7452_s4 }
   0x4   :  { %7466 = sst [smem:[#allocation24_spill]] %s7454_s6 }
   0x5   :  { %7467 = sst [smem:[#allocation25_spill]] %s7457_s9 }
   0x6   :  { %14 = vsyncpa [#allocation4], 0 }
   0x7   :  { %16 = vsyncpa [#allocation4 + $0x1], 0 }
   0x8   :  { %17 = vsyncpa [#allocation7], 0 }
   0x9   :  { %19 = vsyncpa [#allocation7 + $0x1], 0 }
   0xa   :  { %20 = vsyncpa [#allocation10], 0 }
   0xb   :  { %21 = vsyncpa [#allocation13], 0 }
   0xc   :  { %22 = vsyncpa [#allocation5], 0  ;;  %s6202_s30 = smov 0   ;;  %s6204_s10 = smov 0  }
   0xd   :  { %s6206_s11 = smov 0   ;;  %s6208_s12 = smov 0  }
   0xe LB: > { %s6221_s13 = sadd.s32 4294967295, %s6134_s12   ;;  %p48_p0 = scmp.ne.s32.totalorder %s6126_s10, %s6122_s30  ;;  %s6134_s12 = sphi %s6208_s12, %s7492_s12   ;;  %s6130_s11 = sphi %s6206_s11, %s7491_s11   ;;  %s6126_s10 = sphi %s6204_s10, %s7490_s10   ;;  %s6122_s30 = sphi %s6202_s30, %s7489_s30  }
   0xf   : > { %p7458_p1 = scmp.eq.s32.totalorder %s6221_s13, 0  ;;  %p4191_p2 = scmp.ge.s32.totalorder %s6134_s12, 1 }
  0x10   : > { %p253_p3 = scmp.lt.s32.totalorder %s6134_s12, 3  ;;  %s6136_s16 = smov [#allocation8]  }
  0x11   : > { %p6230_p5 = por %p7458_p1, %p48_p0  ;;  %s268_s17 = sshll.u32 %s6136_s16, 4  ;;  %s6238_s17 = int_to_ptr.vmem [resolvable:$true] %s268_s17 }
  0x12   : > { %p6234_p6 = pnand %p4191_p2, %p253_p3  ;;  %s6137_s19 = smov [#allocation9]  }
  0x13   : > { %s7468_s14 = scalar_select %p6230_p5, 1, 0 }
  0x14   : > { %s7469_s15 = scalar_select %p6234_p6, 1, 0 }
  0x15   : > { %p5585_p7 = pneg %p6234_p6  ;;  %s281_s20 = sshll.u32 %s6137_s19, 4  ;;  %s6248_s20 = int_to_ptr.vmem [resolvable:$true] %s281_s20 }
  0x16   : > { %s6138_s21 = smov [#allocation11]   ;;  %s7471_s3 = sld [smem:[#allocation22_spill]] }
  0x17   : > { %p6244_p8 = pnand %p5585_p7, %p7458_p1  ;;  %s6250_s22 = sshll.u32 %s6138_s21, 4  ;;  %s298_s22 = int_to_ptr.vmem [resolvable:$true] %s6250_s22 }
  0x19   : > { %p6260_p10 = pneg %p6244_p8 }
  0x1c   : > { %s5882_s25 = scalar_lea.hbm %s7471_s3, 8192 }
  0x1d   : > { %p5883_p9 = scmp.ne.s32.totalorder %s7471_s3, %s5882_s25  ;;  %p5889_p13 = scmp.lt.u32.totalorder %s5882_s25, %s7471_s3 }
  0x1f   : > { %p5885_p11 = pnand %p6260_p10, %p5883_p9 }
  0x21   : > { %p5886_p12 = pneg %p5885_p11 }
  0x23   : > { %p5891_p0 = pnand %p5889_p13, %p5886_p12 }
  0x25   : > { %5894 = shalt.err (!%p5891_p0)
}
  0x26   : > { %s5895_s16 = scalar_lea.vmem %s6238_s17, 8192  ;;  %p5903_p4 = scmp.lt.s32.totalorder %s6238_s17, %s6238_s17 }
  0x27   : > { %p5896_p2 = scmp.ne.s32.totalorder %s6238_s17, %s5895_s16  ;;  %p5904_p1 = scmp.lt.s32.totalorder %s5895_s16, %s5895_s16 }
  0x29   : > { %p5898_p3 = pnand %p5896_p2, %p6260_p10  ;;  %p5905_p9 = por %p5904_p1, %p5903_p4 }
  0x2b   : > { %p5899_p7 = pneg %p5898_p3 }
  0x2d   : > { %p5906_p11 = pnand %p5905_p9, %p5899_p7 }
  0x2f   : > { %5909 = shalt.err (!%p5906_p11)
}
  0x30   : > { %s6139_s19 = smov 512   ;;  %s6140_s21 = smov 32  }
  0x31   : > { %5588 = dma.hbm_to_vmem [thread:$0]  (!%p6244_p8), %s7471_s3, 8192, %s6238_s17, [#allocation7], %s6139_s19, %s6139_s19, %s6140_s21  }
  0x32   : > { %s7473_s4 = sld [smem:[#allocation23_spill]] }
  0x38   : > { %s5910_s27 = scalar_lea.hbm %s7473_s4, 8192 }
  0x39   : > { %p5911_p1 = scmp.ne.s32.totalorder %s7473_s4, %s5910_s27  ;;  %p5917_p13 = scmp.lt.u32.totalorder %s5910_s27, %s7473_s4 }
  0x3b   : > { %p5913_p4 = pnand %p5911_p1, %p6260_p10 }
  0x3d   : > { %p5914_p12 = pneg %p5913_p4 }
  0x3f   : > { %p5919_p0 = pnand %p5917_p13, %p5914_p12 }
  0x41   : > { %5922 = shalt.err (!%p5919_p0)
}
  0x42   : > { %s5923_s17 = scalar_lea.vmem %s6248_s20, 8192  ;;  %p5931_p9 = scmp.lt.s32.totalorder %s6248_s20, %s6248_s20 }
  0x43   : > { %p5924_p2 = scmp.ne.s32.totalorder %s6248_s20, %s5923_s17  ;;  %p5932_p11 = scmp.lt.s32.totalorder %s5923_s17, %s5923_s17 }
  0x45   : > { %p5926_p3 = pnand %p5924_p2, %p6260_p10  ;;  %p5933_p1 = por %p5932_p11, %p5931_p9 }
  0x47   : > { %p5927_p7 = pneg %p5926_p3 }
  0x49   : > { %p5934_p4 = pnand %p5933_p1, %p5927_p7 }
  0x4b   : > { %5937 = shalt.err (!%p5934_p4)
}
  0x4c   : > { %5591 = dma.hbm_to_vmem [thread:$0]  (!%p6244_p8), %s7473_s4, 8192, %s6248_s20, [#allocation10], %s6139_s19, %s6139_s19, %s6140_s21  }
  0x4d   : > { %s7474_s6 = sld [smem:[#allocation24_spill]] }
  0x53   : > { %s5938_s26 = scalar_lea.hbm %s7474_s6, 8192 }
  0x54   : > { %p5939_p12 = scmp.ne.s32.totalorder %s7474_s6, %s5938_s26  ;;  %p5945_p2 = scmp.lt.u32.totalorder %s5938_s26, %s7474_s6 }
  0x56   : > { %p5941_p13 = pnand %p5939_p12, %p6260_p10 }
  0x58   : > { %p5942_p0 = pneg %p5941_p13 }
  0x5a   : > { %p5947_p3 = pnand %p5945_p2, %p5942_p0 }
  0x5c   : > { %5950 = shalt.err (!%p5947_p3)
}
  0x5d   : > { %s5951_s17 = scalar_lea.vmem %s298_s22, 8192  ;;  %p5959_p1 = scmp.lt.s32.totalorder %s298_s22, %s298_s22 }
  0x5e   : > { %p5952_p7 = scmp.ne.s32.totalorder %s298_s22, %s5951_s17  ;;  %p5960_p4 = scmp.lt.s32.totalorder %s5951_s17, %s5951_s17 }
  0x60   : > { %p5954_p9 = pnand %p5952_p7, %p6260_p10  ;;  %p5961_p5 = por %p5960_p4, %p5959_p1 }
  0x62   : > { %p5955_p11 = pneg %p5954_p9 }
  0x64   : > { %p5962_p6 = pnand %p5961_p5, %p5955_p11 }
  0x66   : > { %5965 = shalt.err (!%p5962_p6)
}
  0x67   : > { %5594 = dma.hbm_to_vmem [thread:$0]  (!%p6244_p8), %s7474_s6, 8192, %s298_s22, [#allocation10], %s6139_s19, %s6139_s19, %s6140_s21  }
  0x68   : > { %s6141_s23 = smov [#allocation12]   ;;  %s5966_s27 = scalar_lea.hbm %s7455_s7, 8192 }
  0x69   : > { %s310_s24 = sshll.u32 %s6141_s23, 4  ;;  %p5967_p5 = scmp.ne.s32.totalorder %s7455_s7, %s5966_s27  ;;  %s311_s24 = int_to_ptr.vmem [resolvable:$true] %s310_s24 }
  0x6a   : > { %p5973_p13 = scmp.lt.u32.totalorder %s5966_s27, %s7455_s7 }
  0x6b   : > { %p5969_p6 = pnand %p5967_p5, %p6260_p10 }
  0x6d   : > { %p5970_p12 = pneg %p5969_p6 }
  0x6f   : > { %p5975_p0 = pnand %p5973_p13, %p5970_p12 }
  0x71   : > { %5978 = shalt.err (!%p5975_p0)
}
  0x72   : > { %s5979_s22 = scalar_lea.vmem %s311_s24, 8192  ;;  %p5987_p9 = scmp.lt.s32.totalorder %s311_s24, %s311_s24 }
  0x73   : > { %p5980_p2 = scmp.ne.s32.totalorder %s311_s24, %s5979_s22  ;;  %p5988_p11 = scmp.lt.s32.totalorder %s5979_s22, %s5979_s22 }
  0x75   : > { %p5982_p3 = pnand %p5980_p2, %p6260_p10  ;;  %p5989_p1 = por %p5988_p11, %p5987_p9 }
  0x77   : > { %p5983_p7 = pneg %p5982_p3 }
  0x79   : > { %p5990_p4 = pnand %p5989_p1, %p5983_p7 }
  0x7b   : > { %5993 = shalt.err (!%p5990_p4)
}
  0x7c   : > { %5597 = dma.hbm_to_vmem [thread:$0]  (!%p6244_p8), %s7455_s7, 8192, %s311_s24, [#allocation13], %s6139_s19, %s6139_s19, %s6140_s21  }
  0x7d   : > { %s6354_s28 = sadd.s32 1, %s6134_s12   ;;  %s35_s18 = sadd.s32 1, %s6130_s11 }
  0x7e   : > { %s32_s23 = ssub.s32 %s6134_s12, %s6354_s28  ;;  %p42_p10 = scmp.ne.s32.totalorder %s6130_s11, %s6126_s10 }
  0x7f   : > { %p33_p5 = scmp.eq.s32.totalorder %s32_s23, 0  ;;  %p43_p6 = scmp.eq.s32.totalorder %s6134_s12, 0 }
  0x80   : > { %p5609_p12 = scmp.lt.s32.totalorder %s6134_s12, 2  ;;  %s6364_s25 = sand.u32 1, %s6130_s11  }
  0x81   : > { %s6367_s26 = scalar_select %p33_p5, %s6130_s11, %s35_s18  }
  0x82   : > { %p44_p13 = por %p43_p6, %p42_p10  ;;  %s4197_s27 = sshll.u32 %s6364_s25, 5 }
  0x83   : > { %s4198_s29 = sshll.u32 %s6134_s12, 6  ;;  %s7475_s0 = sld [smem:[#allocation21_spill]] }
  0x84   : > { %s331_s30 = scalar_lea.vmem [#allocation3], %s4197_s27  ;;  %p6376_p8 = pnand %p5609_p12, %p44_p13 }
  0x85   : > { %s337_s16 = sshll.u32 %s331_s30, 4  ;;  %s328_s20 = scalar_lea.sflag [#allocation4], %s6364_s25  ;;  %s6380_s16 = int_to_ptr.vmem [resolvable:$true] %s337_s16 }
  0x86   : > { %p5996_p2 = pneg %p6376_p8 }
  0x89   : > { %s6374_s24 = scalar_lea.hbm %s7475_s0, %s4198_s29  ;;  %s5999_s27 = scalar_lea.hbm %s7475_s0, 1024 }
  0x8a   : > { %s5994_s9 = scalar_lea.hbm %s6374_s24, 512  ;;  %p6000_p9 = scmp.lt.u32.totalorder %s6374_s24, %s7475_s0 }
  0x8b   : > { %p5995_p0 = scmp.ne.s32.totalorder %s6374_s24, %s5994_s9  ;;  %p6001_p11 = scmp.lt.u32.totalorder %s5999_s27, %s5994_s9 }
  0x8c   : > { %p6003_p4 = scmp.lt.u32.totalorder %s5994_s9, %s6374_s24 }
  0x8d   : > { %p5997_p3 = pnand %p5996_p2, %p5995_p0  ;;  %p6002_p1 = por %p6001_p11, %p6000_p9 }
  0x8f   : > { %p5998_p7 = pneg %p5997_p3  ;;  %p6004_p10 = por %p6003_p4, %p6002_p1 }
  0x91   : > { %p6005_p5 = pnand %p6004_p10, %p5998_p7 }
  0x93   : > { %6008 = shalt.err (!%p6005_p5)
}
  0x94   : > { %s6009_s21 = scalar_lea.vmem %s6380_s16, 512  ;;  %s6142_s30 = smov [#allocation3]  }
  0x95   : > { %p6010_p6 = scmp.ne.s32.totalorder %s6380_s16, %s6009_s21  ;;  %s6014_s18 = sshll.u32 %s6142_s30, 4  ;;  %s6015_s18 = int_to_ptr.vmem [resolvable:$false] %s6014_s18 }
  0x96   : > { %s6016_s23 = scalar_lea.vmem %s6015_s18, 1024  ;;  %p6017_p0 = scmp.lt.s32.totalorder %s6380_s16, %s6015_s18 }
  0x97   : > { %p6012_p12 = pnand %p6010_p6, %p5996_p2  ;;  %p6018_p3 = scmp.lt.s32.totalorder %s6016_s23, %s6009_s21 }
  0x99   : > { %p6013_p13 = pneg %p6012_p12  ;;  %p6019_p9 = por %p6018_p3, %p6017_p0 }
  0x9b   : > { %p6020_p11 = pnand %p6019_p9, %p6013_p13 }
  0x9d   : > { %6023 = shalt.err (!%p6020_p11)
}
  0x9e   : > { %s6143_s9 = smov 128   ;;  %s6144_s27 = smov 64  }
  0x9f   : > { %s6145_s29 = smov 4   ;;  %s4199_s19 = sshll.u32 %s6364_s25, 6 }
  0xa0   : > { %5601 = dma.hbm_to_vmem [thread:$0]  (!%p6376_p8), %s6374_s24, 512, %s6380_s16, %s328_s20, %s6143_s9, %s6144_s27, %s6145_s29  }
  0xa1   : > { %s4228_s21 = sshll.u32 %s6134_s12, 10  ;;  %s351_s22 = scalar_lea.vmem [#allocation6], %s4199_s19 }
  0xa2   : > { %s6418_s23 = scalar_lea.hbm %s7449_s1, %s4228_s21  ;;  %s358_s0 = sshll.u32 %s351_s22, 4  ;;  %s6420_s0 = int_to_ptr.vmem [resolvable:$true] %s358_s0 }
  0xa3   : > { %s7477_s3 = sand.u32 1, %s6134_s12   ;;  %s6024_s6 = scalar_lea.hbm %s6418_s23, 1024 }
  0xa4   : > { %s6424_s4 = scalar_lea.sflag [#allocation7], %s7477_s3  ;;  %p6025_p7 = scmp.ne.s32.totalorder %s6418_s23, %s6024_s6 }
  0xa5   : > { %s6029_s16 = scalar_lea.hbm %s7449_s1, 2048  ;;  %p6030_p10 = scmp.lt.u32.totalorder %s6418_s23, %s7449_s1 }
  0xa6   : > { %p6027_p1 = pnand %p6025_p7, %p5996_p2  ;;  %p6031_p5 = scmp.lt.u32.totalorder %s6029_s16, %s6024_s6 }
  0xa7   : > { %p6033_p12 = scmp.lt.u32.totalorder %s6024_s6, %s6418_s23 }
  0xa8   : > { %p6028_p4 = pneg %p6027_p1  ;;  %p6032_p6 = por %p6031_p5, %p6030_p10 }
  0xaa   : > { %p6034_p13 = por %p6033_p12, %p6032_p6 }
  0xac   : > { %p6035_p0 = pnand %p6034_p13, %p6028_p4 }
  0xae   : > { %6038 = shalt.err (!%p6035_p0)
}
  0xaf   : > { %s6039_s3 = scalar_lea.vmem %s6420_s0, 1024  ;;  %s6146_s12 = smov [#allocation6]  }
  0xb0   : > { %p6040_p3 = scmp.ne.s32.totalorder %s6420_s0, %s6039_s3  ;;  %s6044_s22 = sshll.u32 %s6146_s12, 4  ;;  %s6045_s22 = int_to_ptr.vmem [resolvable:$false] %s6044_s22 }
  0xb1   : > { %s6046_s19 = scalar_lea.vmem %s6045_s22, 2048  ;;  %p6047_p7 = scmp.lt.s32.totalorder %s6420_s0, %s6045_s22 }
  0xb2   : > { %p6042_p9 = pnand %p6040_p3, %p5996_p2  ;;  %p6048_p1 = scmp.lt.s32.totalorder %s6046_s19, %s6039_s3 }
  0xb4   : > { %p6043_p11 = pneg %p6042_p9  ;;  %p6049_p10 = por %p6048_p1, %p6047_p7 }
  0xb6   : > { %p6050_p5 = pnand %p6049_p10, %p6043_p11 }
  0xb8   : > { %6053 = shalt.err (!%p6050_p5)
}
  0xb9   : > { %5604 = dma.hbm_to_vmem [thread:$0]  (!%p6376_p8), %s6418_s23, 1024, %s6420_s0, %s6424_s4, %s6144_s27, %s6144_s27, %s6145_s29  }
  0xba   : > { %p7478_p2 = scmp.ne.s32.totalorder %s7469_s15, 0 }
  0xbb   : > { %s372_s6 = sand.u32 (!%p7478_p2), 1, %s6126_s10   ;;  %p7479_p4 = scmp.ne.s32.totalorder (!%p7478_p2), %s7468_s14, 0 }
  0xbc   : > { %370 = sbr.rel (%p7478_p2) target bundleno = 4562 (0x11d2), region = 56  ;;  %s4203_s21 = sshll.u32 (!%p7478_p2), %s372_s6, 5 }
  0xbd   : > { %s373_s30 = scalar_lea.sflag (!%p7478_p2), [#allocation4], %s372_s6  ;;  %s6456_s18 = scalar_lea.vmem (!%p7478_p2), [#allocation3], %s4203_s21 }
  0xc3   : > { %6097 = dma.done.wait (%p7479_p4), %s373_s30, 512  }
  0xc4   : > { %6099 = vsyncadd (%p7479_p4), %s373_s30, 4294966784  ;;  %s381_s17 = sand.u32 1, %s6221_s13   ;;  %s4204_s25 = sshll.u32 %s372_s6, 6 }
  0xc5   : > { %s382_s0 = scalar_lea.sflag [#allocation7], %s381_s17  ;;  %s6463_s4 = scalar_lea.vmem [#allocation6], %s4204_s25 }
  0xc6   : > { %6101 = dma.done.wait (%p7479_p4), %s382_s0, 1024  }
  0xc7   : > { %6103 = vsyncadd (%p7479_p4), %s382_s0, 4294966272  ;;  %p7480_p8 = scmp.eq.s32.totalorder %s6221_s13, 0 }
  0xc9   : > { %6105 = dma.done.wait (%p7480_p8), [#allocation7], 8192   ;;  %p7481_p6 = pmov %p7480_p8 }
  0xcb   : > { %6107 = vsyncadd (%p7481_p6), [#allocation7], 4294959104  ;;  %p7482_p12 = pmov %p7481_p6 }
  0xcc   : > { %p7483_p13 = pmov %p7481_p6 }
  0xcd   : > { %6109 = dma.done.wait (%p7482_p12), [#allocation10], 16384  }
  0xce   : > { %6111 = vsyncadd (%p7483_p13), [#allocation10], 4294950912  ;;  %p7484_p0 = pmov %p7481_p6 }
  0xd0   : > { %6113 = dma.done.wait (%p7484_p0), [#allocation13], 8192   ;;  %p7485_p3 = pmov %p7484_p0 }
  0xd1   : > { %p7486_p9 = scmp.ne.s32.totalorder %s6221_s13, 0 }
  0xd2   : > { %6115 = vsyncadd (%p7485_p3), [#allocation13], 4294959104  ;;  %v6147_v0 = vmov (!%p7486_p9), 0.0  }
  0xd3   : > { %441 = sbr.rel (%p7486_p9) target bundleno = 218 (0xda), region = 84  ;;  %442 = vst [vmem:[#allocation2] sm:$0xff] (!%p7486_p9), %v6147_v0  ;;  %443 = vst [vmem:[#allocation2 + $0x8] sm:$0xff] (!%p7486_p9), %v6147_v0 }
  0xd4   : > { %444 = vst [vmem:[#allocation2 + $0x10] sm:$0xff] (!%p7486_p9), %v6147_v0  ;;  %445 = vst [vmem:[#allocation2 + $0x18] sm:$0xff] (!%p7486_p9), %v6147_v0 }
  0xd5   : > { %446 = vst [vmem:[#allocation2 + $0x20] sm:$0xff] (!%p7486_p9), %v6147_v0  ;;  %447 = vst [vmem:[#allocation2 + $0x28] sm:$0xff] (!%p7486_p9), %v6147_v0 }
  0xd6   : > { %448 = vst [vmem:[#allocation2 + $0x30] sm:$0xff] (!%p7486_p9), %v6147_v0  ;;  %449 = vst [vmem:[#allocation2 + $0x38] sm:$0xff] (!%p7486_p9), %v6147_v0 }
  0xda PF: > { %v5662_v1 = vld [vmem:[%s6463_s4] sm:$0xff]   ;;  %v5663_v2 = vld [vmem:[%s6463_s4 + $0x8] sm:$0xff]   ;;  %v5664_v3 = vld [vmem:[%s6463_s4 + $0x10] sm:$0xff]   ;;  %p4222_p11 = scmp.ne.s32.totalorder %s6221_s13, 1 }
  0xdb   : > { %4241 = vmatprep.subr.bf16.mxu0 %v5662_v1  ;;  %5417 = vmatprep.subr.bf16.mxu1 %v5662_v1  ;;  %v5665_v4 = vld [vmem:[%s6463_s4 + $0x18] sm:$0xff]   ;;  %v5670_v5 = vld [vmem:[%s6456_s18] sm:$0xff]   ;;  %v5671_v6 = vld [vmem:[%s6456_s18 + $0x10] sm:$0xff]   ;;  %v6148_v44 = vmov (!%p4222_p11), 0.0  }
  0xdc   : > { %4242 = vmatpush3.bf16.msra.mxu0 %v5662_v1  ;;  %5425 = vmatpush3.bf16.msra.mxu1 %v5662_v1  ;;  %v5666_v7 = vld [vmem:[%s6463_s4 + $0x20] sm:$0xff]   ;;  %v5667_v8 = vld [vmem:[%s6463_s4 + $0x28] sm:$0xff]   ;;  %v5668_v9 = vld [vmem:[%s6463_s4 + $0x30] sm:$0xff]  }
  0xdd   : > { %4243 = vmatprep.subr.bf16.mxu0 %v5663_v2  ;;  %5418 = vmatprep.subr.bf16.mxu1 %v5663_v2  ;;  %v5669_v10 = vld [vmem:[%s6463_s4 + $0x38] sm:$0xff]   ;;  %v5672_v11 = vld [vmem:[%s6456_s18 + $0x8] sm:$0xff]   ;;  %v452_v13 = vld [vmem:[#allocation2 + $0x10] sm:$0xff] }
  0xde   : > { %4257 = vmatprep.mubr.bf16.mxu0 %v5670_v5  ;;  %4261 = vmatprep.mubr.bf16.mxu1 %v5671_v6  ;;  %v5673_v12 = vld [vmem:[%s6456_s18 + $0x18] sm:$0xff]   ;;  %v456_v14 = vld [vmem:[#allocation2 + $0x30] sm:$0xff]  ;;  %v450_v15 = vld [vmem:[#allocation2] sm:$0xff] }
  0xdf   : > { %v454_v16 = vld [vmem:[#allocation2 + $0x20] sm:$0xff]  ;;  %v453_v19 = vld [vmem:[#allocation2 + $0x18] sm:$0xff]  ;;  %v451_v25 = vld [vmem:[#allocation2 + $0x8] sm:$0xff] }
  0xe0   : > { %4244 = vmatpush3.bf16.msra.mxu0 %v5663_v2  ;;  %5426 = vmatpush3.bf16.msra.mxu1 %v5663_v2  ;;  %v457_v20 = vld [vmem:[#allocation2 + $0x38] sm:$0xff]  ;;  %v455_v26 = vld [vmem:[#allocation2 + $0x28] sm:$0xff]  ;;  %v670_v42 = vld [vmem:[#allocation8] sm:$0xff] (!%p4222_p11) }
  0xe1   : > { %4245 = vmatprep.subr.bf16.mxu0 %v5664_v3  ;;  %5419 = vmatprep.subr.bf16.mxu1 %v5664_v3  ;;  %v671_v37 = vld [vmem:[#allocation8 + $0x8] sm:$0xff] (!%p4222_p11)  ;;  %v673_v39 = vld [vmem:[#allocation8 + $0x18] sm:$0xff] (!%p4222_p11)  ;;  %v674_v43 = vld [vmem:[#allocation8 + $0x20] sm:$0xff] (!%p4222_p11) }
  0xe2   : > { %v675_v38 = vld [vmem:[#allocation8 + $0x28] sm:$0xff] (!%p4222_p11)  ;;  %v677_v41 = vld [vmem:[#allocation8 + $0x38] sm:$0xff] (!%p4222_p11)  ;;  %v4267_v46 = vpack.c.bf16 (!%p4222_p11), %v674_v43, %v670_v42  ;;  %v672_v47 = vld [vmem:[#allocation8 + $0x10] sm:$0xff] (!%p4222_p11) }
  0xe3   : > { %v4265_v40 = vpack.c.bf16 (!%p4222_p11), %v675_v38, %v671_v37  ;;  %v4297_v45 = vpack.c.bf16 (!%p4222_p11), %v677_v41, %v673_v39  ;;  %v676_v48 = vld [vmem:[#allocation8 + $0x30] sm:$0xff] (!%p4222_p11)  ;;  %v679_v49 = vld [vmem:[#allocation8 + $0x48] sm:$0xff] (!%p4222_p11)  ;;  %v681_v52 = vld [vmem:[#allocation8 + $0x58] sm:$0xff] (!%p4222_p11) }
  0xe4   : > { %4246 = vmatpush3.bf16.msra.mxu0 %v5664_v3  ;;  %5427 = vmatpush3.bf16.msra.mxu1 %v5664_v3  ;;  %v4299_v50 = vpack.c.bf16 (!%p4222_p11), %v676_v48, %v672_v47  ;;  %v683_v51 = vld [vmem:[#allocation8 + $0x68] sm:$0xff] (!%p4222_p11)  ;;  %v685_v53 = vld [vmem:[#allocation8 + $0x78] sm:$0xff] (!%p4222_p11)  ;;  %v678_v56 = vld [vmem:[#allocation8 + $0x40] sm:$0xff] (!%p4222_p11) }
  0xe5   : > { %4247 = vmatprep.subr.bf16.mxu0 %v5665_v4  ;;  %5420 = vmatprep.subr.bf16.mxu1 %v5665_v4  ;;  %v4269_v54 = vpack.c.bf16 (!%p4222_p11), %v683_v51, %v679_v49  ;;  %v4301_v55 = vpack.c.bf16 (!%p4222_p11), %v685_v53, %v681_v52  ;;  %v682_v57 = vld [vmem:[#allocation8 + $0x60] sm:$0xff] (!%p4222_p11)  ;;  %v680_v58 = vld [vmem:[#allocation8 + $0x50] sm:$0xff] (!%p4222_p11)  ;;  %v687_v61 = vld [vmem:[#allocation8 + $0x88] sm:$0xff] (!%p4222_p11) }
  0xe6   : > { %v4271_v59 = vpack.c.bf16 (!%p4222_p11), %v682_v57, %v678_v56  ;;  %v684_v60 = vld [vmem:[#allocation8 + $0x70] sm:$0xff] (!%p4222_p11)  ;;  %v691_v62 = vld [vmem:[#allocation8 + $0xa8] sm:$0xff] (!%p4222_p11)  ;;  %v689_v1 = vld [vmem:[#allocation8 + $0x98] sm:$0xff] (!%p4222_p11) }
  0xe7   : > { %v4303_v63 = vpack.c.bf16 (!%p4222_p11), %v684_v60, %v680_v58  ;;  %v4273_v0 = vpack.c.bf16 (!%p4222_p11), %v691_v62, %v687_v61  ;;  %v693_v2 = vld [vmem:[#allocation8 + $0xb8] sm:$0xff] (!%p4222_p11)  ;;  %v686_v3 = vld [vmem:[#allocation8 + $0x80] sm:$0xff] (!%p4222_p11)  ;;  %v688_v6 = vld [vmem:[#allocation8 + $0x90] sm:$0xff] (!%p4222_p11) }
  0xe8   : > { %4248 = vmatpush3.bf16.msra.mxu0 %v5665_v4  ;;  %5428 = vmatpush3.bf16.msra.mxu1 %v5665_v4  ;;  %v4305_v4 = vpack.c.bf16 (!%p4222_p11), %v693_v2, %v689_v1  ;;  %v690_v5 = vld [vmem:[#allocation8 + $0xa0] sm:$0xff] (!%p4222_p11)  ;;  %v712_v41 = vld [vmem:[#allocation8 + $0x150] sm:$0xff] (!%p4222_p11)  ;;  %v721_v47 = vld [vmem:[#allocation8 + $0x198] sm:$0xff] (!%p4222_p11) }
  0xe9   : > { %4249 = vmatprep.subr.bf16.mxu0 %v5666_v7  ;;  %5421 = vmatprep.subr.bf16.mxu1 %v5666_v7  ;;  %v710_v39 = vld [vmem:[#allocation8 + $0x140] sm:$0xff] (!%p4222_p11)  ;;  %v716_v43 = vld [vmem:[#allocation8 + $0x170] sm:$0xff] (!%p4222_p11)  ;;  %v725_v48 = vld [vmem:[#allocation8 + $0x1b8] sm:$0xff] (!%p4222_p11) }
  0xea   : > { %v722_v51 = vld [vmem:[#allocation8 + $0x1a0] sm:$0xff] (!%p4222_p11)  ;;  %v4319_v52 = vpack.c.bf16 (!%p4222_p11), %v716_v43, %v712_v41  ;;  %v4321_v57 = vpack.c.bf16 (!%p4222_p11), %v725_v48, %v721_v47  ;;  %v724_v58 = vld [vmem:[#allocation8 + $0x1b0] sm:$0xff] (!%p4222_p11)  ;;  %v731_v60 = vld [vmem:[#allocation8 + $0x1e8] sm:$0xff] (!%p4222_p11) }
  0xeb   : > { %v6501_v56 = vld [vmem:[%s7450_s2] ss:$0 sm:$0xff] (!%p4222_p11)  ;;  %v729_v62 = vld [vmem:[#allocation8 + $0x1d8] sm:$0xff] (!%p4222_p11)  ;;  %v999_v41 = vld [vmem:[#allocation9 + $0x88] sm:$0xff] (!%p4222_p11) }
  0xec   : > { %4250 = vmatpush3.bf16.msra.mxu0 %v5666_v7  ;;  %5429 = vmatpush3.bf16.msra.mxu1 %v5666_v7  ;;  %v692_v7 = vld [vmem:[#allocation8 + $0xb0] sm:$0xff] (!%p4222_p11) }
  0xed   : > { %4251 = vmatprep.subr.bf16.mxu0 %v5667_v8  ;;  %5422 = vmatprep.subr.bf16.mxu1 %v5667_v8 }
  0xf0   : > { %4252 = vmatpush3.bf16.msra.mxu0 %v5667_v8  ;;  %5430 = vmatpush3.bf16.msra.mxu1 %v5667_v8  ;;  %v4275_v8 = vpack.c.bf16 (!%p4222_p11), %v690_v5, %v686_v3  ;;  %v730_v5 = vld [vmem:[#allocation8 + $0x1e0] sm:$0xff] (!%p4222_p11) }
  0xf1   : > { %4253 = vmatprep.subr.bf16.mxu0 %v5668_v9  ;;  %5423 = vmatprep.subr.bf16.mxu1 %v5668_v9 }
  0xf4   : > { %4254 = vmatpush3.bf16.msra.mxu0 %v5668_v9  ;;  %5431 = vmatpush3.bf16.msra.mxu1 %v5668_v9  ;;  %v695_v9 = vld [vmem:[#allocation8 + $0xc8] sm:$0xff] (!%p4222_p11) }
  0xf5   : > { %4255 = vmatprep.subr.bf16.mxu0 %v5669_v10  ;;  %5424 = vmatprep.subr.bf16.mxu1 %v5669_v10 }
  0xf8   : > { %4256 = vmatpush3.bf16.msra.mxu0 %v5669_v10  ;;  %5432 = vmatpush3.bf16.msra.mxu1 %v5669_v10  ;;  %v699_v10 = vld [vmem:[#allocation8 + $0xe8] sm:$0xff] (!%p4222_p11) }
  0xf9   : > { %4266 = vmatprep.subr.bf16.mxu0 (!%p4222_p11), %v4265_v40  ;;  %4298 = vmatprep.subr.bf16.mxu1 (!%p4222_p11), %v4297_v45  ;;  %v714_v40 = vld [vmem:[#allocation8 + $0x160] sm:$0xff] (!%p4222_p11)  ;;  %v719_v45 = vld [vmem:[#allocation8 + $0x188] sm:$0xff] (!%p4222_p11) }
  0xfa   : > { %v4287_v49 = vpack.c.bf16 (!%p4222_p11), %v714_v40, %v710_v39 }
  0xfb   : > { %4258 = vmatmul.mubr.bf16.vlgmr.msra.gmra.mrb[0].mxu0 %v5672_v11  ;;  %4262 = vmatmul.mubr.bf16.vlgmr.msra.gmra.mrb[0].mxu1 %v5673_v12  ;;  %v697_v11 = vld [vmem:[#allocation8 + $0xd8] sm:$0xff] (!%p4222_p11)  ;;  %v4307_v12 = vpack.c.bf16 (!%p4222_p11), %v692_v7, %v688_v6  ;;  %v728_v6 = vld [vmem:[#allocation8 + $0x1d0] sm:$0xff] (!%p4222_p11) }
  0xfc   : > { %820 = vmatprep.mubr.f32.mxu0 (!%p4222_p11), %v6148_v44  ;;  %933 = vmatprep.mubr.f32.mxu1 (!%p4222_p11), %v6148_v44 }
  0xfd   : > { %4268 = vmatpush1.bf16.msra.mxu0 (!%p4222_p11), %v4267_v46  ;;  %4300 = vmatpush1.bf16.msra.mxu1 (!%p4222_p11), %v4299_v50  ;;  %v723_v46 = vld [vmem:[#allocation8 + $0x1a8] sm:$0xff] (!%p4222_p11)  ;;  %v718_v50 = vld [vmem:[#allocation8 + $0x180] sm:$0xff] (!%p4222_p11) }
  0xfe   : > { %4270 = vmatprep.subr.bf16.mxu0 (!%p4222_p11), %v4269_v54  ;;  %4302 = vmatprep.subr.bf16.mxu1 (!%p4222_p11), %v4301_v55  ;;  %v4289_v53 = vpack.c.bf16 (!%p4222_p11), %v723_v46, %v719_v45  ;;  %v720_v54 = vld [vmem:[#allocation8 + $0x190] sm:$0xff] (!%p4222_p11)  ;;  %v1001_v45 = vld [vmem:[#allocation9 + $0x98] sm:$0xff] (!%p4222_p11) }
  0xff   : > { %v4323_v2 = vpack.c.bf16 (!%p4222_p11), %v724_v58, %v720_v54  ;;  %v1005_v46 = vld [vmem:[#allocation9 + $0xb8] sm:$0xff] (!%p4222_p11)  ;;  %v1004_v54 = vld [vmem:[#allocation9 + $0xb0] sm:$0xff] (!%p4222_p11)  ;;  %v1007_v58 = vld [vmem:[#allocation9 + $0xc8] sm:$0xff] (!%p4222_p11) }
 0x101   : > { %4272 = vmatpush1.bf16.msra.mxu0 (!%p4222_p11), %v4271_v59  ;;  %4304 = vmatpush1.bf16.msra.mxu1 (!%p4222_p11), %v4303_v63  ;;  %v727_v59 = vld [vmem:[#allocation8 + $0x1c8] sm:$0xff] (!%p4222_p11)  ;;  %v733_v63 = vld [vmem:[#allocation8 + $0x1f8] sm:$0xff] (!%p4222_p11) }
 0x102   : > { %4274 = vmatprep.subr.bf16.mxu0 (!%p4222_p11), %v4273_v0  ;;  %4306 = vmatprep.subr.bf16.mxu1 (!%p4222_p11), %v4305_v4  ;;  %v4291_v0 = vpack.c.bf16 (!%p4222_p11), %v722_v51, %v718_v50  ;;  %v4293_v3 = vpack.c.bf16 (!%p4222_p11), %v731_v60, %v727_v59  ;;  %v726_v4 = vld [vmem:[#allocation8 + $0x1c0] sm:$0xff] (!%p4222_p11)  ;;  %v1011_v59 = vld [vmem:[#allocation9 + $0xe8] sm:$0xff] (!%p4222_p11) }
 0x103   : > { %v998_v50 = vld [vmem:[#allocation9 + $0x80] sm:$0xff] (!%p4222_p11) }
 0x104   : > { %v1002_v51 = vld [vmem:[#allocation9 + $0xa0] sm:$0xff] (!%p4222_p11) }
 0x105   : > { %4276 = vmatpush1.bf16.msra.mxu0 (!%p4222_p11), %v4275_v8  ;;  %4308 = vmatpush1.bf16.msra.mxu1 (!%p4222_p11), %v4307_v12  ;;  %v4325_v8 = vpack.c.bf16 (!%p4222_p11), %v733_v63, %v729_v62  ;;  %v985_v12 = vld [vmem:[#allocation9 + $0x18] sm:$0xff] (!%p4222_p11)  ;;  %v6538_v62 = vpack.c.bf16 (!%p4222_p11), %v1002_v51, %v998_v50 }
 0x106   : > { %v1009_v63 = vld [vmem:[#allocation9 + $0xd8] sm:$0xff] (!%p4222_p11) }
 0x107   : > { %v1037_v50 = vld [vmem:[#allocation9 + $0x1b8] sm:$0xff] (!%p4222_p11) }
 0x1ce   : > { %v4259_v17 = vpop.f32.mrb[0].mxu0  ;;  %v4263_v18 = vpop.f32.mrb[0].mxu1  ;;  %638 = sbr.rel (%p4222_p11) target bundleno = 4530 (0x11b2), region = 88 }
 0x1cf   : > { %v621_v21 = vadd.f32 %v4259_v17, %v452_v13  ;;  %v625_v22 = vadd.f32 %v4263_v18, %v456_v14  ;;  %v588_v23 = vpop.f32.mrb[1].mxu0  ;;  %v604_v24 = vpop.f32.mrb[1].mxu1  ;;  %v4277_v13 = vpack.c.bf16 (!%p4222_p11), %v699_v10, %v695_v9  ;;  %v701_v14 = vld [vmem:[#allocation8 + $0xf8] sm:$0xff] (!%p4222_p11)  ;;  %v696_v18 = vld [vmem:[#allocation8 + $0xd0] sm:$0xff] (!%p4222_p11)  ;;  %v983_v10 = vld [vmem:[#allocation9 + $0x8] sm:$0xff] (!%p4222_p11) }
 0x1d0   : > { %v619_v27 = vadd.f32 %v588_v23, %v450_v15  ;;  %v623_v28 = vadd.f32 %v604_v24, %v454_v16  ;;  %v4260_v29 = vpop.f32.mrb[2].mxu0  ;;  %v4264_v30 = vpop.f32.mrb[2].mxu1  ;;  %v694_v15 = vld [vmem:[#allocation8 + $0xc0] sm:$0xff] (!%p4222_p11)  ;;  %v4309_v17 = vpack.c.bf16 (!%p4222_p11), %v701_v14, %v697_v11  ;;  %v709_v23 = vld [vmem:[#allocation8 + $0x138] sm:$0xff] (!%p4222_p11)  ;;  %v732_v9 = vld [vmem:[#allocation8 + $0x1f0] sm:$0xff] (!%p4222_p11) }
 0x1d1   : > { %629 = vst [vmem:[#allocation2 + $0x10] sm:$0xff] %v621_v21  ;;  %633 = vst [vmem:[#allocation2 + $0x30] sm:$0xff] %v625_v22  ;;  %v622_v31 = vadd.f32 %v4260_v29, %v453_v19  ;;  %v626_v32 = vadd.f32 %v4264_v30, %v457_v20  ;;  %v591_v33 = vpop.f32.mrb[3].mxu0  ;;  %v607_v34 = vpop.f32.mrb[3].mxu1  ;;  %v698_v16 = vld [vmem:[#allocation8 + $0xe0] sm:$0xff] (!%p4222_p11)  ;;  %v700_v19 = vld [vmem:[#allocation8 + $0xf0] sm:$0xff] (!%p4222_p11)  ;;  %4278 = vmatprep.subr.bf16.mxu0 (!%p4222_p11), %v4277_v13 }
 0x1d2   : > { %627 = vst [vmem:[#allocation2] sm:$0xff] %v619_v27  ;;  %631 = vst [vmem:[#allocation2 + $0x20] sm:$0xff] %v623_v28  ;;  %v620_v35 = vadd.f32 %v591_v33, %v451_v25  ;;  %v624_v36 = vadd.f32 %v607_v34, %v455_v26  ;;  %v703_v20 = vld [vmem:[#allocation8 + $0x108] sm:$0xff] (!%p4222_p11)  ;;  %v705_v22 = vld [vmem:[#allocation8 + $0x118] sm:$0xff] (!%p4222_p11)  ;;  %v4279_v24 = vpack.c.bf16 (!%p4222_p11), %v698_v16, %v694_v15  ;;  %4310 = vmatprep.subr.bf16.mxu1 (!%p4222_p11), %v4309_v17 }
 0x1d3   : > { %630 = vst [vmem:[#allocation2 + $0x18] sm:$0xff] %v622_v31  ;;  %634 = vst [vmem:[#allocation2 + $0x38] sm:$0xff] %v626_v32  ;;  %v707_v21 = vld [vmem:[#allocation8 + $0x128] sm:$0xff] (!%p4222_p11)  ;;  %v4311_v25 = vpack.c.bf16 (!%p4222_p11), %v700_v19, %v696_v18  ;;  %v702_v27 = vld [vmem:[#allocation8 + $0x100] sm:$0xff] (!%p4222_p11)  ;;  %v4313_v30 = vpack.c.bf16 (!%p4222_p11), %v709_v23, %v705_v22  ;;  %v4295_v15 = vpack.c.bf16 (!%p4222_p11), %v730_v5, %v726_v4 }
 0x1d4   : > { %628 = vst [vmem:[#allocation2 + $0x8] sm:$0xff] %v620_v35  ;;  %632 = vst [vmem:[#allocation2 + $0x28] sm:$0xff] %v624_v36  ;;  %v4281_v26 = vpack.c.bf16 (!%p4222_p11), %v707_v21, %v703_v20  ;;  %v706_v28 = vld [vmem:[#allocation8 + $0x120] sm:$0xff] (!%p4222_p11)  ;;  %v704_v29 = vld [vmem:[#allocation8 + $0x110] sm:$0xff] (!%p4222_p11)  ;;  %4280 = vmatpush1.bf16.msra.mxu0 (!%p4222_p11), %v4279_v24  ;;  %v4327_v17 = vpack.c.bf16 (!%p4222_p11), %v732_v9, %v728_v6  ;;  %v6546_v4 = vpack.c.bf16 (!%p4222_p11), %v1011_v59, %v1007_v58 }
 0x1d5   : > { %v708_v31 = vld [vmem:[#allocation8 + $0x130] sm:$0xff]  ;;  %v711_v32 = vld [vmem:[#allocation8 + $0x148] sm:$0xff]  ;;  %v713_v34 = vld [vmem:[#allocation8 + $0x158] sm:$0xff]  ;;  %v4283_v36 = vpack.c.bf16 %v706_v28, %v702_v27  ;;  %4312 = vmatpush1.bf16.msra.mxu1 %v4311_v25 }
 0x1d6   : > { %v715_v33 = vld [vmem:[#allocation8 + $0x168] sm:$0xff]  ;;  %v717_v35 = vld [vmem:[#allocation8 + $0x178] sm:$0xff]  ;;  %4282 = vmatprep.subr.bf16.mxu0 %v4281_v26  ;;  %v4315_v37 = vpack.c.bf16 %v708_v31, %v704_v29  ;;  %4314 = vmatprep.subr.bf16.mxu1 %v4313_v30  ;;  %v982_v19 = vld [vmem:[#allocation9] sm:$0xff] }
 0x1d7   : > { %v4285_v38 = vpack.c.bf16 %v715_v33, %v711_v32  ;;  %v4317_v42 = vpack.c.bf16 %v717_v35, %v713_v34  ;;  %v987_v11 = vld [vmem:[#allocation9 + $0x28] sm:$0xff]  ;;  %v989_v13 = vld [vmem:[#allocation9 + $0x38] sm:$0xff]  ;;  %v986_v20 = vld [vmem:[#allocation9 + $0x20] sm:$0xff] }
 0x1d8   : > { %4284 = vmatpush1.bf16.msra.mxu0 %v4283_v36  ;;  %v641_v14 = vld [vmem:[#allocation2 + $0x10] sm:$0xff]  ;;  %v6506_v18 = vpack.c.bf16 %v987_v11, %v983_v10  ;;  %v6508_v21 = vpack.c.bf16 %v989_v13, %v985_v12  ;;  %v991_v25 = vld [vmem:[#allocation9 + $0x48] sm:$0xff]  ;;  %v6511_v28 = vpack.c.bf16 %v986_v20, %v982_v19  ;;  %v993_v29 = vld [vmem:[#allocation9 + $0x58] sm:$0xff] }
 0x1d9   : > { %4316 = vmatpush1.bf16.msra.mxu1 %v4315_v37  ;;  %4286 = vmatprep.subr.bf16.mxu0 %v4285_v38  ;;  %v639_v55 = vld [vmem:[#allocation2] sm:$0xff]  ;;  %v656_v16 = vadd.f32 %v6501_v56, %v641_v14  ;;  %v984_v22 = vld [vmem:[#allocation9 + $0x10] sm:$0xff]  ;;  %v995_v26 = vld [vmem:[#allocation9 + $0x68] sm:$0xff] }
 0x1da   : > { %4318 = vmatprep.subr.bf16.mxu1 %v4317_v42  ;;  %v654_v61 = vadd.f32 %v6501_v56, %v639_v55  ;;  %v988_v23 = vld [vmem:[#allocation9 + $0x30] sm:$0xff]  ;;  %v642_v24 = vld [vmem:[#allocation2 + $0x18] sm:$0xff]  ;;  %v990_v32 = vld [vmem:[#allocation9 + $0x40] sm:$0xff]  ;;  %v6517_v36 = vpack.c.bf16 %v995_v26, %v991_v25 }
 0x1db   : > { %v640_v1 = vld [vmem:[#allocation2 + $0x8] sm:$0xff]  ;;  %v657_v27 = vadd.f32 %v6501_v56, %v642_v24  ;;  %v997_v30 = vld [vmem:[#allocation9 + $0x78] sm:$0xff]  ;;  %v6514_v31 = vpack.c.bf16 %v988_v23, %v984_v22  ;;  %v994_v33 = vld [vmem:[#allocation9 + $0x60] sm:$0xff] }
 0x1dc   : > { %4288 = vmatpush1.bf16.msra.mxu0 %v4287_v49  ;;  %5674 = vtanh.f32 %v654_v61  ;;  %v655_v7 = vadd.f32 %v6501_v56, %v640_v1  ;;  %v643_v34 = vld [vmem:[#allocation2 + $0x20] sm:$0xff]  ;;  %v992_v37 = vld [vmem:[#allocation9 + $0x50] sm:$0xff]  ;;  %v6520_v40 = vpack.c.bf16 %v997_v30, %v993_v29  ;;  %v1003_v42 = vld [vmem:[#allocation9 + $0xa8] sm:$0xff]  ;;  %v6523_v43 = vpack.c.bf16 %v994_v33, %v990_v32 }
 0x1dd   : > { %4320 = vmatpush1.bf16.msra.mxu1 %v4319_v52  ;;  %4290 = vmatprep.subr.bf16.mxu0 %v4289_v53  ;;  %v996_v38 = vld [vmem:[#allocation9 + $0x70] sm:$0xff]  ;;  %v658_v39 = vadd.f32 %v6501_v56, %v643_v34  ;;  %v644_v47 = vld [vmem:[#allocation2 + $0x28] sm:$0xff]  ;;  %v6531_v52 = vpack.c.bf16 %v1003_v42, %v999_v41  ;;  %v646_v11 = vld [vmem:[#allocation2 + $0x38] sm:$0xff] }
 0x1de   : > { %4322 = vmatprep.subr.bf16.mxu1 %v4321_v57  ;;  %5676 = vtanh.f32 %v655_v7  ;;  %v6527_v49 = vpack.c.bf16 %v996_v38, %v992_v37  ;;  %v1000_v53 = vld [vmem:[#allocation9 + $0x90] sm:$0xff]  ;;  %v659_v55 = vadd.f32 %v6501_v56, %v644_v47  ;;  %v6535_v57 = vpack.c.bf16 %v1005_v46, %v1001_v45  ;;  %v1015_v9 = vld [vmem:[#allocation9 + $0x108] sm:$0xff]  ;;  %v1017_v14 = vld [vmem:[#allocation9 + $0x118] sm:$0xff] }
 0x1df   : > { %5678 = vtanh.f32 %v656_v16  ;;  %v645_v60 = vld [vmem:[#allocation2 + $0x30] sm:$0xff]  ;;  %v6542_v1 = vpack.c.bf16 %v1004_v54, %v1000_v53  ;;  %v1019_v10 = vld [vmem:[#allocation9 + $0x128] sm:$0xff]  ;;  %v1018_v19 = vld [vmem:[#allocation9 + $0x120] sm:$0xff]  ;;  %v661_v24 = vadd.f32 %v6501_v56, %v646_v11 }
 0x1e0   : > { %4292 = vmatpush1.bf16.msra.mxu0 %v4291_v0  ;;  %5680 = vtanh.f32 %v657_v27  ;;  %v1013_v0 = vld [vmem:[#allocation9 + $0xf8] sm:$0xff]  ;;  %v1008_v5 = vld [vmem:[#allocation9 + $0xd0] sm:$0xff]  ;;  %v660_v7 = vadd.f32 %v6501_v56, %v645_v60  ;;  %v6561_v20 = vpack.c.bf16 %v1019_v10, %v1015_v9  ;;  %v1023_v26 = vld [vmem:[#allocation9 + $0x148] sm:$0xff] }
 0x1e1   : > { %4324 = vmatpush1.bf16.msra.mxu1 %v4323_v2  ;;  %4294 = vmatprep.subr.bf16.mxu0 %v4293_v3  ;;  %5682 = vtanh.f32 %v658_v39  ;;  %v1006_v2 = vld [vmem:[#allocation9 + $0xc0] sm:$0xff]  ;;  %v1012_v6 = vld [vmem:[#allocation9 + $0xf0] sm:$0xff]  ;;  %v1027_v27 = vld [vmem:[#allocation9 + $0x168] sm:$0xff] }
 0x1e2   : > { %4326 = vmatprep.subr.bf16.mxu1 %v4325_v8  ;;  %v1010_v3 = vld [vmem:[#allocation9 + $0xe0] sm:$0xff]  ;;  %5684 = vtanh.f32 %v659_v55  ;;  %v6550_v8 = vpack.c.bf16 %v1013_v0, %v1009_v63  ;;  %v6557_v16 = vpack.c.bf16 %v1012_v6, %v1008_v5  ;;  %v1016_v22 = vld [vmem:[#allocation9 + $0x110] sm:$0xff]  ;;  %v1025_v32 = vld [vmem:[#allocation9 + $0x158] sm:$0xff]  ;;  %v6576_v37 = vpack.c.bf16 %v1027_v27, %v1023_v26 }
 0x1e3   : > { %v6553_v13 = vpack.c.bf16 %v1010_v3, %v1006_v2  ;;  %v1020_v23 = vld [vmem:[#allocation9 + $0x130] sm:$0xff]  ;;  %5686 = vtanh.f32 %v660_v7  ;;  %v1029_v33 = vld [vmem:[#allocation9 + $0x178] sm:$0xff]  ;;  %v1022_v34 = vld [vmem:[#allocation9 + $0x140] sm:$0xff] }
 0x1e4   : > { %4296 = vmatpush1.bf16.msra.mxu0 %v4295_v15  ;;  %v1021_v15 = vld [vmem:[#allocation9 + $0x138] sm:$0xff]  ;;  %v6572_v56 = vpack.c.bf16 %v1020_v23, %v1016_v22  ;;  %v1024_v38 = vld [vmem:[#allocation9 + $0x150] sm:$0xff]  ;;  %5688 = vtanh.f32 %v661_v24  ;;  %v6579_v41 = vpack.c.bf16 %v1029_v33, %v1025_v32  ;;  %v1031_v42 = vld [vmem:[#allocation9 + $0x188] sm:$0xff]  ;;  %v736_v22 = vlaneseq }
 0x1e5   : > { %4328 = vmatpush1.bf16.msra.mxu1 %v4327_v17  ;;  %4330 = vmatprep.subr.bf16.mxu0 %v6506_v18  ;;  %v1014_v17 = vld [vmem:[#allocation9 + $0x100] sm:$0xff]  ;;  %v6565_v25 = vpack.c.bf16 %v1021_v15, %v1017_v14  ;;  %v1028_v39 = vld [vmem:[#allocation9 + $0x170] sm:$0xff]  ;;  %v1035_v45 = vld [vmem:[#allocation9 + $0x1a8] sm:$0xff] }
 0x1e6   : > { %v5675_v35 = vpop.eup %5674  ;;  %4362 = vmatprep.subr.bf16.mxu1 %v6508_v21  ;;  %v6568_v30 = vpack.c.bf16 %v1018_v19, %v1014_v17  ;;  %v6586_v51 = vpack.c.bf16 %v1028_v39, %v1024_v38  ;;  %v1030_v53 = vld [vmem:[#allocation9 + $0x180] sm:$0xff]  ;;  %v6590_v55 = vpack.c.bf16 %v1035_v45, %v1031_v42  ;;  %v1032_v58 = vld [vmem:[#allocation9 + $0x190] sm:$0xff]  ;;  %v1043_v63 = vld [vmem:[#allocation9 + $0x1e8] sm:$0xff]  ;;  %v6661_v23 = vshrl.u32 %v736_v22, 7 }
 0x1e7   : > { %821 = vmatmul.mubr.f32.vlgmr.msra.gmra.mrb[0].mxu0 %v5675_v35  ;;  %v1034_v54 = vld [vmem:[#allocation9 + $0x1a0] sm:$0xff]  ;;  %v1036_v59 = vld [vmem:[#allocation9 + $0x1b0] sm:$0xff]  ;;  %v1041_v3 = vld [vmem:[#allocation9 + $0x1d8] sm:$0xff] }
 0x1e8   : > { %934 = vmatmul.mubr.f32.vlgmr.msra.gmra.mrb[0].mxu1 %v5675_v35  ;;  %4332 = vmatpush1.bf16.msra.mxu0 %v6511_v28  ;;  %v5677_v48 = vpop.eup %5676  ;;  %v1026_v35 = vld [vmem:[#allocation9 + $0x160] sm:$0xff]  ;;  %v6596_v2 = vpack.c.bf16 %v1034_v54, %v1030_v53  ;;  %v1045_v5 = vld [vmem:[#allocation9 + $0x1f8] sm:$0xff]  ;;  %v6600_v6 = vpack.c.bf16 %v1036_v59, %v1032_v58  ;;  %v1040_v11 = vld [vmem:[#allocation9 + $0x1d0] sm:$0xff]  ;;  %v738_v24 = vsub.s32 0, %v6661_v23  ;;  %v742_v27 = vsub.s32 1, %v6661_v23 }
 0x1e9   : > { %4364 = vmatpush1.bf16.msra.mxu1 %v6514_v31  ;;  %826 = vmatprep.mubr.f32.mxu0 %v6148_v44  ;;  %v5679_v61 = vpop.eup %5678  ;;  %v6582_v47 = vpack.c.bf16 %v1026_v35, %v1022_v34  ;;  %v1038_v7 = vld [vmem:[#allocation9 + $0x1c0] sm:$0xff]  ;;  %v6607_v14 = vpack.c.bf16 %v1045_v5, %v1041_v3  ;;  %v746_v32 = vsub.s32 2, %v6661_v23  ;;  %v7462_v45 = vsub.s32 3, %v6661_v23 }
 0x1ea   : > { %939 = vmatprep.mubr.f32.mxu1 %v6148_v44  ;;  %4334 = vmatprep.subr.bf16.mxu0 %v6517_v36  ;;  %v5681_v12 = vpop.eup %5680  ;;  %v1042_v9 = vld [vmem:[#allocation9 + $0x1e0] sm:$0xff] }
 0x1eb   : > { %827 = vmatmul.mubr.f32.gmra.mrb[2].mxu0 %v5677_v48  ;;  %4366 = vmatprep.subr.bf16.mxu1 %v6520_v40  ;;  %v5683_v29 = vpop.eup %5682  ;;  %v6610_v17 = vpack.c.bf16 %v1042_v9, %v1038_v7  ;;  %v734_v26 = vld [vmem:[%s7453_s5] sm:$0xf] }
 0x1ec   : > { %940 = vmatmul.mubr.f32.gmra.mrb[2].mxu1 %v5677_v48  ;;  %4336 = vmatpush1.bf16.msra.mxu0 %v6523_v43  ;;  %v5685_v46 = vpop.eup %5684  ;;  %v1033_v48 = vld [vmem:[#allocation9 + $0x198] sm:$0xff]  ;;  %v6675_v33 = vrot.slane %v734_v26, %v742_v27  ;;  %v6680_v38 = vrot.slane %v734_v26, %v746_v32  ;;  %v6687_v58 = vrot.slane %v734_v26, %v7462_v45 }
 0x1ed   : > { %4368 = vmatpush1.bf16.msra.mxu1 %v6527_v49  ;;  %832 = vmatprep.mubr.f32.mxu0 %v6148_v44  ;;  %v6593_v60 = vpack.c.bf16 %v1037_v50, %v1033_v48  ;;  %v5687_v0 = vpop.eup %5686 }
 0x1ee   : > { %945 = vmatprep.mubr.f32.mxu1 %v6148_v44  ;;  %4338 = vmatprep.subr.bf16.mxu0 %v6531_v52  ;;  %v5689_v15 = vpop.eup %5688 }
 0x1ef   : > { %833 = vmatmul.mubr.f32.gmra.mrb[4].mxu0 %v5679_v61  ;;  %4370 = vmatprep.subr.bf16.mxu1 %v6535_v57 }
 0x1f0   : > { %946 = vmatmul.mubr.f32.gmra.mrb[4].mxu1 %v5679_v61  ;;  %4340 = vmatpush1.bf16.msra.mxu0 %v6538_v62  ;;  %v1039_v61 = vld [vmem:[#allocation9 + $0x1c8] sm:$0xff] }
 0x1f1   : > { %4372 = vmatpush1.bf16.msra.mxu1 %v6542_v1  ;;  %838 = vmatprep.mubr.f32.mxu0 %v6148_v44  ;;  %v6604_v10 = vpack.c.bf16 %v1043_v63, %v1039_v61 }
 0x1f2   : > { %951 = vmatprep.mubr.f32.mxu1 %v6148_v44  ;;  %4342 = vmatprep.subr.bf16.mxu0 %v6546_v4 }
 0x1f3   : > { %839 = vmatmul.mubr.f32.gmra.mrb[6].mxu0 %v5681_v12  ;;  %4374 = vmatprep.subr.bf16.mxu1 %v6550_v8 }
 0x1f4   : > { %952 = vmatmul.mubr.f32.gmra.mrb[6].mxu1 %v5681_v12  ;;  %4344 = vmatpush1.bf16.msra.mxu0 %v6553_v13  ;;  %v1044_v12 = vld [vmem:[#allocation9 + $0x1f0] sm:$0xff] }
 0x1f5   : > { %4376 = vmatpush1.bf16.msra.mxu1 %v6557_v16  ;;  %844 = vmatprep.mubr.f32.mxu0 %v6148_v44  ;;  %v6614_v19 = vpack.c.bf16 %v1044_v12, %v1040_v11 }
 0x1f6   : > { %957 = vmatprep.mubr.f32.mxu1 %v6148_v44  ;;  %4346 = vmatprep.subr.bf16.mxu0 %v6561_v20 }
 0x1f7   : > { %845 = vmatmul.mubr.f32.gmra.mrb[8].mxu0 %v5683_v29  ;;  %4378 = vmatprep.subr.bf16.mxu1 %v6565_v25 }
 0x1f8   : > { %958 = vmatmul.mubr.f32.gmra.mrb[8].mxu1 %v5683_v29  ;;  %4348 = vmatpush1.bf16.msra.mxu0 %v6568_v30  ;;  %v6670_v29 = vrot.slane %v734_v26, %v738_v24 }
 0x1f9   : > { %4380 = vmatpush1.bf16.msra.mxu1 %v6572_v56  ;;  %850 = vmatprep.mubr.f32.mxu0 %v6148_v44 }
 0x1fa   : > { %963 = vmatprep.mubr.f32.mxu1 %v6148_v44  ;;  %4350 = vmatprep.subr.bf16.mxu0 %v6576_v37 }
 0x1fb   : > { %851 = vmatmul.mubr.f32.gmra.mrb[10].mxu0 %v5685_v46  ;;  %4382 = vmatprep.subr.bf16.mxu1 %v6579_v41 }
 0x1fc   : > { %964 = vmatmul.mubr.f32.gmra.mrb[10].mxu1 %v5685_v46  ;;  %4352 = vmatpush1.bf16.msra.mxu0 %v6582_v47 }
 0x1fd   : > { %4384 = vmatpush1.bf16.msra.mxu1 %v6586_v51  ;;  %856 = vmatprep.mubr.f32.mxu0 %v6148_v44 }
 0x1fe   : > { %969 = vmatprep.mubr.f32.mxu1 %v6148_v44  ;;  %4354 = vmatprep.subr.bf16.mxu0 %v6590_v55 }
 0x1ff   : > { %857 = vmatmul.mubr.f32.gmra.mrb[12].mxu0 %v5687_v0  ;;  %4386 = vmatprep.subr.bf16.mxu1 %v6593_v60 }
 0x200   : > { %970 = vmatmul.mubr.f32.gmra.mrb[12].mxu1 %v5687_v0  ;;  %4356 = vmatpush1.bf16.msra.mxu0 %v6596_v2 }
 0x201   : > { %4388 = vmatpush1.bf16.msra.mxu1 %v6600_v6  ;;  %862 = vmatprep.mubr.f32.mxu0 %v6148_v44 }
 0x202   : > { %975 = vmatprep.mubr.f32.mxu1 %v6148_v44  ;;  %4358 = vmatprep.subr.bf16.mxu0 %v6604_v10 }
 0x203   : > { %863 = vmatmul.mubr.f32.gmra.mrb[14].mxu0 %v5689_v15  ;;  %4390 = vmatprep.subr.bf16.mxu1 %v6607_v14 }
 0x204   : > { %976 = vmatmul.mubr.f32.gmra.mrb[14].mxu1 %v5689_v15  ;;  %4360 = vmatpush1.bf16.msra.mxu0 %v6610_v17 }
 0x205   : > { %4392 = vmatpush1.bf16.msra.mxu1 %v6614_v19  ;;  %1110 = vmatprep.mubr.f32.mxu0 %v6148_v44 }
 0x206   : > { %1181 = vmatprep.mubr.f32.mxu1 %v6148_v44  ;;  %4394 = vmatprep.subr.bf16.mxu0 %v6506_v18 }
 0x207   : > { %1111 = vmatmul.mubr.f32.vlgmr.msra.gmra.mrb[0].mxu0 %v6148_v44  ;;  %4426 = vmatprep.subr.bf16.mxu1 %v6508_v21 }
 0x208   : > { %1182 = vmatmul.mubr.f32.vlgmr.msra.gmra.mrb[0].mxu1 %v6148_v44  ;;  %4396 = vmatpush1.bf16.msra.mxu0 %v6511_v28 }
 0x209   : > { %4428 = vmatpush1.bf16.msra.mxu1 %v6514_v31  ;;  %4398 = vmatprep.subr.bf16.mxu0 %v6517_v36 }
 0x20a   : > { %4430 = vmatprep.subr.bf16.mxu1 %v6520_v40  ;;  %1275 = vmatprep.mubr.f32.mxu0 %v6148_v44 }
 0x20b   : > { %1346 = vmatprep.mubr.f32.mxu1 %v6148_v44 }
 0x20c   : > { %4400 = vmatpush1.bf16.msra.mxu0 %v6523_v43 }
 0x20d   : > { %4432 = vmatpush1.bf16.msra.mxu1 %v6527_v49  ;;  %4402 = vmatprep.subr.bf16.mxu0 %v6531_v52 }
 0x20e   : > { %4434 = vmatprep.subr.bf16.mxu1 %v6535_v57 }
 0x210   : > { %4404 = vmatpush1.bf16.msra.mxu0 %v6538_v62 }
 0x211   : > { %4436 = vmatpush1.bf16.msra.mxu1 %v6542_v1  ;;  %4406 = vmatprep.subr.bf16.mxu0 %v6546_v4 }
 0x212   : > { %4438 = vmatprep.subr.bf16.mxu1 %v6550_v8 }
 0x214   : > { %4408 = vmatpush1.bf16.msra.mxu0 %v6553_v13 }
 0x215   : > { %4440 = vmatpush1.bf16.msra.mxu1 %v6557_v16  ;;  %4410 = vmatprep.subr.bf16.mxu0 %v6561_v20 }
 0x216   : > { %4442 = vmatprep.subr.bf16.mxu1 %v6565_v25 }
 0x218   : > { %4412 = vmatpush1.bf16.msra.mxu0 %v6568_v30 }
 0x219   : > { %4444 = vmatpush1.bf16.msra.mxu1 %v6572_v56  ;;  %4414 = vmatprep.subr.bf16.mxu0 %v6576_v37 }
 0x21a   : > { %4446 = vmatprep.subr.bf16.mxu1 %v6579_v41 }
 0x21c   : > { %4416 = vmatpush1.bf16.msra.mxu0 %v6582_v47 }
 0x21d   : > { %4448 = vmatpush1.bf16.msra.mxu1 %v6586_v51  ;;  %4418 = vmatprep.subr.bf16.mxu0 %v6590_v55 }
 0x21e   : > { %4450 = vmatprep.subr.bf16.mxu1 %v6593_v60 }
 0x220   : > { %4420 = vmatpush1.bf16.msra.mxu0 %v6596_v2 }
 0x221   : > { %4452 = vmatpush1.bf16.msra.mxu1 %v6600_v6  ;;  %4422 = vmatprep.subr.bf16.mxu0 %v6604_v10 }
 0x222   : > { %4454 = vmatprep.subr.bf16.mxu1 %v6607_v14 }
 0x224   : > { %4424 = vmatpush1.bf16.msra.mxu0 %v6610_v17 }
 0x225   : > { %4456 = vmatpush1.bf16.msra.mxu1 %v6614_v19  ;;  %4458 = vmatprep.subr.bf16.mxu0 %v6506_v18 }
 0x226   : > { %4490 = vmatprep.subr.bf16.mxu1 %v6508_v21 }
 0x2da   : > { %v1112_v34 = vpop.f32.mrb[0].mxu0 }
 0x2db   : > { %v5433_v35 = vadd.f32 %v1112_v34, %v6670_v29  ;;  %v1183_v39 = vpop.f32.mrb[0].mxu1  ;;  %v1114_v42 = vpop.f32.mrb[1].mxu0 }
 0x2dc   : > { %v5434_v46 = vadd.f32 %v1114_v42, %v6675_v33  ;;  %v1185_v48 = vpop.f32.mrb[1].mxu1  ;;  %v5449_v54 = vadd.f32 %v1183_v39, %v6680_v38 }
 0x2dd   : > { %v1192_v50 = vmul.f32 0.5, %v5433_v35  ;;  %v5450_v59 = vadd.f32 %v1185_v48, %v6687_v58 }
 0x2de   : > { %v1196_v53 = vmul.f32 0.5, %v5434_v46 }
 0x2df   : > { %5690 = vtanh.f32 %v1192_v50  ;;  %v1201_v61 = vmul.f32 0.5, %v5450_v59 }
 0x2e0   : > { %5692 = vtanh.f32 %v1196_v53 }
 0x2e1   : > { %5694 = vtanh.f32 %v5449_v54 }
 0x2e2   : > { %5696 = vtanh.f32 %v1201_v61 }
 0x2e9   : > { %v5691_v63 = vpop.eup %5690 }
 0x2ea   : > { %v5693_v0 = vpop.eup %5692  ;;  %v1194_v3 = vmul.f32 0.5, %v5691_v63 }
 0x2eb   : > { %v1198_v5 = vmul.f32 0.5, %v5693_v0  ;;  %v5695_v9 = vpop.eup %5694 }
 0x2ec   : > { %v1195_v7 = vadd.f32 0.5, %v1194_v3  ;;  %v5697_v26 = vpop.eup %5696 }
 0x2ed   : > { %v1199_v11 = vadd.f32 0.5, %v1198_v5  ;;  %v1203_v34 = vmul.f32 0.5, %v5697_v26 }
 0x2ee   : > { %v1206_v12 = vmul.f32 %v5695_v9, %v1195_v7 }
 0x2ef   : > { %v1205_v15 = vmul.f32 0.0, %v1199_v11  ;;  %v1204_v35 = vadd.f32 0.5, %v1203_v34 }
 0x2f1   : > { %v6690_v22 = vadd.f32 %v1206_v12, %v1205_v15 }
 0x2f3   : > { %5698 = vtanh.f32 %v6690_v22 }
 0x2fd   : > { %v5699_v39 = vpop.eup %5698 }
 0x2fe   : > { %v6693_v42 = vmul.f32 %v5699_v39, %v1204_v35 }
 0x300   : > { %1276 = vmatmul.mubr.f32.vlgmr.msra.gmra.mrb[2].mxu0 %v6693_v42  ;;  %1347 = vmatmul.mubr.f32.vlgmr.msra.gmra.mrb[2].mxu1 %v6693_v42 }
 0x301   : > { %4460 = vmatpush1.bf16.msra.mxu0 %v6511_v28  ;;  %4492 = vmatpush1.bf16.msra.mxu1 %v6514_v31 }
 0x302   : > { %4462 = vmatprep.subr.bf16.mxu0 %v6517_v36  ;;  %4494 = vmatprep.subr.bf16.mxu1 %v6520_v40 }
 0x303   : > { %1440 = vmatprep.mubr.f32.mxu0 %v6148_v44  ;;  %1511 = vmatprep.mubr.f32.mxu1 %v6148_v44 }
 0x305   : > { %4464 = vmatpush1.bf16.msra.mxu0 %v6523_v43  ;;  %4496 = vmatpush1.bf16.msra.mxu1 %v6527_v49 }
 0x306   : > { %4466 = vmatprep.subr.bf16.mxu0 %v6531_v52  ;;  %4498 = vmatprep.subr.bf16.mxu1 %v6535_v57 }
 0x309   : > { %4468 = vmatpush1.bf16.msra.mxu0 %v6538_v62  ;;  %4500 = vmatpush1.bf16.msra.mxu1 %v6542_v1 }
 0x30a   : > { %4470 = vmatprep.subr.bf16.mxu0 %v6546_v4  ;;  %4502 = vmatprep.subr.bf16.mxu1 %v6550_v8 }
 0x30d   : > { %4472 = vmatpush1.bf16.msra.mxu0 %v6553_v13  ;;  %4504 = vmatpush1.bf16.msra.mxu1 %v6557_v16 }
 0x30e   : > { %4474 = vmatprep.subr.bf16.mxu0 %v6561_v20  ;;  %4506 = vmatprep.subr.bf16.mxu1 %v6565_v25 }
 0x311   : > { %4476 = vmatpush1.bf16.msra.mxu0 %v6568_v30  ;;  %4508 = vmatpush1.bf16.msra.mxu1 %v6572_v56 }
 0x312   : > { %4478 = vmatprep.subr.bf16.mxu0 %v6576_v37  ;;  %4510 = vmatprep.subr.bf16.mxu1 %v6579_v41 }
 0x315   : > { %4480 = vmatpush1.bf16.msra.mxu0 %v6582_v47  ;;  %4512 = vmatpush1.bf16.msra.mxu1 %v6586_v51 }
 0x316   : > { %4482 = vmatprep.subr.bf16.mxu0 %v6590_v55  ;;  %4514 = vmatprep.subr.bf16.mxu1 %v6593_v60 }
 0x319   : > { %4484 = vmatpush1.bf16.msra.mxu0 %v6596_v2  ;;  %4516 = vmatpush1.bf16.msra.mxu1 %v6600_v6 }
 0x31a   : > { %4486 = vmatprep.subr.bf16.mxu0 %v6604_v10  ;;  %4518 = vmatprep.subr.bf16.mxu1 %v6607_v14 }
 0x31d   : > { %4488 = vmatpush1.bf16.msra.mxu0 %v6610_v17  ;;  %4520 = vmatpush1.bf16.msra.mxu1 %v6614_v19 }
 0x31e   : > { %4522 = vmatprep.subr.bf16.mxu0 %v6506_v18  ;;  %4554 = vmatprep.subr.bf16.mxu1 %v6508_v21 }
 0x3d3   : > { %v1277_v46 = vpop.f32.mrb[2].mxu0  ;;  %v1348_v48 = vpop.f32.mrb[2].mxu1 }
 0x3d4   : > { %v5435_v50 = vadd.f32 %v1277_v46, %v6670_v29  ;;  %v1279_v53 = vpop.f32.mrb[3].mxu0  ;;  %v1350_v54 = vpop.f32.mrb[3].mxu1  ;;  %v5451_v0 = vadd.f32 %v1348_v48, %v6680_v38 }
 0x3d5   : > { %v5436_v59 = vadd.f32 %v1279_v53, %v6675_v33  ;;  %v5452_v3 = vadd.f32 %v1350_v54, %v6687_v58 }
 0x3d6   : > { %v1357_v61 = vmul.f32 0.5, %v5435_v50 }
 0x3d7   : > { %v1361_v63 = vmul.f32 0.5, %v5436_v59  ;;  %v1366_v5 = vmul.f32 0.5, %v5452_v3 }
 0x3d8   : > { %5700 = vtanh.f32 %v1357_v61 }
 0x3d9   : > { %5702 = vtanh.f32 %v1361_v63 }
 0x3da   : > { %5704 = vtanh.f32 %v5451_v0 }
 0x3db   : > { %5706 = vtanh.f32 %v1366_v5 }
 0x3e2   : > { %v5701_v7 = vpop.eup %5700 }
 0x3e3   : > { %v5703_v9 = vpop.eup %5702  ;;  %v1359_v11 = vmul.f32 0.5, %v5701_v7 }
 0x3e4   : > { %v1363_v12 = vmul.f32 0.5, %v5703_v9  ;;  %v5705_v26 = vpop.eup %5704 }
 0x3e5   : > { %v1360_v15 = vadd.f32 0.5, %v1359_v11  ;;  %v5707_v48 = vpop.eup %5706 }
 0x3e6   : > { %v1364_v34 = vadd.f32 0.5, %v1363_v12  ;;  %v1368_v50 = vmul.f32 0.5, %v5707_v48 }
 0x3e7   : > { %v1371_v35 = vmul.f32 %v5705_v26, %v1360_v15 }
 0x3e8   : > { %v1370_v39 = vmul.f32 %v1364_v34, %v6690_v22  ;;  %v1369_v53 = vadd.f32 0.5, %v1368_v50 }
 0x3ea   : > { %v6736_v46 = vadd.f32 %v1371_v35, %v1370_v39 }
 0x3ec   : > { %5708 = vtanh.f32 %v6736_v46 }
 0x3f6   : > { %v5709_v54 = vpop.eup %5708 }
 0x3f7   : > { %v6739_v59 = vmul.f32 %v5709_v54, %v1369_v53 }
 0x3f9   : > { %1441 = vmatmul.mubr.f32.vlgmr.msra.gmra.mrb[4].mxu0 %v6739_v59  ;;  %1512 = vmatmul.mubr.f32.vlgmr.msra.gmra.mrb[4].mxu1 %v6739_v59 }
 0x3fa   : > { %4524 = vmatpush1.bf16.msra.mxu0 %v6511_v28  ;;  %4556 = vmatpush1.bf16.msra.mxu1 %v6514_v31 }
 0x3fb   : > { %4526 = vmatprep.subr.bf16.mxu0 %v6517_v36  ;;  %4558 = vmatprep.subr.bf16.mxu1 %v6520_v40 }
 0x3fc   : > { %1605 = vmatprep.mubr.f32.mxu0 %v6148_v44  ;;  %1676 = vmatprep.mubr.f32.mxu1 %v6148_v44 }
 0x3fe   : > { %4528 = vmatpush1.bf16.msra.mxu0 %v6523_v43  ;;  %4560 = vmatpush1.bf16.msra.mxu1 %v6527_v49 }
 0x3ff   : > { %4530 = vmatprep.subr.bf16.mxu0 %v6531_v52  ;;  %4562 = vmatprep.subr.bf16.mxu1 %v6535_v57 }
 0x402   : > { %4532 = vmatpush1.bf16.msra.mxu0 %v6538_v62  ;;  %4564 = vmatpush1.bf16.msra.mxu1 %v6542_v1 }
 0x403   : > { %4534 = vmatprep.subr.bf16.mxu0 %v6546_v4  ;;  %4566 = vmatprep.subr.bf16.mxu1 %v6550_v8 }
 0x406   : > { %4536 = vmatpush1.bf16.msra.mxu0 %v6553_v13  ;;  %4568 = vmatpush1.bf16.msra.mxu1 %v6557_v16 }
 0x407   : > { %4538 = vmatprep.subr.bf16.mxu0 %v6561_v20  ;;  %4570 = vmatprep.subr.bf16.mxu1 %v6565_v25 }
 0x40a   : > { %4540 = vmatpush1.bf16.msra.mxu0 %v6568_v30  ;;  %4572 = vmatpush1.bf16.msra.mxu1 %v6572_v56 }
 0x40b   : > { %4542 = vmatprep.subr.bf16.mxu0 %v6576_v37  ;;  %4574 = vmatprep.subr.bf16.mxu1 %v6579_v41 }
 0x40e   : > { %4544 = vmatpush1.bf16.msra.mxu0 %v6582_v47  ;;  %4576 = vmatpush1.bf16.msra.mxu1 %v6586_v51 }
 0x40f   : > { %4546 = vmatprep.subr.bf16.mxu0 %v6590_v55  ;;  %4578 = vmatprep.subr.bf16.mxu1 %v6593_v60 }
 0x412   : > { %4548 = vmatpush1.bf16.msra.mxu0 %v6596_v2  ;;  %4580 = vmatpush1.bf16.msra.mxu1 %v6600_v6 }
 0x413   : > { %4550 = vmatprep.subr.bf16.mxu0 %v6604_v10  ;;  %4582 = vmatprep.subr.bf16.mxu1 %v6607_v14 }
 0x416   : > { %4552 = vmatpush1.bf16.msra.mxu0 %v6610_v17  ;;  %4584 = vmatpush1.bf16.msra.mxu1 %v6614_v19 }
 0x417   : > { %4586 = vmatprep.subr.bf16.mxu0 %v6506_v18  ;;  %4618 = vmatprep.subr.bf16.mxu1 %v6508_v21 }
 0x4cc   : > { %v1442_v22 = vpop.f32.mrb[4].mxu0  ;;  %v1513_v61 = vpop.f32.mrb[4].mxu1 }
 0x4cd   : > { %v5437_v63 = vadd.f32 %v1442_v22, %v6670_v29  ;;  %v1444_v0 = vpop.f32.mrb[5].mxu0  ;;  %v1515_v3 = vpop.f32.mrb[5].mxu1  ;;  %v5453_v11 = vadd.f32 %v1513_v61, %v6680_v38 }
 0x4ce   : > { %v5438_v5 = vadd.f32 %v1444_v0, %v6675_v33  ;;  %v5454_v12 = vadd.f32 %v1515_v3, %v6687_v58 }
 0x4cf   : > { %v1522_v7 = vmul.f32 0.5, %v5437_v63 }
 0x4d0   : > { %v1526_v9 = vmul.f32 0.5, %v5438_v5  ;;  %v1531_v15 = vmul.f32 0.5, %v5454_v12 }
 0x4d1   : > { %5710 = vtanh.f32 %v1522_v7 }
 0x4d2   : > { %5712 = vtanh.f32 %v1526_v9 }
 0x4d3   : > { %5714 = vtanh.f32 %v5453_v11 }
 0x4d4   : > { %5716 = vtanh.f32 %v1531_v15 }
 0x4db   : > { %v5711_v26 = vpop.eup %5710 }
 0x4dc   : > { %v5713_v34 = vpop.eup %5712  ;;  %v1524_v35 = vmul.f32 0.5, %v5711_v26 }
 0x4dd   : > { %v1528_v39 = vmul.f32 0.5, %v5713_v34  ;;  %v5715_v50 = vpop.eup %5714 }
 0x4de   : > { %v1525_v48 = vadd.f32 0.5, %v1524_v35  ;;  %v5717_v61 = vpop.eup %5716 }
 0x4df   : > { %v1529_v53 = vadd.f32 0.5, %v1528_v39  ;;  %v1533_v0 = vmul.f32 0.5, %v5717_v61 }
 0x4e0   : > { %v1536_v54 = vmul.f32 %v5715_v50, %v1525_v48 }
 0x4e1   : > { %v1535_v22 = vmul.f32 %v1529_v53, %v6736_v46  ;;  %v1534_v5 = vadd.f32 0.5, %v1533_v0 }
 0x4e3   : > { %v6782_v63 = vadd.f32 %v1536_v54, %v1535_v22 }
 0x4e5   : > { %5718 = vtanh.f32 %v6782_v63 }
 0x4ef   : > { %v5719_v3 = vpop.eup %5718 }
 0x4f0   : > { %v6785_v7 = vmul.f32 %v5719_v3, %v1534_v5 }
 0x4f2   : > { %1606 = vmatmul.mubr.f32.vlgmr.msra.gmra.mrb[6].mxu0 %v6785_v7  ;;  %1677 = vmatmul.mubr.f32.vlgmr.msra.gmra.mrb[6].mxu1 %v6785_v7 }
 0x4f3   : > { %4588 = vmatpush1.bf16.msra.mxu0 %v6511_v28  ;;  %4620 = vmatpush1.bf16.msra.mxu1 %v6514_v31 }
 0x4f4   : > { %4590 = vmatprep.subr.bf16.mxu0 %v6517_v36  ;;  %4622 = vmatprep.subr.bf16.mxu1 %v6520_v40 }
 0x4f5   : > { %1770 = vmatprep.mubr.f32.mxu0 %v6148_v44  ;;  %1841 = vmatprep.mubr.f32.mxu1 %v6148_v44 }
 0x4f7   : > { %4592 = vmatpush1.bf16.msra.mxu0 %v6523_v43  ;;  %4624 = vmatpush1.bf16.msra.mxu1 %v6527_v49 }
 0x4f8   : > { %4594 = vmatprep.subr.bf16.mxu0 %v6531_v52  ;;  %4626 = vmatprep.subr.bf16.mxu1 %v6535_v57 }
 0x4fb   : > { %4596 = vmatpush1.bf16.msra.mxu0 %v6538_v62  ;;  %4628 = vmatpush1.bf16.msra.mxu1 %v6542_v1 }
 0x4fc   : > { %4598 = vmatprep.subr.bf16.mxu0 %v6546_v4  ;;  %4630 = vmatprep.subr.bf16.mxu1 %v6550_v8 }
 0x4ff   : > { %4600 = vmatpush1.bf16.msra.mxu0 %v6553_v13  ;;  %4632 = vmatpush1.bf16.msra.mxu1 %v6557_v16 }
 0x500   : > { %4602 = vmatprep.subr.bf16.mxu0 %v6561_v20  ;;  %4634 = vmatprep.subr.bf16.mxu1 %v6565_v25 }
 0x503   : > { %4604 = vmatpush1.bf16.msra.mxu0 %v6568_v30  ;;  %4636 = vmatpush1.bf16.msra.mxu1 %v6572_v56 }
 0x504   : > { %4606 = vmatprep.subr.bf16.mxu0 %v6576_v37  ;;  %4638 = vmatprep.subr.bf16.mxu1 %v6579_v41 }
 0x507   : > { %4608 = vmatpush1.bf16.msra.mxu0 %v6582_v47  ;;  %4640 = vmatpush1.bf16.msra.mxu1 %v6586_v51 }
 0x508   : > { %4610 = vmatprep.subr.bf16.mxu0 %v6590_v55  ;;  %4642 = vmatprep.subr.bf16.mxu1 %v6593_v60 }
 0x50b   : > { %4612 = vmatpush1.bf16.msra.mxu0 %v6596_v2  ;;  %4644 = vmatpush1.bf16.msra.mxu1 %v6600_v6 }
 0x50c   : > { %4614 = vmatprep.subr.bf16.mxu0 %v6604_v10  ;;  %4646 = vmatprep.subr.bf16.mxu1 %v6607_v14 }
 0x50f   : > { %4616 = vmatpush1.bf16.msra.mxu0 %v6610_v17  ;;  %4648 = vmatpush1.bf16.msra.mxu1 %v6614_v19 }
 0x510   : > { %4650 = vmatprep.subr.bf16.mxu0 %v6506_v18  ;;  %4682 = vmatprep.subr.bf16.mxu1 %v6508_v21 }
 0x5c5   : > { %v1607_v46 = vpop.f32.mrb[6].mxu0  ;;  %v1678_v9 = vpop.f32.mrb[6].mxu1 }
 0x5c6   : > { %v5439_v11 = vadd.f32 %v1607_v46, %v6670_v29  ;;  %v1609_v12 = vpop.f32.mrb[7].mxu0  ;;  %v1680_v15 = vpop.f32.mrb[7].mxu1  ;;  %v5455_v39 = vadd.f32 %v1678_v9, %v6680_v38 }
 0x5c7   : > { %v5440_v26 = vadd.f32 %v1609_v12, %v6675_v33  ;;  %v5456_v48 = vadd.f32 %v1680_v15, %v6687_v58 }
 0x5c8   : > { %v1687_v34 = vmul.f32 0.5, %v5439_v11 }
 0x5c9   : > { %v1691_v35 = vmul.f32 0.5, %v5440_v26  ;;  %v1696_v50 = vmul.f32 0.5, %v5456_v48 }
 0x5ca   : > { %5720 = vtanh.f32 %v1687_v34 }
 0x5cb   : > { %5722 = vtanh.f32 %v1691_v35 }
 0x5cc   : > { %5724 = vtanh.f32 %v5455_v39 }
 0x5cd   : > { %5726 = vtanh.f32 %v1696_v50 }
 0x5d4   : > { %v5721_v53 = vpop.eup %5720 }
 0x5d5   : > { %v5723_v54 = vpop.eup %5722  ;;  %v1689_v22 = vmul.f32 0.5, %v5721_v53 }
 0x5d6   : > { %v1693_v61 = vmul.f32 0.5, %v5723_v54  ;;  %v5725_v5 = vpop.eup %5724 }
 0x5d7   : > { %v1690_v0 = vadd.f32 0.5, %v1689_v22  ;;  %v5727_v9 = vpop.eup %5726 }
 0x5d8   : > { %v1694_v3 = vadd.f32 0.5, %v1693_v61  ;;  %v1698_v26 = vmul.f32 0.5, %v5727_v9 }
 0x5d9   : > { %v1701_v46 = vmul.f32 %v5725_v5, %v1690_v0 }
 0x5da   : > { %v1700_v11 = vmul.f32 %v1694_v3, %v6782_v63  ;;  %v1699_v34 = vadd.f32 0.5, %v1698_v26 }
 0x5dc   : > { %v6828_v12 = vadd.f32 %v1701_v46, %v1700_v11 }
 0x5de   : > { %5728 = vtanh.f32 %v6828_v12 }
 0x5e8   : > { %v5729_v15 = vpop.eup %5728 }
 0x5e9   : > { %v6831_v35 = vmul.f32 %v5729_v15, %v1699_v34 }
 0x5eb   : > { %1771 = vmatmul.mubr.f32.vlgmr.msra.gmra.mrb[8].mxu0 %v6831_v35  ;;  %1842 = vmatmul.mubr.f32.vlgmr.msra.gmra.mrb[8].mxu1 %v6831_v35 }
 0x5ec   : > { %4652 = vmatpush1.bf16.msra.mxu0 %v6511_v28  ;;  %4684 = vmatpush1.bf16.msra.mxu1 %v6514_v31 }
 0x5ed   : > { %4654 = vmatprep.subr.bf16.mxu0 %v6517_v36  ;;  %4686 = vmatprep.subr.bf16.mxu1 %v6520_v40 }
 0x5ee   : > { %1935 = vmatprep.mubr.f32.mxu0 %v6148_v44  ;;  %2006 = vmatprep.mubr.f32.mxu1 %v6148_v44 }
 0x5f0   : > { %4656 = vmatpush1.bf16.msra.mxu0 %v6523_v43  ;;  %4688 = vmatpush1.bf16.msra.mxu1 %v6527_v49 }
 0x5f1   : > { %4658 = vmatprep.subr.bf16.mxu0 %v6531_v52  ;;  %4690 = vmatprep.subr.bf16.mxu1 %v6535_v57 }
 0x5f4   : > { %4660 = vmatpush1.bf16.msra.mxu0 %v6538_v62  ;;  %4692 = vmatpush1.bf16.msra.mxu1 %v6542_v1 }
 0x5f5   : > { %4662 = vmatprep.subr.bf16.mxu0 %v6546_v4  ;;  %4694 = vmatprep.subr.bf16.mxu1 %v6550_v8 }
 0x5f8   : > { %4664 = vmatpush1.bf16.msra.mxu0 %v6553_v13  ;;  %4696 = vmatpush1.bf16.msra.mxu1 %v6557_v16 }
 0x5f9   : > { %4666 = vmatprep.subr.bf16.mxu0 %v6561_v20  ;;  %4698 = vmatprep.subr.bf16.mxu1 %v6565_v25 }
 0x5fc   : > { %4668 = vmatpush1.bf16.msra.mxu0 %v6568_v30  ;;  %4700 = vmatpush1.bf16.msra.mxu1 %v6572_v56 }
 0x5fd   : > { %4670 = vmatprep.subr.bf16.mxu0 %v6576_v37  ;;  %4702 = vmatprep.subr.bf16.mxu1 %v6579_v41 }
 0x600   : > { %4672 = vmatpush1.bf16.msra.mxu0 %v6582_v47  ;;  %4704 = vmatpush1.bf16.msra.mxu1 %v6586_v51 }
 0x601   : > { %4674 = vmatprep.subr.bf16.mxu0 %v6590_v55  ;;  %4706 = vmatprep.subr.bf16.mxu1 %v6593_v60 }
 0x604   : > { %4676 = vmatpush1.bf16.msra.mxu0 %v6596_v2  ;;  %4708 = vmatpush1.bf16.msra.mxu1 %v6600_v6 }
 0x605   : > { %4678 = vmatprep.subr.bf16.mxu0 %v6604_v10  ;;  %4710 = vmatprep.subr.bf16.mxu1 %v6607_v14 }
 0x608   : > { %4680 = vmatpush1.bf16.msra.mxu0 %v6610_v17  ;;  %4712 = vmatpush1.bf16.msra.mxu1 %v6614_v19 }
 0x609   : > { %4714 = vmatprep.subr.bf16.mxu0 %v6506_v18  ;;  %4746 = vmatprep.subr.bf16.mxu1 %v6508_v21 }
 0x6be   : > { %v1772_v63 = vpop.f32.mrb[8].mxu0  ;;  %v1843_v39 = vpop.f32.mrb[8].mxu1 }
 0x6bf   : > { %v5441_v48 = vadd.f32 %v1772_v63, %v6670_v29  ;;  %v1774_v50 = vpop.f32.mrb[9].mxu0  ;;  %v1845_v53 = vpop.f32.mrb[9].mxu1  ;;  %v5457_v0 = vadd.f32 %v1843_v39, %v6680_v38 }
 0x6c0   : > { %v5442_v54 = vadd.f32 %v1774_v50, %v6675_v33  ;;  %v5458_v5 = vadd.f32 %v1845_v53, %v6687_v58 }
 0x6c1   : > { %v1852_v22 = vmul.f32 0.5, %v5441_v48 }
 0x6c2   : > { %v1856_v61 = vmul.f32 0.5, %v5442_v54  ;;  %v1861_v3 = vmul.f32 0.5, %v5458_v5 }
 0x6c3   : > { %5730 = vtanh.f32 %v1852_v22 }
 0x6c4   : > { %5732 = vtanh.f32 %v1856_v61 }
 0x6c5   : > { %5734 = vtanh.f32 %v5457_v0 }
 0x6c6   : > { %5736 = vtanh.f32 %v1861_v3 }
 0x6cd   : > { %v5731_v46 = vpop.eup %5730 }
 0x6ce   : > { %v5733_v11 = vpop.eup %5732  ;;  %v1854_v9 = vmul.f32 0.5, %v5731_v46 }
 0x6cf   : > { %v1858_v26 = vmul.f32 0.5, %v5733_v11  ;;  %v5735_v15 = vpop.eup %5734 }
 0x6d0   : > { %v1855_v34 = vadd.f32 0.5, %v1854_v9  ;;  %v5737_v39 = vpop.eup %5736 }
 0x6d1   : > { %v1859_v63 = vadd.f32 0.5, %v1858_v26  ;;  %v1863_v54 = vmul.f32 0.5, %v5737_v39 }
 0x6d2   : > { %v1866_v45 = vmul.f32 %v5735_v15, %v1855_v34 }
 0x6d3   : > { %v1865_v48 = vmul.f32 %v1859_v63, %v6828_v12  ;;  %v1864_v22 = vadd.f32 0.5, %v1863_v54 }
 0x6d5   : > { %v6874_v50 = vadd.f32 %v1866_v45, %v1865_v48 }
 0x6d7   : > { %5738 = vtanh.f32 %v6874_v50 }
 0x6e1   : > { %v5739_v53 = vpop.eup %5738 }
 0x6e2   : > { %v6877_v61 = vmul.f32 %v5739_v53, %v1864_v22 }
 0x6e4   : > { %1936 = vmatmul.mubr.f32.vlgmr.msra.gmra.mrb[10].mxu0 %v6877_v61  ;;  %2007 = vmatmul.mubr.f32.vlgmr.msra.gmra.mrb[10].mxu1 %v6877_v61 }
 0x6e5   : > { %4716 = vmatpush1.bf16.msra.mxu0 %v6511_v28  ;;  %4748 = vmatpush1.bf16.msra.mxu1 %v6514_v31 }
 0x6e6   : > { %4718 = vmatprep.subr.bf16.mxu0 %v6517_v36  ;;  %4750 = vmatprep.subr.bf16.mxu1 %v6520_v40 }
 0x6e7   : > { %2100 = vmatprep.mubr.f32.mxu0 %v6148_v44  ;;  %2171 = vmatprep.mubr.f32.mxu1 %v6148_v44 }
 0x6e9   : > { %4720 = vmatpush1.bf16.msra.mxu0 %v6523_v43  ;;  %4752 = vmatpush1.bf16.msra.mxu1 %v6527_v49 }
 0x6ea   : > { %4722 = vmatprep.subr.bf16.mxu0 %v6531_v52  ;;  %4754 = vmatprep.subr.bf16.mxu1 %v6535_v57 }
 0x6ed   : > { %4724 = vmatpush1.bf16.msra.mxu0 %v6538_v62  ;;  %4756 = vmatpush1.bf16.msra.mxu1 %v6542_v1 }
 0x6ee   : > { %4726 = vmatprep.subr.bf16.mxu0 %v6546_v4  ;;  %4758 = vmatprep.subr.bf16.mxu1 %v6550_v8 }
 0x6f1   : > { %4728 = vmatpush1.bf16.msra.mxu0 %v6553_v13  ;;  %4760 = vmatpush1.bf16.msra.mxu1 %v6557_v16 }
 0x6f2   : > { %4730 = vmatprep.subr.bf16.mxu0 %v6561_v20  ;;  %4762 = vmatprep.subr.bf16.mxu1 %v6565_v25 }
 0x6f5   : > { %4732 = vmatpush1.bf16.msra.mxu0 %v6568_v30  ;;  %4764 = vmatpush1.bf16.msra.mxu1 %v6572_v56 }
 0x6f6   : > { %4734 = vmatprep.subr.bf16.mxu0 %v6576_v37  ;;  %4766 = vmatprep.subr.bf16.mxu1 %v6579_v41 }
 0x6f9   : > { %4736 = vmatpush1.bf16.msra.mxu0 %v6582_v47  ;;  %4768 = vmatpush1.bf16.msra.mxu1 %v6586_v51 }
 0x6fa   : > { %4738 = vmatprep.subr.bf16.mxu0 %v6590_v55  ;;  %4770 = vmatprep.subr.bf16.mxu1 %v6593_v60 }
 0x6fd   : > { %4740 = vmatpush1.bf16.msra.mxu0 %v6596_v2  ;;  %4772 = vmatpush1.bf16.msra.mxu1 %v6600_v6 }
 0x6fe   : > { %4742 = vmatprep.subr.bf16.mxu0 %v6604_v10  ;;  %4774 = vmatprep.subr.bf16.mxu1 %v6607_v14 }
 0x701   : > { %4744 = vmatpush1.bf16.msra.mxu0 %v6610_v17  ;;  %4776 = vmatpush1.bf16.msra.mxu1 %v6614_v19 }
 0x702   : > { %4778 = vmatprep.subr.bf16.mxu0 %v6506_v18  ;;  %4810 = vmatprep.subr.bf16.mxu1 %v6508_v21 }
 0x7b7   : > { %v1937_v45 = vpop.f32.mrb[10].mxu0  ;;  %v2008_v12 = vpop.f32.mrb[10].mxu1 }
 0x7b8   : > { %v5443_v0 = vadd.f32 %v1937_v45, %v6670_v29  ;;  %v1939_v5 = vpop.f32.mrb[11].mxu0  ;;  %v2010_v3 = vpop.f32.mrb[11].mxu1  ;;  %v5459_v26 = vadd.f32 %v2008_v12, %v6680_v38 }
 0x7b9   : > { %v5444_v46 = vadd.f32 %v1939_v5, %v6675_v33  ;;  %v5460_v34 = vadd.f32 %v2010_v3, %v6687_v58 }
 0x7ba   : > { %v2017_v11 = vmul.f32 0.5, %v5443_v0 }
 0x7bb   : > { %v2021_v9 = vmul.f32 0.5, %v5444_v46  ;;  %v2026_v18 = vmul.f32 0.5, %v5460_v34  ;;  %v2375_v34 = vld [vmem:[#allocation11 + $0x48] sm:$0xff] }
 0x7bc   : > { %5740 = vtanh.f32 %v2017_v11 }
 0x7bd   : > { %5742 = vtanh.f32 %v2021_v9  ;;  %v2368_v9 = vld [vmem:[#allocation11 + $0x10] sm:$0xff] }
 0x7be   : > { %5744 = vtanh.f32 %v5459_v26  ;;  %v2372_v26 = vld [vmem:[#allocation11 + $0x30] sm:$0xff] }
 0x7bf   : > { %5746 = vtanh.f32 %v2026_v18  ;;  %v2379_v18 = vld [vmem:[#allocation11 + $0x68] sm:$0xff] }
 0x7c6   : > { %v5741_v15 = vpop.eup %5740 }
 0x7c7   : > { %v5743_v21 = vpop.eup %5742  ;;  %v2019_v63 = vmul.f32 0.5, %v5741_v15  ;;  %v2377_v15 = vld [vmem:[#allocation11 + $0x58] sm:$0xff] }
 0x7c8   : > { %v2023_v48 = vmul.f32 0.5, %v5743_v21  ;;  %v5745_v54 = vpop.eup %5744  ;;  %v2381_v21 = vld [vmem:[#allocation11 + $0x78] sm:$0xff] }
 0x7c9   : > { %v2020_v39 = vadd.f32 0.5, %v2019_v63  ;;  %v5747_v12 = vpop.eup %5746 }
 0x7ca   : > { %v2024_v22 = vadd.f32 0.5, %v2023_v48  ;;  %v2028_v5 = vmul.f32 0.5, %v5747_v12  ;;  %v4877_v12 = vpack.c.bf16 %v2381_v21, %v2377_v15  ;;  %v2404_v15 = vld [vmem:[#allocation11 + $0x130] sm:$0xff]  ;;  %v2407_v21 = vld [vmem:[#allocation11 + $0x148] sm:$0xff] }
 0x7cb   : > { %v2031_v53 = vmul.f32 %v5745_v54, %v2020_v39  ;;  %v4875_v54 = vpack.c.bf16 %v2372_v26, %v2368_v9  ;;  %v2402_v9 = vld [vmem:[#allocation11 + $0x120] sm:$0xff] }
 0x7cc   : > { %v2030_v45 = vmul.f32 %v2024_v22, %v6874_v50  ;;  %v2029_v46 = vadd.f32 0.5, %v2028_v5  ;;  %v2370_v50 = vld [vmem:[#allocation11 + $0x20] sm:$0xff]  ;;  %v2376_v5 = vld [vmem:[#allocation11 + $0x50] sm:$0xff] }
 0x7cd   : > { %v2374_v22 = vld [vmem:[#allocation11 + $0x40] sm:$0xff] }
 0x7ce   : > { %v6920_v0 = vadd.f32 %v2031_v53, %v2030_v45  ;;  %v2378_v53 = vld [vmem:[#allocation11 + $0x60] sm:$0xff] }
 0x7d0   : > { %5748 = vtanh.f32 %v6920_v0 }
 0x7da   : > { %v5749_v3 = vpop.eup %5748 }
 0x7db   : > { %v6923_v11 = vmul.f32 %v5749_v3, %v2029_v46  ;;  %v2380_v46 = vld [vmem:[#allocation11 + $0x70] sm:$0xff]  ;;  %v2383_v3 = vld [vmem:[#allocation11 + $0x88] sm:$0xff] }
 0x7dd   : > { %2101 = vmatmul.mubr.f32.vlgmr.msra.gmra.mrb[12].mxu0 %v6923_v11  ;;  %2172 = vmatmul.mubr.f32.vlgmr.msra.gmra.mrb[12].mxu1 %v6923_v11 }
 0x7de   : > { %4780 = vmatpush1.bf16.msra.mxu0 %v6511_v28  ;;  %4812 = vmatpush1.bf16.msra.mxu1 %v6514_v31  ;;  %v2367_v28 = vld [vmem:[#allocation11 + $0x8] sm:$0xff] }
 0x7df   : > { %4782 = vmatprep.subr.bf16.mxu0 %v6517_v36  ;;  %4814 = vmatprep.subr.bf16.mxu1 %v6520_v40  ;;  %v2371_v31 = vld [vmem:[#allocation11 + $0x28] sm:$0xff]  ;;  %v2369_v36 = vld [vmem:[#allocation11 + $0x18] sm:$0xff] }
 0x7e0   : > { %2265 = vmatprep.mubr.f32.mxu0 %v6148_v44  ;;  %2336 = vmatprep.mubr.f32.mxu1 %v6148_v44  ;;  %v4841_v40 = vpack.c.bf16 %v2371_v31, %v2367_v28  ;;  %v2387_v28 = vld [vmem:[#allocation11 + $0xa8] sm:$0xff]  ;;  %v2385_v31 = vld [vmem:[#allocation11 + $0x98] sm:$0xff] }
 0x7e2   : > { %4784 = vmatpush1.bf16.msra.mxu0 %v6523_v43  ;;  %4816 = vmatpush1.bf16.msra.mxu1 %v6527_v49  ;;  %v2373_v43 = vld [vmem:[#allocation11 + $0x38] sm:$0xff] }
 0x7e3   : > { %4786 = vmatprep.subr.bf16.mxu0 %v6531_v52  ;;  %4818 = vmatprep.subr.bf16.mxu1 %v6535_v57  ;;  %v4873_v49 = vpack.c.bf16 %v2373_v43, %v2369_v36  ;;  %v2389_v36 = vld [vmem:[#allocation11 + $0xb8] sm:$0xff]  ;;  %v4879_v43 = vpack.c.bf16 %v2380_v46, %v2376_v5  ;;  %v2408_v46 = vld [vmem:[#allocation11 + $0x150] sm:$0xff] }
 0x7e6   : > { %4788 = vmatpush1.bf16.msra.mxu0 %v6538_v62  ;;  %4820 = vmatpush1.bf16.msra.mxu1 %v6542_v1 }
 0x7e7   : > { %4790 = vmatprep.subr.bf16.mxu0 %v6546_v4  ;;  %4822 = vmatprep.subr.bf16.mxu1 %v6550_v8 }
 0x7ea   : > { %4792 = vmatpush1.bf16.msra.mxu0 %v6553_v13  ;;  %4824 = vmatpush1.bf16.msra.mxu1 %v6557_v16 }
 0x7eb   : > { %4794 = vmatprep.subr.bf16.mxu0 %v6561_v20  ;;  %4826 = vmatprep.subr.bf16.mxu1 %v6565_v25 }
 0x7ee   : > { %4796 = vmatpush1.bf16.msra.mxu0 %v6568_v30  ;;  %4828 = vmatpush1.bf16.msra.mxu1 %v6572_v56 }
 0x7ef   : > { %4798 = vmatprep.subr.bf16.mxu0 %v6576_v37  ;;  %4830 = vmatprep.subr.bf16.mxu1 %v6579_v41 }
 0x7f2   : > { %4800 = vmatpush1.bf16.msra.mxu0 %v6582_v47  ;;  %4832 = vmatpush1.bf16.msra.mxu1 %v6586_v51 }
 0x7f3   : > { %4802 = vmatprep.subr.bf16.mxu0 %v6590_v55  ;;  %4834 = vmatprep.subr.bf16.mxu1 %v6593_v60 }
 0x7f6   : > { %4804 = vmatpush1.bf16.msra.mxu0 %v6596_v2  ;;  %4836 = vmatpush1.bf16.msra.mxu1 %v6600_v6 }
 0x7f7   : > { %4806 = vmatprep.subr.bf16.mxu0 %v6604_v10  ;;  %4838 = vmatprep.subr.bf16.mxu1 %v6607_v14 }
 0x7fa   : > { %4808 = vmatpush1.bf16.msra.mxu0 %v6610_v17  ;;  %4840 = vmatpush1.bf16.msra.mxu1 %v6614_v19  ;;  %v2366_v19 = vld [vmem:[#allocation11] sm:$0xff] }
 0x7fb   : > { %4842 = vmatprep.subr.bf16.mxu0 %v4841_v40  ;;  %4874 = vmatprep.subr.bf16.mxu1 %v4873_v49  ;;  %v4843_v39 = vpack.c.bf16 %v2370_v50, %v2366_v19  ;;  %v4847_v40 = vpack.c.bf16 %v2378_v53, %v2374_v22  ;;  %v2382_v49 = vld [vmem:[#allocation11 + $0x80] sm:$0xff] }
 0x7fc   : > { %v2398_v50 = vld [vmem:[#allocation11 + $0x100] sm:$0xff] }
 0x7fd   : > { %v2406_v53 = vld [vmem:[#allocation11 + $0x140] sm:$0xff] }
 0x8b0   : > { %v2102_v52 = vpop.f32.mrb[12].mxu0  ;;  %v2173_v57 = vpop.f32.mrb[12].mxu1 }
 0x8b1   : > { %v5445_v62 = vadd.f32 %v2102_v52, %v6670_v29  ;;  %v2104_v1 = vpop.f32.mrb[13].mxu0  ;;  %v2175_v4 = vpop.f32.mrb[13].mxu1  ;;  %v5461_v20 = vadd.f32 %v2173_v57, %v6680_v38  ;;  %v2386_v52 = vld [vmem:[#allocation11 + $0xa0] sm:$0xff]  ;;  %v4849_v57 = vpack.c.bf16 %v2387_v28, %v2383_v3  ;;  %v2412_v3 = vld [vmem:[#allocation11 + $0x170] sm:$0xff]  ;;  %v2415_v28 = vld [vmem:[#allocation11 + $0x188] sm:$0xff] }
 0x8b2   : > { %v5446_v8 = vadd.f32 %v2104_v1, %v6675_v33  ;;  %v5462_v25 = vadd.f32 %v2175_v4, %v6687_v58  ;;  %v2384_v1 = vld [vmem:[#allocation11 + $0x90] sm:$0xff] }
 0x8b3   : > { %v2182_v13 = vmul.f32 0.5, %v5445_v62  ;;  %v4881_v62 = vpack.c.bf16 %v2389_v36, %v2385_v31  ;;  %v2388_v4 = vld [vmem:[#allocation11 + $0xb0] sm:$0xff]  ;;  %v2419_v31 = vld [vmem:[#allocation11 + $0x1a8] sm:$0xff]  ;;  %v2417_v36 = vld [vmem:[#allocation11 + $0x198] sm:$0xff] }
 0x8b4   : > { %v2186_v16 = vmul.f32 0.5, %v5446_v8  ;;  %v2191_v30 = vmul.f32 0.5, %v5462_v25  ;;  %v2391_v8 = vld [vmem:[#allocation11 + $0xc8] sm:$0xff]  ;;  %v4851_v25 = vpack.c.bf16 %v2386_v52, %v2382_v49  ;;  %v4895_v49 = vpack.c.bf16 %v2412_v3, %v2408_v46  ;;  %v2414_v52 = vld [vmem:[#allocation11 + $0x180] sm:$0xff] }
 0x8b5   : > { %5750 = vtanh.f32 %v2182_v13  ;;  %v2395_v13 = vld [vmem:[#allocation11 + $0xe8] sm:$0xff] }
 0x8b6   : > { %5752 = vtanh.f32 %v2186_v16  ;;  %v2393_v16 = vld [vmem:[#allocation11 + $0xd8] sm:$0xff] }
 0x8b7   : > { %5754 = vtanh.f32 %v5461_v20  ;;  %v2397_v20 = vld [vmem:[#allocation11 + $0xf8] sm:$0xff] }
 0x8b8   : > { %5756 = vtanh.f32 %v2191_v30  ;;  %v4883_v30 = vpack.c.bf16 %v2388_v4, %v2384_v1  ;;  %v2416_v4 = vld [vmem:[#allocation11 + $0x190] sm:$0xff] }
 0x8bf   : > { %v5751_v56 = vpop.eup %5750 }
 0x8c0   : > { %v5753_v37 = vpop.eup %5752  ;;  %v2184_v41 = vmul.f32 0.5, %v5751_v56  ;;  %v2390_v56 = vld [vmem:[#allocation11 + $0xc0] sm:$0xff] }
 0x8c1   : > { %v2188_v47 = vmul.f32 0.5, %v5753_v37  ;;  %v5755_v55 = vpop.eup %5754  ;;  %v2394_v37 = vld [vmem:[#allocation11 + $0xe0] sm:$0xff] }
 0x8c2   : > { %v2185_v51 = vadd.f32 0.5, %v2184_v41  ;;  %v5757_v14 = vpop.eup %5756  ;;  %v4853_v41 = vpack.c.bf16 %v2395_v13, %v2391_v8  ;;  %v2420_v8 = vld [vmem:[#allocation11 + $0x1b0] sm:$0xff]  ;;  %v2423_v13 = vld [vmem:[#allocation11 + $0x1c8] sm:$0xff] }
 0x8c3   : > { %v2189_v60 = vadd.f32 0.5, %v2188_v47  ;;  %v2193_v17 = vmul.f32 0.5, %v5757_v14  ;;  %v4885_v47 = vpack.c.bf16 %v2397_v20, %v2393_v16  ;;  %v2405_v14 = vld [vmem:[#allocation11 + $0x138] sm:$0xff]  ;;  %v2427_v16 = vld [vmem:[#allocation11 + $0x1e8] sm:$0xff] }
 0x8c4   : > { %v2196_v2 = vmul.f32 %v5755_v55, %v2185_v51  ;;  %v2392_v51 = vld [vmem:[#allocation11 + $0xd0] sm:$0xff]  ;;  %v2425_v20 = vld [vmem:[#allocation11 + $0x1d8] sm:$0xff] }
 0x8c5   : > { %v2195_v6 = vmul.f32 %v2189_v60, %v6920_v0  ;;  %v2194_v63 = vadd.f32 0.5, %v2193_v17  ;;  %v4845_v0 = vpack.c.bf16 %v2379_v18, %v2375_v34  ;;  %v2396_v55 = vld [vmem:[#allocation11 + $0xf0] sm:$0xff]  ;;  %v2399_v60 = vld [vmem:[#allocation11 + $0x108] sm:$0xff]  ;;  %v4855_v17 = vpack.c.bf16 %v2394_v37, %v2390_v56  ;;  %v2422_v37 = vld [vmem:[#allocation11 + $0x1c0] sm:$0xff] }
 0x8c6   : > { %v4887_v19 = vpack.c.bf16 %v2396_v55, %v2392_v51  ;;  %v2400_v18 = vld [vmem:[#allocation11 + $0x110] sm:$0xff]  ;;  %v4899_v56 = vpack.c.bf16 %v2420_v8, %v2416_v4  ;;  %v2426_v51 = vld [vmem:[#allocation11 + $0x1e0] sm:$0xff] }
 0x8c7   : > { %v6964_v10 = vadd.f32 %v2196_v2, %v2195_v6  ;;  %v2403_v2 = vld [vmem:[#allocation11 + $0x128] sm:$0xff]  ;;  %v2401_v6 = vld [vmem:[#allocation11 + $0x118] sm:$0xff]  ;;  %v4891_v22 = vpack.c.bf16 %v2404_v15, %v2400_v18  ;;  %v2424_v55 = vld [vmem:[#allocation11 + $0x1d0] sm:$0xff] }
 0x8c8   : > { %v4857_v26 = vpack.c.bf16 %v2403_v2, %v2399_v60  ;;  %v4889_v34 = vpack.c.bf16 %v2405_v14, %v2401_v6  ;;  %v2428_v60 = vld [vmem:[#allocation11 + $0x1f0] sm:$0xff]  ;;  %v4871_v2 = vpack.c.bf16 %v2426_v51, %v2422_v37  ;;  %v2706_v51 = vld [vmem:[#allocation12 + $0xe0] sm:$0xff] }
 0x8c9   : > { %5758 = vtanh.f32 %v6964_v10  ;;  %v4903_v6 = vpack.c.bf16 %v2428_v60, %v2424_v55 }
 0x8ca   : > { %5760 = vtanh.f32 %v6693_v42 }
 0x8cb   : > { %5762 = vtanh.f32 %v6739_v59 }
 0x8cc   : > { %5764 = vtanh.f32 %v6785_v7 }
 0x8cd   : > { %5766 = vtanh.f32 %v6831_v35 }
 0x8ce   : > { %5768 = vtanh.f32 %v6877_v61 }
 0x8cf   : > { %5770 = vtanh.f32 %v6923_v11 }
 0x8d3   : > { %v5759_v48 = vpop.eup %5758 }
 0x8d4   : > { %v6967_v45 = vmul.f32 %v5759_v48, %v2194_v63  ;;  %v2411_v63 = vld [vmem:[#allocation11 + $0x168] sm:$0xff]  ;;  %v2409_v48 = vld [vmem:[#allocation11 + $0x158] sm:$0xff]  ;;  %v5761_v42 = vpop.eup %5760 }
 0x8d5   : > { %v5763_v59 = vpop.eup %5762 }
 0x8d6   : > { %2266 = vmatmul.mubr.f32.vlgmr.msra.gmra.mrb[14].mxu0 %v6967_v45  ;;  %2337 = vmatmul.mubr.f32.vlgmr.msra.gmra.mrb[14].mxu1 %v6967_v45  ;;  %v5765_v7 = vpop.eup %5764  ;;  %5772 = vtanh.f32 %v6967_v45  ;;  %v2679_v45 = vld [vmem:[#allocation12 + $0x8] sm:$0xff] }
 0x8d7   : > { %4844 = vmatpush1.bf16.msra.mxu0 %v4843_v39  ;;  %4876 = vmatpush1.bf16.msra.mxu1 %v4875_v54  ;;  %v2413_v39 = vld [vmem:[#allocation11 + $0x178] sm:$0xff]  ;;  %v4859_v54 = vpack.c.bf16 %v2402_v9, %v2398_v50  ;;  %v5767_v35 = vpop.eup %5766 }
 0x8d8   : > { %4846 = vmatprep.subr.bf16.mxu0 %v4845_v0  ;;  %4878 = vmatprep.subr.bf16.mxu1 %v4877_v12  ;;  %v2410_v0 = vld [vmem:[#allocation11 + $0x160] sm:$0xff]  ;;  %v4861_v12 = vpack.c.bf16 %v2411_v63, %v2407_v21  ;;  %v4893_v5 = vpack.c.bf16 %v2413_v39, %v2409_v48  ;;  %v5769_v61 = vpop.eup %5768  ;;  %v2685_v9 = vld [vmem:[#allocation12 + $0x38] sm:$0xff]  ;;  %v2680_v21 = vld [vmem:[#allocation12 + $0x10] sm:$0xff] }
 0x8d9   : > { %2516 = vmatprep.mubr.f32.mxu0 %v6148_v44  ;;  %2629 = vmatprep.mubr.f32.mxu1 %v6148_v44  ;;  %v5771_v11 = vpop.eup %5770  ;;  %v2684_v63 = vld [vmem:[#allocation12 + $0x30] sm:$0xff]  ;;  %v2687_v39 = vld [vmem:[#allocation12 + $0x48] sm:$0xff] }
 0x8da   : > { %v7001_v48 = vpack.c.bf16 %v2684_v63, %v2680_v21  ;;  %v2719_v21 = vld [vmem:[#allocation12 + $0x148] sm:$0xff] }
 0x8db   : > { %4848 = vmatpush1.bf16.msra.mxu0 %v4847_v40  ;;  %4880 = vmatpush1.bf16.msra.mxu1 %v4879_v43  ;;  %v2421_v40 = vld [vmem:[#allocation11 + $0x1b8] sm:$0xff]  ;;  %v4863_v43 = vpack.c.bf16 %v2410_v0, %v2406_v53  ;;  %v2723_v63 = vld [vmem:[#allocation12 + $0x168] sm:$0xff] }
 0x8dc   : > { %4850 = vmatprep.subr.bf16.mxu0 %v4849_v57  ;;  %4882 = vmatprep.subr.bf16.mxu1 %v4881_v62  ;;  %v2418_v57 = vld [vmem:[#allocation11 + $0x1a0] sm:$0xff]  ;;  %v4865_v62 = vpack.c.bf16 %v2419_v31, %v2415_v28  ;;  %v4897_v1 = vpack.c.bf16 %v2421_v40, %v2417_v36  ;;  %v2693_v0 = vld [vmem:[#allocation12 + $0x78] sm:$0xff]  ;;  %v2688_v28 = vld [vmem:[#allocation12 + $0x50] sm:$0xff] }
 0x8dd   : > { %v2692_v31 = vld [vmem:[#allocation12 + $0x70] sm:$0xff]  ;;  %v2695_v40 = vld [vmem:[#allocation12 + $0x88] sm:$0xff] }
 0x8de   : > { %v7013_v36 = vpack.c.bf16 %v2692_v31, %v2688_v28  ;;  %v2720_v31 = vld [vmem:[#allocation12 + $0x150] sm:$0xff] }
 0x8df   : > { %4852 = vmatpush1.bf16.msra.mxu0 %v4851_v25  ;;  %4884 = vmatpush1.bf16.msra.mxu1 %v4883_v30  ;;  %v2429_v25 = vld [vmem:[#allocation11 + $0x1f8] sm:$0xff]  ;;  %v4867_v30 = vpack.c.bf16 %v2418_v57, %v2414_v52 }
 0x8e0   : > { %4854 = vmatprep.subr.bf16.mxu0 %v4853_v41  ;;  %4886 = vmatprep.subr.bf16.mxu1 %v4885_v47  ;;  %v4869_v41 = vpack.c.bf16 %v2427_v16, %v2423_v13  ;;  %v4901_v47 = vpack.c.bf16 %v2429_v25, %v2425_v20  ;;  %v5773_v14 = vpop.eup %5772  ;;  %v2701_v57 = vld [vmem:[#allocation12 + $0xb8] sm:$0xff]  ;;  %v2696_v13 = vld [vmem:[#allocation12 + $0x90] sm:$0xff]  ;;  %v2703_v25 = vld [vmem:[#allocation12 + $0xc8] sm:$0xff] }
 0x8e1   : > { %v2700_v16 = vld [vmem:[#allocation12 + $0xb0] sm:$0xff] }
 0x8e2   : > { %v7025_v20 = vpack.c.bf16 %v2700_v16, %v2696_v13 }
 0x8e3   : > { %4856 = vmatpush1.bf16.msra.mxu0 %v4855_v17  ;;  %4888 = vmatpush1.bf16.msra.mxu1 %v4887_v19  ;;  %v2683_v17 = vld [vmem:[#allocation12 + $0x28] sm:$0xff]  ;;  %v2681_v19 = vld [vmem:[#allocation12 + $0x18] sm:$0xff] }
 0x8e4   : > { %4858 = vmatprep.subr.bf16.mxu0 %v4857_v26  ;;  %4890 = vmatprep.subr.bf16.mxu1 %v4889_v34  ;;  %v6994_v50 = vpack.c.bf16 %v2683_v17, %v2679_v45  ;;  %v2678_v26 = vld [vmem:[#allocation12] sm:$0xff]  ;;  %v6996_v18 = vpack.c.bf16 %v2685_v9, %v2681_v19  ;;  %v2712_v9 = vld [vmem:[#allocation12 + $0x110] sm:$0xff] }
 0x8e5   : > { %v2682_v34 = vld [vmem:[#allocation12 + $0x20] sm:$0xff] }
 0x8e6   : > { %v6998_v15 = vpack.c.bf16 %v2682_v34, %v2678_v26  ;;  %v2714_v45 = vld [vmem:[#allocation12 + $0x120] sm:$0xff]  ;;  %v2716_v26 = vld [vmem:[#allocation12 + $0x130] sm:$0xff] }
 0x8e7   : > { %4860 = vmatpush1.bf16.msra.mxu0 %v4859_v54  ;;  %4892 = vmatpush1.bf16.msra.mxu1 %v4891_v22  ;;  %v2691_v54 = vld [vmem:[#allocation12 + $0x68] sm:$0xff]  ;;  %v2689_v22 = vld [vmem:[#allocation12 + $0x58] sm:$0xff]  ;;  %v7049_v34 = vpack.c.bf16 %v2716_v26, %v2712_v9  ;;  %v2736_v26 = vld [vmem:[#allocation12 + $0x1d0] sm:$0xff] }
 0x8e8   : > { %4862 = vmatprep.subr.bf16.mxu0 %v4861_v12  ;;  %4894 = vmatprep.subr.bf16.mxu1 %v4893_v5  ;;  %v7006_v53 = vpack.c.bf16 %v2691_v54, %v2687_v39  ;;  %v2686_v12 = vld [vmem:[#allocation12 + $0x40] sm:$0xff]  ;;  %v7008_v46 = vpack.c.bf16 %v2693_v0, %v2689_v22  ;;  %v2721_v39 = vld [vmem:[#allocation12 + $0x158] sm:$0xff]  ;;  %v7053_v54 = vpack.c.bf16 %v2723_v63, %v2719_v21  ;;  %v2740_v21 = vld [vmem:[#allocation12 + $0x1f0] sm:$0xff] }
 0x8e9   : > { %v2690_v5 = vld [vmem:[#allocation12 + $0x60] sm:$0xff]  ;;  %v2725_v22 = vld [vmem:[#allocation12 + $0x178] sm:$0xff]  ;;  %v7085_v63 = vpack.c.bf16 %v2740_v21, %v2736_v26 }
 0x8ea   : > { %v7010_v3 = vpack.c.bf16 %v2690_v5, %v2686_v12  ;;  %v2718_v0 = vld [vmem:[#allocation12 + $0x140] sm:$0xff]  ;;  %v7056_v5 = vpack.c.bf16 %v2725_v22, %v2721_v39 }
 0x8eb   : > { %4864 = vmatpush1.bf16.msra.mxu0 %v4863_v43  ;;  %4896 = vmatpush1.bf16.msra.mxu1 %v4895_v49  ;;  %v2699_v43 = vld [vmem:[#allocation12 + $0xa8] sm:$0xff]  ;;  %v2697_v49 = vld [vmem:[#allocation12 + $0x98] sm:$0xff]  ;;  %v2722_v12 = vld [vmem:[#allocation12 + $0x160] sm:$0xff] }
 0x8ec   : > { %4866 = vmatprep.subr.bf16.mxu0 %v4865_v62  ;;  %4898 = vmatprep.subr.bf16.mxu1 %v4897_v1  ;;  %v7018_v52 = vpack.c.bf16 %v2699_v43, %v2695_v40  ;;  %v2694_v62 = vld [vmem:[#allocation12 + $0x80] sm:$0xff]  ;;  %v7020_v4 = vpack.c.bf16 %v2701_v57, %v2697_v49  ;;  %v7058_v28 = vpack.c.bf16 %v2722_v12, %v2718_v0  ;;  %v2724_v40 = vld [vmem:[#allocation12 + $0x170] sm:$0xff]  ;;  %v2727_v43 = vld [vmem:[#allocation12 + $0x188] sm:$0xff] }
 0x8ed   : > { %v2698_v1 = vld [vmem:[#allocation12 + $0xa0] sm:$0xff]  ;;  %v7061_v49 = vpack.c.bf16 %v2724_v40, %v2720_v31  ;;  %v2731_v57 = vld [vmem:[#allocation12 + $0x1a8] sm:$0xff] }
 0x8ee   : > { %v7022_v8 = vpack.c.bf16 %v2698_v1, %v2694_v62  ;;  %v2729_v62 = vld [vmem:[#allocation12 + $0x198] sm:$0xff]  ;;  %v7064_v13 = vpack.c.bf16 %v2731_v57, %v2727_v43 }
 0x8ef   : > { %4868 = vmatpush1.bf16.msra.mxu0 %v4867_v30  ;;  %4900 = vmatpush1.bf16.msra.mxu1 %v4899_v56  ;;  %v2707_v30 = vld [vmem:[#allocation12 + $0xe8] sm:$0xff]  ;;  %v2705_v56 = vld [vmem:[#allocation12 + $0xd8] sm:$0xff] }
 0x8f0   : > { %4870 = vmatprep.subr.bf16.mxu0 %v4869_v41  ;;  %4902 = vmatprep.subr.bf16.mxu1 %v4901_v47  ;;  %v7030_v37 = vpack.c.bf16 %v2707_v30, %v2703_v25  ;;  %v2709_v41 = vld [vmem:[#allocation12 + $0xf8] sm:$0xff]  ;;  %v2702_v47 = vld [vmem:[#allocation12 + $0xc0] sm:$0xff] }
 0x8f1   : > { %v7032_v55 = vpack.c.bf16 %v2709_v41, %v2705_v56  ;;  %v7034_v60 = vpack.c.bf16 %v2706_v51, %v2702_v47  ;;  %v2733_v1 = vld [vmem:[#allocation12 + $0x1b8] sm:$0xff]  ;;  %v2726_v25 = vld [vmem:[#allocation12 + $0x180] sm:$0xff]  ;;  %v2728_v56 = vld [vmem:[#allocation12 + $0x190] sm:$0xff] }
 0x8f2   : > { %v7066_v16 = vpack.c.bf16 %v2733_v1, %v2729_v62  ;;  %v2730_v30 = vld [vmem:[#allocation12 + $0x1a0] sm:$0xff]  ;;  %v2732_v47 = vld [vmem:[#allocation12 + $0x1b0] sm:$0xff] }
 0x8f3   : > { %4872 = vmatpush1.bf16.msra.mxu0 %v4871_v2  ;;  %4904 = vmatpush1.bf16.msra.mxu1 %v4903_v6  ;;  %v2704_v2 = vld [vmem:[#allocation12 + $0xd0] sm:$0xff]  ;;  %v7069_v41 = vpack.c.bf16 %v2730_v30, %v2726_v25  ;;  %v7073_v51 = vpack.c.bf16 %v2732_v47, %v2728_v56 }
 0x8f4   : > { %4906 = vmatprep.subr.bf16.mxu0 %v6994_v50  ;;  %4938 = vmatprep.subr.bf16.mxu1 %v6996_v18  ;;  %v2708_v6 = vld [vmem:[#allocation12 + $0xf0] sm:$0xff] }
 0x8f6   : > { %2517 = vmatmul.mubr.f32.vlgmr.msra.gmra.mrb[16].mxu0 %v5761_v42  ;;  %2630 = vmatmul.mubr.f32.vlgmr.msra.gmra.mrb[16].mxu1 %v5761_v42  ;;  %v7037_v42 = vpack.c.bf16 %v2708_v6, %v2704_v2  ;;  %v2735_v2 = vld [vmem:[#allocation12 + $0x1c8] sm:$0xff] }
 0x8f7   : > { %2522 = vmatprep.mubr.f32.mxu0 %v6148_v44  ;;  %2635 = vmatprep.mubr.f32.mxu1 %v6148_v44  ;;  %v2739_v6 = vld [vmem:[#allocation12 + $0x1e8] sm:$0xff] }
 0x8f8   : > { %4908 = vmatpush1.bf16.msra.mxu0 %v6998_v15  ;;  %4940 = vmatpush1.bf16.msra.mxu1 %v7001_v48 }
 0x8f9   : > { %4910 = vmatprep.subr.bf16.mxu0 %v7006_v53  ;;  %4942 = vmatprep.subr.bf16.mxu1 %v7008_v46 }
 0x8fa   : > { %2523 = vmatmul.mubr.f32.gmra.mrb[18].mxu0 %v5763_v59  ;;  %2636 = vmatmul.mubr.f32.gmra.mrb[18].mxu1 %v5763_v59  ;;  %v2711_v59 = vld [vmem:[#allocation12 + $0x108] sm:$0xff] }
 0x8fb   : > { %2528 = vmatprep.mubr.f32.mxu0 %v6148_v44  ;;  %2641 = vmatprep.mubr.f32.mxu1 %v6148_v44 }
 0x8fc   : > { %4912 = vmatpush1.bf16.msra.mxu0 %v7010_v3  ;;  %4944 = vmatpush1.bf16.msra.mxu1 %v7013_v36 }
 0x8fd   : > { %4914 = vmatprep.subr.bf16.mxu0 %v7018_v52  ;;  %4946 = vmatprep.subr.bf16.mxu1 %v7020_v4 }
 0x8fe   : > { %2529 = vmatmul.mubr.f32.gmra.mrb[20].mxu0 %v5765_v7  ;;  %2642 = vmatmul.mubr.f32.gmra.mrb[20].mxu1 %v5765_v7  ;;  %v2715_v7 = vld [vmem:[#allocation12 + $0x128] sm:$0xff] }
 0x8ff   : > { %2534 = vmatprep.mubr.f32.mxu0 %v6148_v44  ;;  %2647 = vmatprep.mubr.f32.mxu1 %v6148_v44 }
 0x900   : > { %4916 = vmatpush1.bf16.msra.mxu0 %v7022_v8  ;;  %4948 = vmatpush1.bf16.msra.mxu1 %v7025_v20 }
 0x901   : > { %4918 = vmatprep.subr.bf16.mxu0 %v7030_v37  ;;  %4950 = vmatprep.subr.bf16.mxu1 %v7032_v55 }
 0x902   : > { %2535 = vmatmul.mubr.f32.gmra.mrb[22].mxu0 %v5767_v35  ;;  %2648 = vmatmul.mubr.f32.gmra.mrb[22].mxu1 %v5767_v35  ;;  %v2713_v35 = vld [vmem:[#allocation12 + $0x118] sm:$0xff] }
 0x903   : > { %2540 = vmatprep.mubr.f32.mxu0 %v6148_v44  ;;  %2653 = vmatprep.mubr.f32.mxu1 %v6148_v44 }
 0x904   : > { %4920 = vmatpush1.bf16.msra.mxu0 %v7034_v60  ;;  %4952 = vmatpush1.bf16.msra.mxu1 %v7037_v42 }
 0x906   : > { %2541 = vmatmul.mubr.f32.gmra.mrb[24].mxu0 %v5769_v61  ;;  %2654 = vmatmul.mubr.f32.gmra.mrb[24].mxu1 %v5769_v61  ;;  %v7042_v61 = vpack.c.bf16 %v2715_v7, %v2711_v59  ;;  %v2737_v59 = vld [vmem:[#allocation12 + $0x1d8] sm:$0xff]  ;;  %v7078_v7 = vpack.c.bf16 %v2739_v6, %v2735_v2 }
 0x907   : > { %2546 = vmatprep.mubr.f32.mxu0 %v6148_v44  ;;  %2659 = vmatprep.mubr.f32.mxu1 %v6148_v44 }
 0x908   : > { %4922 = vmatprep.subr.bf16.mxu0 %v7042_v61 }
 0x90a   : > { %2547 = vmatmul.mubr.f32.gmra.mrb[26].mxu0 %v5771_v11  ;;  %2660 = vmatmul.mubr.f32.gmra.mrb[26].mxu1 %v5771_v11  ;;  %v2717_v11 = vld [vmem:[#allocation12 + $0x138] sm:$0xff] }
 0x90b   : > { %2552 = vmatprep.mubr.f32.mxu0 %v6148_v44  ;;  %2665 = vmatprep.mubr.f32.mxu1 %v6148_v44  ;;  %v7044_v17 = vpack.c.bf16 %v2717_v11, %v2713_v35  ;;  %v2741_v35 = vld [vmem:[#allocation12 + $0x1f8] sm:$0xff]  ;;  %v2734_v11 = vld [vmem:[#allocation12 + $0x1c0] sm:$0xff] }
 0x90d   : > { %4954 = vmatprep.subr.bf16.mxu1 %v7044_v17 }
 0x90e   : > { %2553 = vmatmul.mubr.f32.gmra.mrb[28].mxu0 %v5773_v14  ;;  %2666 = vmatmul.mubr.f32.gmra.mrb[28].mxu1 %v5773_v14  ;;  %v2710_v14 = vld [vmem:[#allocation12 + $0x100] sm:$0xff] }
 0x90f   : > { %2558 = vmatprep.mubr.f32.mxu0 %v6148_v44  ;;  %2671 = vmatprep.mubr.f32.mxu1 %v6148_v44  ;;  %v7046_v19 = vpack.c.bf16 %v2714_v45, %v2710_v14  ;;  %v2738_v14 = vld [vmem:[#allocation12 + $0x1e0] sm:$0xff]  ;;  %v7080_v45 = vpack.c.bf16 %v2741_v35, %v2737_v59 }
 0x910   : > { %4956 = vmatpush1.bf16.msra.mxu1 %v7049_v34  ;;  %v7082_v9 = vpack.c.bf16 %v2738_v14, %v2734_v11 }
 0x911   : > { %4924 = vmatpush1.bf16.msra.mxu0 %v7046_v19  ;;  %4958 = vmatprep.subr.bf16.mxu1 %v7056_v5 }
 0x912   : > { %4926 = vmatprep.subr.bf16.mxu0 %v7053_v54 }
 0x914   : > { %4960 = vmatpush1.bf16.msra.mxu1 %v7061_v49 }
 0x915   : > { %4928 = vmatpush1.bf16.msra.mxu0 %v7058_v28  ;;  %4962 = vmatprep.subr.bf16.mxu1 %v7066_v16 }
 0x916   : > { %4930 = vmatprep.subr.bf16.mxu0 %v7064_v13 }
 0x918   : > { %4964 = vmatpush1.bf16.msra.mxu1 %v7073_v51 }
 0x919   : > { %4932 = vmatpush1.bf16.msra.mxu0 %v7069_v41  ;;  %4966 = vmatprep.subr.bf16.mxu1 %v7080_v45 }
 0x91a   : > { %4934 = vmatprep.subr.bf16.mxu0 %v7078_v7 }
 0x91c   : > { %4968 = vmatpush1.bf16.msra.mxu1 %v7085_v63 }
 0x91d   : > { %4936 = vmatpush1.bf16.msra.mxu0 %v7082_v9  ;;  %5002 = vmatprep.subr.bf16.mxu1 %v6996_v18 }
 0x91e   : > { %4970 = vmatprep.subr.bf16.mxu0 %v6994_v50 }
 0x9a9   : > { %v2267_v39 = vpop.f32.mrb[14].mxu0  ;;  %v2338_v22 = vpop.f32.mrb[14].mxu1 }
 0x9aa   : > { %v5447_v0 = vadd.f32 %v2267_v39, %v6670_v29  ;;  %v2269_v12 = vpop.f32.mrb[15].mxu0  ;;  %v2340_v31 = vpop.f32.mrb[15].mxu1  ;;  %v5463_v62 = vadd.f32 %v2338_v22, %v6680_v38 }
 0x9ab   : > { %v5448_v40 = vadd.f32 %v2269_v12, %v6675_v33  ;;  %v5464_v1 = vadd.f32 %v2340_v31, %v6687_v58 }
 0x9ac   : > { %v2347_v43 = vmul.f32 0.5, %v5447_v0 }
 0x9ad   : > { %v2351_v57 = vmul.f32 0.5, %v5448_v40  ;;  %v2356_v25 = vmul.f32 0.5, %v5464_v1 }
 0x9ae   : > { %5774 = vtanh.f32 %v2347_v43 }
 0x9af   : > { %5776 = vtanh.f32 %v2351_v57 }
 0x9b0   : > { %5778 = vtanh.f32 %v5463_v62 }
 0x9b1   : > { %5780 = vtanh.f32 %v2356_v25 }
 0x9b8   : > { %v5775_v30 = vpop.eup %5774 }
 0x9b9   : > { %v5777_v56 = vpop.eup %5776  ;;  %v2349_v47 = vmul.f32 0.5, %v5775_v30 }
 0x9ba   : > { %v2353_v2 = vmul.f32 0.5, %v5777_v56  ;;  %v5779_v6 = vpop.eup %5778 }
 0x9bb   : > { %v2350_v29 = vadd.f32 0.5, %v2349_v47  ;;  %v5781_v14 = vpop.eup %5780 }
 0x9bc   : > { %v2354_v59 = vadd.f32 0.5, %v2353_v2  ;;  %v2358_v38 = vmul.f32 0.5, %v5781_v14 }
 0x9bd   : > { %v2361_v35 = vmul.f32 %v5779_v6, %v2350_v29 }
 0x9be   : > { %v2360_v33 = vmul.f32 %v2354_v59, %v6964_v10  ;;  %v2359_v26 = vadd.f32 0.5, %v2358_v38  ;;  %v2430_v10 = vld [vmem:[%s7456_s8] sm:$0xf] }
 0x9bf   : > { %v7140_v22 = vrot.slane %v2430_v10, %v738_v24  ;;  %v7144_v0 = vrot.slane %v2430_v10, %v742_v27  ;;  %v7149_v43 = vrot.slane %v2430_v10, %v746_v32  ;;  %v7487_v27 = vsub.s32 3, %v6661_v23 }
 0x9c0   : > { %v2362_v11 = vadd.f32 %v2361_v35, %v2360_v33 }
 0x9c1   : > { %v7155_v56 = vrot.slane %v2430_v10, %v7487_v27 }
 0x9c2   : > { %5782 = vtanh.f32 %v2362_v11 }
 0x9cc   : > { %v5783_v21 = vpop.eup %5782 }
 0x9cd   : > { %v2364_v39 = vmul.f32 %v5783_v21, %v2359_v26 }
 0x9cf   : > { %5784 = vtanh.f32 %v2364_v39 }
 0x9d9   : > { %v5785_v58 = vpop.eup %5784 }
 0x9da   : > { %2559 = vmatmul.mubr.f32.gmra.mrb[30].mxu0 %v5785_v58  ;;  %2672 = vmatmul.mubr.f32.gmra.mrb[30].mxu1 %v5785_v58 }
 0x9db   : > { %2806 = vmatprep.mubr.f32.mxu0 %v6148_v44  ;;  %2877 = vmatprep.mubr.f32.mxu1 %v6148_v44 }
 0x9de   : > { %2807 = vmatmul.mubr.f32.vlgmr.msra.gmra.mrb[16].mxu0 %v6148_v44  ;;  %2878 = vmatmul.mubr.f32.vlgmr.msra.gmra.mrb[16].mxu1 %v6148_v44 }
 0x9df   : > { %4972 = vmatpush1.bf16.msra.mxu0 %v6998_v15  ;;  %5004 = vmatpush1.bf16.msra.mxu1 %v7001_v48 }
 0x9e0   : > { %4974 = vmatprep.subr.bf16.mxu0 %v7006_v53  ;;  %5006 = vmatprep.subr.bf16.mxu1 %v7008_v46 }
 0x9e1   : > { %2971 = vmatprep.mubr.f32.mxu0 %v6148_v44  ;;  %3042 = vmatprep.mubr.f32.mxu1 %v6148_v44 }
 0x9e3   : > { %4976 = vmatpush1.bf16.msra.mxu0 %v7010_v3  ;;  %5008 = vmatpush1.bf16.msra.mxu1 %v7013_v36 }
 0x9e4   : > { %4978 = vmatprep.subr.bf16.mxu0 %v7018_v52  ;;  %5010 = vmatprep.subr.bf16.mxu1 %v7020_v4 }
 0x9e7   : > { %4980 = vmatpush1.bf16.msra.mxu0 %v7022_v8  ;;  %5012 = vmatpush1.bf16.msra.mxu1 %v7025_v20 }
 0x9e8   : > { %4982 = vmatprep.subr.bf16.mxu0 %v7030_v37  ;;  %5014 = vmatprep.subr.bf16.mxu1 %v7032_v55 }
 0x9eb   : > { %4984 = vmatpush1.bf16.msra.mxu0 %v7034_v60  ;;  %5016 = vmatpush1.bf16.msra.mxu1 %v7037_v42 }
 0x9ec   : > { %4986 = vmatprep.subr.bf16.mxu0 %v7042_v61  ;;  %5018 = vmatprep.subr.bf16.mxu1 %v7044_v17 }
 0x9ef   : > { %4988 = vmatpush1.bf16.msra.mxu0 %v7046_v19  ;;  %5020 = vmatpush1.bf16.msra.mxu1 %v7049_v34 }
 0x9f0   : > { %4990 = vmatprep.subr.bf16.mxu0 %v7053_v54  ;;  %5022 = vmatprep.subr.bf16.mxu1 %v7056_v5 }
 0x9f3   : > { %4992 = vmatpush1.bf16.msra.mxu0 %v7058_v28  ;;  %5024 = vmatpush1.bf16.msra.mxu1 %v7061_v49 }
 0x9f4   : > { %4994 = vmatprep.subr.bf16.mxu0 %v7064_v13  ;;  %5026 = vmatprep.subr.bf16.mxu1 %v7066_v16 }
 0x9f7   : > { %4996 = vmatpush1.bf16.msra.mxu0 %v7069_v41  ;;  %5028 = vmatpush1.bf16.msra.mxu1 %v7073_v51 }
 0x9f8   : > { %4998 = vmatprep.subr.bf16.mxu0 %v7078_v7  ;;  %5030 = vmatprep.subr.bf16.mxu1 %v7080_v45 }
 0x9fb   : > { %5000 = vmatpush1.bf16.msra.mxu0 %v7082_v9  ;;  %5032 = vmatpush1.bf16.msra.mxu1 %v7085_v63 }
 0x9fc   : > { %5034 = vmatprep.subr.bf16.mxu0 %v6994_v50  ;;  %5066 = vmatprep.subr.bf16.mxu1 %v6996_v18 }
 0xab1   : > { %v2808_v12 = vpop.f32.mrb[16].mxu0  ;;  %v2879_v31 = vpop.f32.mrb[16].mxu1 }
 0xab2   : > { %v5465_v40 = vadd.f32 %v2808_v12, %v7140_v22  ;;  %v2810_v57 = vpop.f32.mrb[17].mxu0  ;;  %v2881_v62 = vpop.f32.mrb[17].mxu1  ;;  %v5481_v24 = vadd.f32 %v2879_v31, %v7149_v43 }
 0xab3   : > { %v5466_v1 = vadd.f32 %v2810_v57, %v7144_v0  ;;  %v5482_v47 = vadd.f32 %v2881_v62, %v7155_v56 }
 0xab4   : > { %v2888_v25 = vmul.f32 0.5, %v5465_v40 }
 0xab5   : > { %v2892_v30 = vmul.f32 0.5, %v5466_v1  ;;  %v2897_v2 = vmul.f32 0.5, %v5482_v47 }
 0xab6   : > { %5786 = vtanh.f32 %v2888_v25 }
 0xab7   : > { %5788 = vtanh.f32 %v2892_v30 }
 0xab8   : > { %5790 = vtanh.f32 %v5481_v24 }
 0xab9   : > { %5792 = vtanh.f32 %v2897_v2 }
 0xac0   : > { %v5787_v32 = vpop.eup %5786 }
 0xac1   : > { %v5789_v29 = vpop.eup %5788  ;;  %v2890_v6 = vmul.f32 0.5, %v5787_v32 }
 0xac2   : > { %v2894_v59 = vmul.f32 0.5, %v5789_v29  ;;  %v5791_v33 = vpop.eup %5790 }
 0xac3   : > { %v2891_v35 = vadd.f32 0.5, %v2890_v6  ;;  %v5793_v23 = vpop.eup %5792 }
 0xac4   : > { %v2895_v11 = vadd.f32 0.5, %v2894_v59  ;;  %v2899_v21 = vmul.f32 0.5, %v5793_v23 }
 0xac5   : > { %v2902_v14 = vmul.f32 %v5791_v33, %v2891_v35 }
 0xac6   : > { %v2901_v38 = vmul.f32 0.0, %v2895_v11  ;;  %v2900_v39 = vadd.f32 0.5, %v2899_v21 }
 0xac8   : > { %v7158_v26 = vadd.f32 %v2902_v14, %v2901_v38 }
 0xaca   : > { %5794 = vtanh.f32 %v7158_v26 }
 0xad4   : > { %v5795_v58 = vpop.eup %5794 }
 0xad5   : > { %v2905_v10 = vmul.f32 %v5795_v58, %v2900_v39 }
 0xad7   : > { %5796 = vtanh.f32 %v2905_v10  ;;  %2972 = vmatmul.mubr.f32.vlgmr.msra.gmra.mrb[18].mxu0 %v2905_v10  ;;  %3043 = vmatmul.mubr.f32.vlgmr.msra.gmra.mrb[18].mxu1 %v2905_v10 }
 0xad8   : > { %5036 = vmatpush1.bf16.msra.mxu0 %v6998_v15  ;;  %5068 = vmatpush1.bf16.msra.mxu1 %v7001_v48 }
 0xad9   : > { %5038 = vmatprep.subr.bf16.mxu0 %v7006_v53  ;;  %5070 = vmatprep.subr.bf16.mxu1 %v7008_v46 }
 0xada   : > { %3136 = vmatprep.mubr.f32.mxu0 %v6148_v44  ;;  %3207 = vmatprep.mubr.f32.mxu1 %v6148_v44 }
 0xadc   : > { %5040 = vmatpush1.bf16.msra.mxu0 %v7010_v3  ;;  %5072 = vmatpush1.bf16.msra.mxu1 %v7013_v36 }
 0xadd   : > { %5042 = vmatprep.subr.bf16.mxu0 %v7018_v52  ;;  %5074 = vmatprep.subr.bf16.mxu1 %v7020_v4 }
 0xae0   : > { %5044 = vmatpush1.bf16.msra.mxu0 %v7022_v8  ;;  %5076 = vmatpush1.bf16.msra.mxu1 %v7025_v20 }
 0xae1   : > { %v5797_v12 = vpop.eup %5796  ;;  %5046 = vmatprep.subr.bf16.mxu0 %v7030_v37  ;;  %5078 = vmatprep.subr.bf16.mxu1 %v7032_v55 }
 0xae2   : > { %4062 = vst [vmem:[#allocation14] sm:$0xff] %v5797_v12 }
 0xae4   : > { %5048 = vmatpush1.bf16.msra.mxu0 %v7034_v60  ;;  %5080 = vmatpush1.bf16.msra.mxu1 %v7037_v42 }
 0xae5   : > { %5050 = vmatprep.subr.bf16.mxu0 %v7042_v61  ;;  %5082 = vmatprep.subr.bf16.mxu1 %v7044_v17 }
 0xae8   : > { %5052 = vmatpush1.bf16.msra.mxu0 %v7046_v19  ;;  %5084 = vmatpush1.bf16.msra.mxu1 %v7049_v34 }
 0xae9   : > { %5054 = vmatprep.subr.bf16.mxu0 %v7053_v54  ;;  %5086 = vmatprep.subr.bf16.mxu1 %v7056_v5 }
 0xaec   : > { %5056 = vmatpush1.bf16.msra.mxu0 %v7058_v28  ;;  %5088 = vmatpush1.bf16.msra.mxu1 %v7061_v49 }
 0xaed   : > { %5058 = vmatprep.subr.bf16.mxu0 %v7064_v13  ;;  %5090 = vmatprep.subr.bf16.mxu1 %v7066_v16 }
 0xaf0   : > { %5060 = vmatpush1.bf16.msra.mxu0 %v7069_v41  ;;  %5092 = vmatpush1.bf16.msra.mxu1 %v7073_v51 }
 0xaf1   : > { %5062 = vmatprep.subr.bf16.mxu0 %v7078_v7  ;;  %5094 = vmatprep.subr.bf16.mxu1 %v7080_v45 }
 0xaf4   : > { %5064 = vmatpush1.bf16.msra.mxu0 %v7082_v9  ;;  %5096 = vmatpush1.bf16.msra.mxu1 %v7085_v63 }
 0xaf5   : > { %5098 = vmatprep.subr.bf16.mxu0 %v6994_v50  ;;  %5130 = vmatprep.subr.bf16.mxu1 %v6996_v18 }
 0xbaa   : > { %v2973_v31 = vpop.f32.mrb[18].mxu0  ;;  %v3044_v40 = vpop.f32.mrb[18].mxu1 }
 0xbab   : > { %v5467_v57 = vadd.f32 %v2973_v31, %v7140_v22  ;;  %v2975_v62 = vpop.f32.mrb[19].mxu0  ;;  %v3046_v1 = vpop.f32.mrb[19].mxu1  ;;  %v5483_v27 = vadd.f32 %v3044_v40, %v7149_v43 }
 0xbac   : > { %v5468_v25 = vadd.f32 %v2975_v62, %v7144_v0  ;;  %v5484_v47 = vadd.f32 %v3046_v1, %v7155_v56 }
 0xbad   : > { %v3053_v30 = vmul.f32 0.5, %v5467_v57 }
 0xbae   : > { %v3057_v24 = vmul.f32 0.5, %v5468_v25  ;;  %v3062_v2 = vmul.f32 0.5, %v5484_v47 }
 0xbaf   : > { %5798 = vtanh.f32 %v3053_v30 }
 0xbb0   : > { %5800 = vtanh.f32 %v3057_v24 }
 0xbb1   : > { %5802 = vtanh.f32 %v5483_v27 }
 0xbb2   : > { %5804 = vtanh.f32 %v3062_v2 }
 0xbb9   : > { %v5799_v32 = vpop.eup %5798 }
 0xbba   : > { %v5801_v29 = vpop.eup %5800  ;;  %v3055_v6 = vmul.f32 0.5, %v5799_v32 }
 0xbbb   : > { %v3059_v59 = vmul.f32 0.5, %v5801_v29  ;;  %v5803_v33 = vpop.eup %5802 }
 0xbbc   : > { %v3056_v35 = vadd.f32 0.5, %v3055_v6  ;;  %v5805_v21 = vpop.eup %5804 }
 0xbbd   : > { %v3060_v11 = vadd.f32 0.5, %v3059_v59  ;;  %v3064_v39 = vmul.f32 0.5, %v5805_v21 }
 0xbbe   : > { %v3067_v14 = vmul.f32 %v5803_v33, %v3056_v35 }
 0xbbf   : > { %v3066_v38 = vmul.f32 %v3060_v11, %v7158_v26  ;;  %v3065_v58 = vadd.f32 0.5, %v3064_v39 }
 0xbc1   : > { %v7200_v23 = vadd.f32 %v3067_v14, %v3066_v38 }
 0xbc3   : > { %5806 = vtanh.f32 %v7200_v23 }
 0xbcd   : > { %v5807_v10 = vpop.eup %5806 }
 0xbce   : > { %v3070_v12 = vmul.f32 %v5807_v10, %v3065_v58 }
 0xbd0   : > { %5808 = vtanh.f32 %v3070_v12  ;;  %3137 = vmatmul.mubr.f32.vlgmr.msra.gmra.mrb[20].mxu0 %v3070_v12  ;;  %3208 = vmatmul.mubr.f32.vlgmr.msra.gmra.mrb[20].mxu1 %v3070_v12 }
 0xbd1   : > { %5100 = vmatpush1.bf16.msra.mxu0 %v6998_v15  ;;  %5132 = vmatpush1.bf16.msra.mxu1 %v7001_v48 }
 0xbd2   : > { %5102 = vmatprep.subr.bf16.mxu0 %v7006_v53  ;;  %5134 = vmatprep.subr.bf16.mxu1 %v7008_v46 }
 0xbd3   : > { %3301 = vmatprep.mubr.f32.mxu0 %v6148_v44  ;;  %3372 = vmatprep.mubr.f32.mxu1 %v6148_v44 }
 0xbd5   : > { %5104 = vmatpush1.bf16.msra.mxu0 %v7010_v3  ;;  %5136 = vmatpush1.bf16.msra.mxu1 %v7013_v36 }
 0xbd6   : > { %5106 = vmatprep.subr.bf16.mxu0 %v7018_v52  ;;  %5138 = vmatprep.subr.bf16.mxu1 %v7020_v4 }
 0xbd9   : > { %5108 = vmatpush1.bf16.msra.mxu0 %v7022_v8  ;;  %5140 = vmatpush1.bf16.msra.mxu1 %v7025_v20 }
 0xbda   : > { %v5809_v26 = vpop.eup %5808  ;;  %5110 = vmatprep.subr.bf16.mxu0 %v7030_v37  ;;  %5142 = vmatprep.subr.bf16.mxu1 %v7032_v55 }
 0xbdb   : > { %4063 = vst [vmem:[#allocation14 + $0x8] sm:$0xff] %v5809_v26 }
 0xbdd   : > { %5112 = vmatpush1.bf16.msra.mxu0 %v7034_v60  ;;  %5144 = vmatpush1.bf16.msra.mxu1 %v7037_v42 }
 0xbde   : > { %5114 = vmatprep.subr.bf16.mxu0 %v7042_v61  ;;  %5146 = vmatprep.subr.bf16.mxu1 %v7044_v17 }
 0xbe1   : > { %5116 = vmatpush1.bf16.msra.mxu0 %v7046_v19  ;;  %5148 = vmatpush1.bf16.msra.mxu1 %v7049_v34 }
 0xbe2   : > { %5118 = vmatprep.subr.bf16.mxu0 %v7053_v54  ;;  %5150 = vmatprep.subr.bf16.mxu1 %v7056_v5 }
 0xbe5   : > { %5120 = vmatpush1.bf16.msra.mxu0 %v7058_v28  ;;  %5152 = vmatpush1.bf16.msra.mxu1 %v7061_v49 }
 0xbe6   : > { %5122 = vmatprep.subr.bf16.mxu0 %v7064_v13  ;;  %5154 = vmatprep.subr.bf16.mxu1 %v7066_v16 }
 0xbe9   : > { %5124 = vmatpush1.bf16.msra.mxu0 %v7069_v41  ;;  %5156 = vmatpush1.bf16.msra.mxu1 %v7073_v51 }
 0xbea   : > { %5126 = vmatprep.subr.bf16.mxu0 %v7078_v7  ;;  %5158 = vmatprep.subr.bf16.mxu1 %v7080_v45 }
 0xbed   : > { %5128 = vmatpush1.bf16.msra.mxu0 %v7082_v9  ;;  %5160 = vmatpush1.bf16.msra.mxu1 %v7085_v63 }
 0xbee   : > { %5162 = vmatprep.subr.bf16.mxu0 %v6994_v50  ;;  %5194 = vmatprep.subr.bf16.mxu1 %v6996_v18 }
 0xca3   : > { %v3138_v31 = vpop.f32.mrb[20].mxu0  ;;  %v3209_v40 = vpop.f32.mrb[20].mxu1 }
 0xca4   : > { %v5469_v57 = vadd.f32 %v3138_v31, %v7140_v22  ;;  %v3140_v62 = vpop.f32.mrb[21].mxu0  ;;  %v3211_v1 = vpop.f32.mrb[21].mxu1  ;;  %v5485_v27 = vadd.f32 %v3209_v40, %v7149_v43 }
 0xca5   : > { %v5470_v25 = vadd.f32 %v3140_v62, %v7144_v0  ;;  %v5486_v47 = vadd.f32 %v3211_v1, %v7155_v56 }
 0xca6   : > { %v3218_v30 = vmul.f32 0.5, %v5469_v57 }
 0xca7   : > { %v3222_v24 = vmul.f32 0.5, %v5470_v25  ;;  %v3227_v2 = vmul.f32 0.5, %v5486_v47 }
 0xca8   : > { %5810 = vtanh.f32 %v3218_v30 }
 0xca9   : > { %5812 = vtanh.f32 %v3222_v24 }
 0xcaa   : > { %5814 = vtanh.f32 %v5485_v27 }
 0xcab   : > { %5816 = vtanh.f32 %v3227_v2 }
 0xcb2   : > { %v5811_v32 = vpop.eup %5810 }
 0xcb3   : > { %v5813_v29 = vpop.eup %5812  ;;  %v3220_v6 = vmul.f32 0.5, %v5811_v32 }
 0xcb4   : > { %v3224_v59 = vmul.f32 0.5, %v5813_v29  ;;  %v5815_v33 = vpop.eup %5814 }
 0xcb5   : > { %v3221_v35 = vadd.f32 0.5, %v3220_v6  ;;  %v5817_v39 = vpop.eup %5816 }
 0xcb6   : > { %v3225_v11 = vadd.f32 0.5, %v3224_v59  ;;  %v3229_v58 = vmul.f32 0.5, %v5817_v39 }
 0xcb7   : > { %v3232_v14 = vmul.f32 %v5815_v33, %v3221_v35 }
 0xcb8   : > { %v3231_v38 = vmul.f32 %v3225_v11, %v7200_v23  ;;  %v3230_v10 = vadd.f32 0.5, %v3229_v58 }
 0xcba   : > { %v7242_v21 = vadd.f32 %v3232_v14, %v3231_v38 }
 0xcbc   : > { %5818 = vtanh.f32 %v7242_v21 }
 0xcc6   : > { %v5819_v12 = vpop.eup %5818 }
 0xcc7   : > { %v3235_v26 = vmul.f32 %v5819_v12, %v3230_v10 }
 0xcc9   : > { %5820 = vtanh.f32 %v3235_v26  ;;  %3302 = vmatmul.mubr.f32.vlgmr.msra.gmra.mrb[22].mxu0 %v3235_v26  ;;  %3373 = vmatmul.mubr.f32.vlgmr.msra.gmra.mrb[22].mxu1 %v3235_v26 }
 0xcca   : > { %5164 = vmatpush1.bf16.msra.mxu0 %v6998_v15  ;;  %5196 = vmatpush1.bf16.msra.mxu1 %v7001_v48 }
 0xccb   : > { %5166 = vmatprep.subr.bf16.mxu0 %v7006_v53  ;;  %5198 = vmatprep.subr.bf16.mxu1 %v7008_v46 }
 0xccc   : > { %3466 = vmatprep.mubr.f32.mxu0 %v6148_v44  ;;  %3537 = vmatprep.mubr.f32.mxu1 %v6148_v44 }
 0xcce   : > { %5168 = vmatpush1.bf16.msra.mxu0 %v7010_v3  ;;  %5200 = vmatpush1.bf16.msra.mxu1 %v7013_v36 }
 0xccf   : > { %5170 = vmatprep.subr.bf16.mxu0 %v7018_v52  ;;  %5202 = vmatprep.subr.bf16.mxu1 %v7020_v4 }
 0xcd2   : > { %5172 = vmatpush1.bf16.msra.mxu0 %v7022_v8  ;;  %5204 = vmatpush1.bf16.msra.mxu1 %v7025_v20 }
 0xcd3   : > { %v5821_v23 = vpop.eup %5820  ;;  %5174 = vmatprep.subr.bf16.mxu0 %v7030_v37  ;;  %5206 = vmatprep.subr.bf16.mxu1 %v7032_v55 }
 0xcd4   : > { %4064 = vst [vmem:[#allocation14 + $0x10] sm:$0xff] %v5821_v23 }
 0xcd6   : > { %5176 = vmatpush1.bf16.msra.mxu0 %v7034_v60  ;;  %5208 = vmatpush1.bf16.msra.mxu1 %v7037_v42 }
 0xcd7   : > { %5178 = vmatprep.subr.bf16.mxu0 %v7042_v61  ;;  %5210 = vmatprep.subr.bf16.mxu1 %v7044_v17 }
 0xcda   : > { %5180 = vmatpush1.bf16.msra.mxu0 %v7046_v19  ;;  %5212 = vmatpush1.bf16.msra.mxu1 %v7049_v34 }
 0xcdb   : > { %5182 = vmatprep.subr.bf16.mxu0 %v7053_v54  ;;  %5214 = vmatprep.subr.bf16.mxu1 %v7056_v5 }
 0xcde   : > { %5184 = vmatpush1.bf16.msra.mxu0 %v7058_v28  ;;  %5216 = vmatpush1.bf16.msra.mxu1 %v7061_v49 }
 0xcdf   : > { %5186 = vmatprep.subr.bf16.mxu0 %v7064_v13  ;;  %5218 = vmatprep.subr.bf16.mxu1 %v7066_v16 }
 0xce2   : > { %5188 = vmatpush1.bf16.msra.mxu0 %v7069_v41  ;;  %5220 = vmatpush1.bf16.msra.mxu1 %v7073_v51 }
 0xce3   : > { %5190 = vmatprep.subr.bf16.mxu0 %v7078_v7  ;;  %5222 = vmatprep.subr.bf16.mxu1 %v7080_v45 }
 0xce6   : > { %5192 = vmatpush1.bf16.msra.mxu0 %v7082_v9  ;;  %5224 = vmatpush1.bf16.msra.mxu1 %v7085_v63 }
 0xce7   : > { %5226 = vmatprep.subr.bf16.mxu0 %v6994_v50  ;;  %5258 = vmatprep.subr.bf16.mxu1 %v6996_v18 }
 0xd9c   : > { %v3303_v31 = vpop.f32.mrb[22].mxu0  ;;  %v3374_v40 = vpop.f32.mrb[22].mxu1 }
 0xd9d   : > { %v5471_v57 = vadd.f32 %v3303_v31, %v7140_v22  ;;  %v3305_v62 = vpop.f32.mrb[23].mxu0  ;;  %v3376_v1 = vpop.f32.mrb[23].mxu1  ;;  %v5487_v27 = vadd.f32 %v3374_v40, %v7149_v43 }
 0xd9e   : > { %v5472_v25 = vadd.f32 %v3305_v62, %v7144_v0  ;;  %v5488_v47 = vadd.f32 %v3376_v1, %v7155_v56 }
 0xd9f   : > { %v3383_v30 = vmul.f32 0.5, %v5471_v57 }
 0xda0   : > { %v3387_v24 = vmul.f32 0.5, %v5472_v25  ;;  %v3392_v2 = vmul.f32 0.5, %v5488_v47 }
 0xda1   : > { %5822 = vtanh.f32 %v3383_v30 }
 0xda2   : > { %5824 = vtanh.f32 %v3387_v24 }
 0xda3   : > { %5826 = vtanh.f32 %v5487_v27 }
 0xda4   : > { %5828 = vtanh.f32 %v3392_v2 }
 0xdab   : > { %v5823_v32 = vpop.eup %5822 }
 0xdac   : > { %v5825_v29 = vpop.eup %5824  ;;  %v3385_v6 = vmul.f32 0.5, %v5823_v32 }
 0xdad   : > { %v3389_v59 = vmul.f32 0.5, %v5825_v29  ;;  %v5827_v33 = vpop.eup %5826 }
 0xdae   : > { %v3386_v35 = vadd.f32 0.5, %v3385_v6  ;;  %v5829_v58 = vpop.eup %5828 }
 0xdaf   : > { %v3390_v11 = vadd.f32 0.5, %v3389_v59  ;;  %v3394_v10 = vmul.f32 0.5, %v5829_v58 }
 0xdb0   : > { %v3397_v14 = vmul.f32 %v5827_v33, %v3386_v35 }
 0xdb1   : > { %v3396_v38 = vmul.f32 %v3390_v11, %v7242_v21  ;;  %v3395_v12 = vadd.f32 0.5, %v3394_v10 }
 0xdb3   : > { %v7284_v39 = vadd.f32 %v3397_v14, %v3396_v38 }
 0xdb5   : > { %5830 = vtanh.f32 %v7284_v39 }
 0xdbf   : > { %v5831_v26 = vpop.eup %5830 }
 0xdc0   : > { %v3400_v23 = vmul.f32 %v5831_v26, %v3395_v12 }
 0xdc2   : > { %5832 = vtanh.f32 %v3400_v23  ;;  %3467 = vmatmul.mubr.f32.vlgmr.msra.gmra.mrb[24].mxu0 %v3400_v23  ;;  %3538 = vmatmul.mubr.f32.vlgmr.msra.gmra.mrb[24].mxu1 %v3400_v23 }
 0xdc3   : > { %5228 = vmatpush1.bf16.msra.mxu0 %v6998_v15  ;;  %5260 = vmatpush1.bf16.msra.mxu1 %v7001_v48 }
 0xdc4   : > { %5230 = vmatprep.subr.bf16.mxu0 %v7006_v53  ;;  %5262 = vmatprep.subr.bf16.mxu1 %v7008_v46 }
 0xdc5   : > { %3631 = vmatprep.mubr.f32.mxu0 %v6148_v44  ;;  %3702 = vmatprep.mubr.f32.mxu1 %v6148_v44 }
 0xdc7   : > { %5232 = vmatpush1.bf16.msra.mxu0 %v7010_v3  ;;  %5264 = vmatpush1.bf16.msra.mxu1 %v7013_v36 }
 0xdc8   : > { %5234 = vmatprep.subr.bf16.mxu0 %v7018_v52  ;;  %5266 = vmatprep.subr.bf16.mxu1 %v7020_v4 }
 0xdcb   : > { %5236 = vmatpush1.bf16.msra.mxu0 %v7022_v8  ;;  %5268 = vmatpush1.bf16.msra.mxu1 %v7025_v20 }
 0xdcc   : > { %v5833_v21 = vpop.eup %5832  ;;  %5238 = vmatprep.subr.bf16.mxu0 %v7030_v37  ;;  %5270 = vmatprep.subr.bf16.mxu1 %v7032_v55 }
 0xdcd   : > { %4065 = vst [vmem:[#allocation14 + $0x18] sm:$0xff] %v5833_v21 }
 0xdcf   : > { %5240 = vmatpush1.bf16.msra.mxu0 %v7034_v60  ;;  %5272 = vmatpush1.bf16.msra.mxu1 %v7037_v42 }
 0xdd0   : > { %5242 = vmatprep.subr.bf16.mxu0 %v7042_v61  ;;  %5274 = vmatprep.subr.bf16.mxu1 %v7044_v17 }
 0xdd3   : > { %5244 = vmatpush1.bf16.msra.mxu0 %v7046_v19  ;;  %5276 = vmatpush1.bf16.msra.mxu1 %v7049_v34 }
 0xdd4   : > { %5246 = vmatprep.subr.bf16.mxu0 %v7053_v54  ;;  %5278 = vmatprep.subr.bf16.mxu1 %v7056_v5 }
 0xdd7   : > { %5248 = vmatpush1.bf16.msra.mxu0 %v7058_v28  ;;  %5280 = vmatpush1.bf16.msra.mxu1 %v7061_v49 }
 0xdd8   : > { %5250 = vmatprep.subr.bf16.mxu0 %v7064_v13  ;;  %5282 = vmatprep.subr.bf16.mxu1 %v7066_v16 }
 0xddb   : > { %5252 = vmatpush1.bf16.msra.mxu0 %v7069_v41  ;;  %5284 = vmatpush1.bf16.msra.mxu1 %v7073_v51 }
 0xddc   : > { %5254 = vmatprep.subr.bf16.mxu0 %v7078_v7  ;;  %5286 = vmatprep.subr.bf16.mxu1 %v7080_v45 }
 0xddf   : > { %5256 = vmatpush1.bf16.msra.mxu0 %v7082_v9  ;;  %5288 = vmatpush1.bf16.msra.mxu1 %v7085_v63 }
 0xde0   : > { %5290 = vmatprep.subr.bf16.mxu0 %v6994_v50  ;;  %5322 = vmatprep.subr.bf16.mxu1 %v6996_v18 }
 0xe95   : > { %v3468_v31 = vpop.f32.mrb[24].mxu0  ;;  %v3539_v40 = vpop.f32.mrb[24].mxu1 }
 0xe96   : > { %v5473_v57 = vadd.f32 %v3468_v31, %v7140_v22  ;;  %v3470_v62 = vpop.f32.mrb[25].mxu0  ;;  %v3541_v1 = vpop.f32.mrb[25].mxu1  ;;  %v5489_v27 = vadd.f32 %v3539_v40, %v7149_v43 }
 0xe97   : > { %v5474_v25 = vadd.f32 %v3470_v62, %v7144_v0  ;;  %v5490_v47 = vadd.f32 %v3541_v1, %v7155_v56 }
 0xe98   : > { %v3548_v30 = vmul.f32 0.5, %v5473_v57 }
 0xe99   : > { %v3552_v24 = vmul.f32 0.5, %v5474_v25  ;;  %v3557_v2 = vmul.f32 0.5, %v5490_v47 }
 0xe9a   : > { %5834 = vtanh.f32 %v3548_v30 }
 0xe9b   : > { %5836 = vtanh.f32 %v3552_v24 }
 0xe9c   : > { %5838 = vtanh.f32 %v5489_v27 }
 0xe9d   : > { %5840 = vtanh.f32 %v3557_v2 }
 0xea4   : > { %v5835_v32 = vpop.eup %5834 }
 0xea5   : > { %v5837_v29 = vpop.eup %5836  ;;  %v3550_v6 = vmul.f32 0.5, %v5835_v32 }
 0xea6   : > { %v3554_v59 = vmul.f32 0.5, %v5837_v29  ;;  %v5839_v33 = vpop.eup %5838 }
 0xea7   : > { %v3551_v35 = vadd.f32 0.5, %v3550_v6  ;;  %v5841_v10 = vpop.eup %5840 }
 0xea8   : > { %v3555_v11 = vadd.f32 0.5, %v3554_v59  ;;  %v3559_v12 = vmul.f32 0.5, %v5841_v10 }
 0xea9   : > { %v3562_v14 = vmul.f32 %v5839_v33, %v3551_v35 }
 0xeaa   : > { %v3561_v38 = vmul.f32 %v3555_v11, %v7284_v39  ;;  %v3560_v26 = vadd.f32 0.5, %v3559_v12 }
 0xeac   : > { %v7326_v58 = vadd.f32 %v3562_v14, %v3561_v38 }
 0xeae   : > { %5842 = vtanh.f32 %v7326_v58 }
 0xeb8   : > { %v5843_v23 = vpop.eup %5842 }
 0xeb9   : > { %v3565_v21 = vmul.f32 %v5843_v23, %v3560_v26 }
 0xebb   : > { %5844 = vtanh.f32 %v3565_v21  ;;  %3632 = vmatmul.mubr.f32.vlgmr.msra.gmra.mrb[26].mxu0 %v3565_v21  ;;  %3703 = vmatmul.mubr.f32.vlgmr.msra.gmra.mrb[26].mxu1 %v3565_v21 }
 0xebc   : > { %5292 = vmatpush1.bf16.msra.mxu0 %v6998_v15  ;;  %5324 = vmatpush1.bf16.msra.mxu1 %v7001_v48 }
 0xebd   : > { %5294 = vmatprep.subr.bf16.mxu0 %v7006_v53  ;;  %5326 = vmatprep.subr.bf16.mxu1 %v7008_v46 }
 0xebe   : > { %3796 = vmatprep.mubr.f32.mxu0 %v6148_v44  ;;  %3867 = vmatprep.mubr.f32.mxu1 %v6148_v44 }
 0xec0   : > { %5296 = vmatpush1.bf16.msra.mxu0 %v7010_v3  ;;  %5328 = vmatpush1.bf16.msra.mxu1 %v7013_v36 }
 0xec1   : > { %5298 = vmatprep.subr.bf16.mxu0 %v7018_v52  ;;  %5330 = vmatprep.subr.bf16.mxu1 %v7020_v4 }
 0xec4   : > { %5300 = vmatpush1.bf16.msra.mxu0 %v7022_v8  ;;  %5332 = vmatpush1.bf16.msra.mxu1 %v7025_v20 }
 0xec5   : > { %v5845_v39 = vpop.eup %5844  ;;  %5302 = vmatprep.subr.bf16.mxu0 %v7030_v37  ;;  %5334 = vmatprep.subr.bf16.mxu1 %v7032_v55 }
 0xec6   : > { %4066 = vst [vmem:[#allocation14 + $0x20] sm:$0xff] %v5845_v39 }
 0xec8   : > { %5304 = vmatpush1.bf16.msra.mxu0 %v7034_v60  ;;  %5336 = vmatpush1.bf16.msra.mxu1 %v7037_v42 }
 0xec9   : > { %5306 = vmatprep.subr.bf16.mxu0 %v7042_v61  ;;  %5338 = vmatprep.subr.bf16.mxu1 %v7044_v17 }
 0xecc   : > { %5308 = vmatpush1.bf16.msra.mxu0 %v7046_v19  ;;  %5340 = vmatpush1.bf16.msra.mxu1 %v7049_v34 }
 0xecd   : > { %5310 = vmatprep.subr.bf16.mxu0 %v7053_v54  ;;  %5342 = vmatprep.subr.bf16.mxu1 %v7056_v5 }
 0xed0   : > { %5312 = vmatpush1.bf16.msra.mxu0 %v7058_v28  ;;  %5344 = vmatpush1.bf16.msra.mxu1 %v7061_v49 }
 0xed1   : > { %5314 = vmatprep.subr.bf16.mxu0 %v7064_v13  ;;  %5346 = vmatprep.subr.bf16.mxu1 %v7066_v16 }
 0xed4   : > { %5316 = vmatpush1.bf16.msra.mxu0 %v7069_v41  ;;  %5348 = vmatpush1.bf16.msra.mxu1 %v7073_v51 }
 0xed5   : > { %5318 = vmatprep.subr.bf16.mxu0 %v7078_v7  ;;  %5350 = vmatprep.subr.bf16.mxu1 %v7080_v45 }
 0xed8   : > { %5320 = vmatpush1.bf16.msra.mxu0 %v7082_v9  ;;  %5352 = vmatpush1.bf16.msra.mxu1 %v7085_v63 }
 0xed9   : > { %5354 = vmatprep.subr.bf16.mxu0 %v6994_v50  ;;  %5386 = vmatprep.subr.bf16.mxu1 %v6996_v18 }
 0xf8e   : > { %v3633_v31 = vpop.f32.mrb[26].mxu0  ;;  %v3704_v40 = vpop.f32.mrb[26].mxu1 }
 0xf8f   : > { %v5475_v57 = vadd.f32 %v3633_v31, %v7140_v22  ;;  %v3635_v62 = vpop.f32.mrb[27].mxu0  ;;  %v3706_v1 = vpop.f32.mrb[27].mxu1  ;;  %v5491_v27 = vadd.f32 %v3704_v40, %v7149_v43 }
 0xf90   : > { %v5476_v25 = vadd.f32 %v3635_v62, %v7144_v0  ;;  %v5492_v47 = vadd.f32 %v3706_v1, %v7155_v56 }
 0xf91   : > { %v3713_v30 = vmul.f32 0.5, %v5475_v57 }
 0xf92   : > { %v3717_v24 = vmul.f32 0.5, %v5476_v25  ;;  %v3722_v50 = vmul.f32 0.5, %v5492_v47 }
 0xf93   : > { %5846 = vtanh.f32 %v3713_v30 }
 0xf94   : > { %5848 = vtanh.f32 %v3717_v24 }
 0xf95   : > { %5850 = vtanh.f32 %v5491_v27 }
 0xf96   : > { %5852 = vtanh.f32 %v3722_v50 }
 0xf9d   : > { %v5847_v2 = vpop.eup %5846 }
 0xf9e   : > { %v5849_v18 = vpop.eup %5848  ;;  %v3715_v32 = vmul.f32 0.5, %v5847_v2 }
 0xf9f   : > { %v3719_v29 = vmul.f32 0.5, %v5849_v18  ;;  %v5851_v59 = vpop.eup %5850 }
 0xfa0   : > { %v3716_v6 = vadd.f32 0.5, %v3715_v32  ;;  %v5853_v38 = vpop.eup %5852 }
 0xfa1   : > { %v3720_v35 = vadd.f32 0.5, %v3719_v29  ;;  %v3724_v10 = vmul.f32 0.5, %v5853_v38 }
 0xfa2   : > { %v3727_v33 = vmul.f32 %v5851_v59, %v3716_v6 }
 0xfa3   : > { %v3726_v11 = vmul.f32 %v3720_v35, %v7326_v58  ;;  %v3725_v12 = vadd.f32 0.5, %v3724_v10 }
 0xfa5   : > { %v7368_v14 = vadd.f32 %v3727_v33, %v3726_v11 }
 0xfa7   : > { %5854 = vtanh.f32 %v7368_v14 }
 0xfb1   : > { %v5855_v26 = vpop.eup %5854 }
 0xfb2   : > { %v3730_v23 = vmul.f32 %v5855_v26, %v3725_v12 }
 0xfb4   : > { %5856 = vtanh.f32 %v3730_v23  ;;  %3797 = vmatmul.mubr.f32.vlgmr.msra.gmra.mrb[28].mxu0 %v3730_v23  ;;  %3868 = vmatmul.mubr.f32.vlgmr.msra.gmra.mrb[28].mxu1 %v3730_v23 }
 0xfb5   : > { %5356 = vmatpush1.bf16.msra.mxu0 %v6998_v15  ;;  %5388 = vmatpush1.bf16.msra.mxu1 %v7001_v48 }
 0xfb6   : > { %5358 = vmatprep.subr.bf16.mxu0 %v7006_v53  ;;  %5390 = vmatprep.subr.bf16.mxu1 %v7008_v46 }
 0xfb7   : > { %3961 = vmatprep.mubr.f32.mxu0 %v6148_v44  ;;  %4032 = vmatprep.mubr.f32.mxu1 %v6148_v44 }
 0xfb9   : > { %5360 = vmatpush1.bf16.msra.mxu0 %v7010_v3  ;;  %5392 = vmatpush1.bf16.msra.mxu1 %v7013_v36 }
 0xfba   : > { %5362 = vmatprep.subr.bf16.mxu0 %v7018_v52  ;;  %5394 = vmatprep.subr.bf16.mxu1 %v7020_v4 }
 0xfbd   : > { %5364 = vmatpush1.bf16.msra.mxu0 %v7022_v8  ;;  %5396 = vmatpush1.bf16.msra.mxu1 %v7025_v20 }
 0xfbe   : > { %v5857_v15 = vpop.eup %5856  ;;  %5366 = vmatprep.subr.bf16.mxu0 %v7030_v37  ;;  %5398 = vmatprep.subr.bf16.mxu1 %v7032_v55 }
 0xfbf   : > { %4067 = vst [vmem:[#allocation14 + $0x28] sm:$0xff] %v5857_v15 }
 0xfc1   : > { %5368 = vmatpush1.bf16.msra.mxu0 %v7034_v60  ;;  %5400 = vmatpush1.bf16.msra.mxu1 %v7037_v42 }
 0xfc2   : > { %5370 = vmatprep.subr.bf16.mxu0 %v7042_v61  ;;  %5402 = vmatprep.subr.bf16.mxu1 %v7044_v17 }
 0xfc5   : > { %5372 = vmatpush1.bf16.msra.mxu0 %v7046_v19  ;;  %5404 = vmatpush1.bf16.msra.mxu1 %v7049_v34 }
 0xfc6   : > { %5374 = vmatprep.subr.bf16.mxu0 %v7053_v54  ;;  %5406 = vmatprep.subr.bf16.mxu1 %v7056_v5 }
 0xfc9   : > { %5376 = vmatpush1.bf16.msra.mxu0 %v7058_v28  ;;  %5408 = vmatpush1.bf16.msra.mxu1 %v7061_v49 }
 0xfca   : > { %5378 = vmatprep.subr.bf16.mxu0 %v7064_v13  ;;  %5410 = vmatprep.subr.bf16.mxu1 %v7066_v16 }
 0xfcd   : > { %5380 = vmatpush1.bf16.msra.mxu0 %v7069_v41  ;;  %5412 = vmatpush1.bf16.msra.mxu1 %v7073_v51 }
 0xfce   : > { %5382 = vmatprep.subr.bf16.mxu0 %v7078_v7  ;;  %5414 = vmatprep.subr.bf16.mxu1 %v7080_v45 }
 0xfd1   : > { %5384 = vmatpush1.bf16.msra.mxu0 %v7082_v9  ;;  %5416 = vmatpush1.bf16.msra.mxu1 %v7085_v63 }
0x1087   : > { %v3798_v44 = vpop.f32.mrb[28].mxu0  ;;  %v3869_v48 = vpop.f32.mrb[28].mxu1 }
0x1088   : > { %v5477_v53 = vadd.f32 %v3798_v44, %v7140_v22  ;;  %v3800_v46 = vpop.f32.mrb[29].mxu0  ;;  %v3871_v3 = vpop.f32.mrb[29].mxu1  ;;  %v5493_v8 = vadd.f32 %v3869_v48, %v7149_v43 }
0x1089   : > { %v5478_v36 = vadd.f32 %v3800_v46, %v7144_v0  ;;  %v5494_v20 = vadd.f32 %v3871_v3, %v7155_v56 }
0x108a   : > { %v3878_v52 = vmul.f32 0.5, %v5477_v53 }
0x108b   : > { %v3882_v4 = vmul.f32 0.5, %v5478_v36  ;;  %v3887_v37 = vmul.f32 0.5, %v5494_v20 }
0x108c   : > { %5858 = vtanh.f32 %v3878_v52 }
0x108d   : > { %5860 = vtanh.f32 %v3882_v4 }
0x108e   : > { %5862 = vtanh.f32 %v5493_v8 }
0x108f   : > { %5864 = vtanh.f32 %v3887_v37 }
0x1096   : > { %v5859_v55 = vpop.eup %5858 }
0x1097   : > { %v5861_v60 = vpop.eup %5860  ;;  %v3880_v42 = vmul.f32 0.5, %v5859_v55 }
0x1098   : > { %v3884_v61 = vmul.f32 0.5, %v5861_v60  ;;  %v5863_v19 = vpop.eup %5862 }
0x1099   : > { %v3881_v17 = vadd.f32 0.5, %v3880_v42  ;;  %v5865_v49 = vpop.eup %5864 }
0x109a   : > { %v3885_v34 = vadd.f32 0.5, %v3884_v61  ;;  %v3889_v13 = vmul.f32 0.5, %v5865_v49 }
0x109b   : > { %v3892_v54 = vmul.f32 %v5863_v19, %v3881_v17 }
0x109c   : > { %v3891_v5 = vmul.f32 %v3885_v34, %v7368_v14  ;;  %v3890_v16 = vadd.f32 0.5, %v3889_v13 }
0x109e   : > { %v3893_v28 = vadd.f32 %v3892_v54, %v3891_v5 }
0x10a0   : > { %5866 = vtanh.f32 %v3893_v28 }
0x10aa   : > { %v5867_v41 = vpop.eup %5866 }
0x10ab   : > { %v3895_v51 = vmul.f32 %v5867_v41, %v3890_v16 }
0x10ad   : > { %5868 = vtanh.f32 %v3895_v51  ;;  %3962 = vmatmul.mubr.f32.vlgmr.msra.gmra.mrb[30].mxu0 %v3895_v51  ;;  %4033 = vmatmul.mubr.f32.vlgmr.msra.gmra.mrb[30].mxu1 %v3895_v51 }
0x10b7   : > { %v5869_v7 = vpop.eup %5868 }
0x10b8   : > { %4068 = vst [vmem:[#allocation14 + $0x30] sm:$0xff] %v5869_v7 }
0x1180   : > { %v3963_v45 = vpop.f32.mrb[30].mxu0  ;;  %v4034_v9 = vpop.f32.mrb[30].mxu1 }
0x1181   : > { %v5479_v63 = vadd.f32 %v3963_v45, %v7140_v22  ;;  %v3965_v58 = vpop.f32.mrb[31].mxu0  ;;  %v4036_v21 = vpop.f32.mrb[31].mxu1  ;;  %v5495_v57 = vadd.f32 %v4034_v9, %v7149_v43 }
0x1182   : > { %v5480_v39 = vadd.f32 %v3965_v58, %v7144_v0  ;;  %v5496_v62 = vadd.f32 %v4036_v21, %v7155_v56 }
0x1183   : > { %v4043_v31 = vmul.f32 0.5, %v5479_v63 }
0x1184   : > { %v4047_v40 = vmul.f32 0.5, %v5480_v39  ;;  %v4052_v1 = vmul.f32 0.5, %v5496_v62 }
0x1185   : > { %5870 = vtanh.f32 %v4043_v31 }
0x1186   : > { %5872 = vtanh.f32 %v4047_v40 }
0x1187   : > { %5874 = vtanh.f32 %v5495_v57 }
0x1188   : > { %5876 = vtanh.f32 %v4052_v1 }
0x118f   : > { %v5871_v25 = vpop.eup %5870 }
0x1190   : > { %v5873_v30 = vpop.eup %5872  ;;  %v4045_v24 = vmul.f32 0.5, %v5871_v25 }
0x1191   : > { %v4049_v27 = vmul.f32 0.5, %v5873_v30  ;;  %v5875_v47 = vpop.eup %5874 }
0x1192   : > { %v4046_v22 = vadd.f32 0.5, %v4045_v24  ;;  %v5877_v32 = vpop.eup %5876 }
0x1193   : > { %v4050_v50 = vadd.f32 0.5, %v4049_v27  ;;  %v4054_v29 = vmul.f32 0.5, %v5877_v32 }
0x1194   : > { %v4057_v2 = vmul.f32 %v5875_v47, %v4046_v22 }
0x1195   : > { %v4056_v0 = vmul.f32 %v4050_v50, %v3893_v28  ;;  %v4055_v43 = vadd.f32 0.5, %v4054_v29 }
0x1197   : > { %v4058_v18 = vadd.f32 %v4057_v2, %v4056_v0 }
0x1199   : > { %5878 = vtanh.f32 %v4058_v18 }
0x11a3   : > { %v5879_v6 = vpop.eup %5878 }
0x11a4   : > { %v4060_v59 = vmul.f32 %v5879_v6, %v4055_v43 }
0x11a6   : > { %5880 = vtanh.f32 %v4060_v59 }
0x11b0   : > { %v5881_v56 = vpop.eup %5880 }
0x11b1   : > { %4069 = vst [vmem:[#allocation14 + $0x38] sm:$0xff] %v5881_v56 }
0x11b2 PF: > { %p5614_p7 = scmp.eq.s32.totalorder %s6221_s13, 1  ;;  %s6149_s16 = smov [#allocation14]  }
0x11b3   : > { %s4076_s20 = sshll.u32 %s6149_s16, 4  ;;  %s4077_s20 = int_to_ptr.vmem [resolvable:$true] %s4076_s20 }
0x11b4   : > { %s6054_s9 = scalar_lea.vmem %s4077_s20, 1024  ;;  %p6061_p2 = scmp.lt.s32.totalorder %s4077_s20, %s4077_s20 }
0x11b5   : > { %p6055_p1 = scmp.ne.s32.totalorder %s4077_s20, %s6054_s9  ;;  %p6062_p4 = scmp.lt.s32.totalorder %s6054_s9, %s6054_s9 }
0x11b7   : > { %p6056_p10 = pnand %p6055_p1, %p5614_p7  ;;  %p6063_p8 = por %p6062_p4, %p6061_p2 }
0x11b9   : > { %p6057_p5 = pneg %p6056_p10 }
0x11bb   : > { %p6064_p6 = pnand %p6063_p8, %p6057_p5 }
0x11bd   : > { %6067 = shalt.err (!%p6064_p6)
}
0x11be   : > { %s7488_s22 = sld [smem:[#allocation25_spill]] }
0x11c4   : > { %s6068_s19 = scalar_lea.hbm %s7488_s22, 1024 }
0x11c5   : > { %p6069_p12 = scmp.ne.s32.totalorder %s7488_s22, %s6068_s19  ;;  %p6074_p3 = scmp.lt.u32.totalorder %s6068_s19, %s7488_s22 }
0x11c7   : > { %p6070_p13 = pnand %p6069_p12, %p5614_p7 }
0x11c9   : > { %p6071_p0 = pneg %p6070_p13 }
0x11cb   : > { %p6076_p9 = pnand %p6074_p3, %p6071_p0 }
0x11cd   : > { %6079 = shalt.err (!%p6076_p9)
}
0x11ce   : > { %s6150_s17 = smov 128   ;;  %s6151_s25 = smov 8  }
0x11cf   : > { %5582 = dma.vmem_to_hbm [thread:$0]  (%p5614_p7), %s4077_s20, 1024, %s7488_s22, [#allocation5], %s6150_s17, %s6150_s17, %s6151_s25  }
0x11d0   : > { %6117 = dma.done.wait (%p5614_p7), [#allocation5], 1024  }
0x11d1   : > { %6119 = vsyncadd (%p5614_p7), [#allocation5], 4294966272 }
0x11d2 PF: > { %p25_p11 = scmp.ge.s32.totalorder %s6354_s28, 4   ;;  %s7489_s30 = smov %s6126_s10 }
0x11d3   : > { %s7490_s10 = smov %s6130_s11  ;;  %s7491_s11 = smov %s6367_s26 }
0x11d4   : > { %s7492_s12 = smov %s6354_s28  ;;  %27 = sbr.rel (!%p25_p11) target bundleno = 14 (0xe), region = 130 }
0x11db   :  { %4092 = vsyncpa [#allocation4], 1 }
0x11dc   :  { %4094 = vsyncpa [#allocation4 + $0x1], 1 }
0x11dd   :  { %4095 = vsyncpa [#allocation7], 1 }
0x11de   :  { %4097 = vsyncpa [#allocation7 + $0x1], 1 }
0x11df   :  { %4098 = vsyncpa [#allocation10], 1 }
0x11e0   :  { %4099 = vsyncpa [#allocation13], 1 }
0x11e1   :  { %4100 = vsyncpa [#allocation5], 1 }
0x11e2   :  { %4102 = vsyncpa [#allocation5 + $0x1], 1 }

</bundles_post_ra>
